<compile_context>
chip_gen: v7x
topology: tpu7x:2x2x1
jax: 0.10.0
libtpu: 0.0.40
codegen_flags: <defaults>
</compile_context>

<pallas_src>
import jax
import jax.numpy as jnp
from jax.experimental import pallas as pl
from jax.experimental.pallas import tpu as pltpu


def _make_kernel(Cin: int, Cout: int, H: int, W: int):
    Wp = 2 * W + 2          # row length of the column-upsampled, column-padded input
    OW = 2 * W
    Lv = H * Wp             # flat span each tap matmul covers (valid lanes: col < OW)

    def kernel(w_ref, x_ref, o_ref):
        # w_ref: (12, Cout, Cin)  folded sub-pixel weights, t = (a*2 + dy)*3 + kx
        # x_ref: (Cin, (H+3)*Wp)  column-upsampled, edge-padded, row-flattened input
        # o_ref: (Cout, 2H, 2W)   output block for this image
        for a in range(2):                              # output row parity
            acc = None
            for dy in range(2):                         # folded row taps
                for kx in range(3):                     # column taps (cols pre-upsampled)
                    t = (a * 2 + dy) * 3 + kx
                    off = (a + dy) * Wp + kx            # constant flat lane shift
                    term = jnp.dot(
                        w_ref[t], x_ref[:, off:off + Lv],
                        preferred_element_type=jnp.float32)
                    acc = term if acc is None else acc + term
            # acc[:, p*Wp + j] == out[:, 2p+a, j] for j < 2W (j in {2W, 2W+1} is junk
            # from the flat-stride trick and is simply not copied out).
            for p in range(H):
                s = p * Wp
                o_ref[:, 2 * p + a, :] = acc[:, s:s + OW].astype(o_ref.dtype)

    return kernel


def upsample_deconv(x: jax.Array, weight: jax.Array) -> jax.Array:
    """x: (N, Cin, H, W);  weight: (Cout, Cin, 3, 3);  returns (N, Cout, 2H, 2W)."""
    N, Cin, H, W = x.shape
    Cout, Cin_w, KH, KW = weight.shape
    assert Cin_w == Cin and KH == 3 and KW == 3

    OH, OW = 2 * H, 2 * W
    Wp = 2 * W + 2
    Lflat = (H + 3) * Wp    # +1 top edge row, +2 bottom edge rows (halo + overread pad)

    # ---- tiny wrapper-side prep (all ~input-sized or smaller, no transposes) ----
    # Row-parity weight folding: Wr[a, dy, kx] = sum_ky A[a, dy, ky] * w[..., ky, kx]
    A = jnp.array([[[1., 0., 0.], [0., 1., 1.]],
                   [[1., 1., 0.], [0., 0., 1.]]], dtype=weight.dtype)   # A[a, dy, ky]
    wr = jnp.einsum("ady,oiyx->adxoi", A, weight).reshape(12, Cout, Cin)

    # Nearest x2 along columns only, edge pad (== reflect pad of the upsampled image),
    # then a free row-major flatten of the spatial dims.
    xcu = jnp.repeat(x, 2, axis=3)                                       # (N,Cin,H,2W)
    xcp = jnp.pad(xcu, ((0, 0), (0, 0), (1, 2), (1, 1)), mode="edge")    # (N,Cin,H+3,Wp)
    xf = xcp.reshape(N, Cin, Lflat)

    kernel = _make_kernel(Cin, Cout, H, W)

    out = pl.pallas_call(
        kernel,
        out_shape=jax.ShapeDtypeStruct((N, Cout, OH, OW), x.dtype),
        grid_spec=pltpu.PrefetchScalarGridSpec(
            num_scalar_prefetch=0,
            grid=(N,),
            in_specs=[
                pl.BlockSpec((12, Cout, Cin), lambda n: (0, 0, 0)),      # resident weights
                pl.BlockSpec((None, Cin, Lflat), lambda n: (n, 0, 0)),   # per-image input
            ],
            out_specs=pl.BlockSpec((None, Cout, OH, OW), lambda n: (n, 0, 0, 0)),
        ),
        compiler_params=pltpu.CompilerParams(
            dimension_semantics=("parallel",),
        ),
        cost_estimate=pl.CostEstimate(
            flops=2 * N * 12 * Cout * Cin * (H * Wp),
            bytes_accessed=4 * (N * Cin * Lflat + N * Cout * OH * OW + 12 * Cout * Cin),
            transcendentals=0,
        ),
    )(wr, xf)
    return out


def _reference(x, weight):
    """Pure-JAX reference: nearest x2 upsample -> reflect pad 1 -> 3x3 VALID conv."""
    xu = jnp.repeat(jnp.repeat(x, 2, axis=2), 2, axis=3)
    xp = jnp.pad(xu, ((0, 0), (0, 0), (1, 1), (1, 1)), mode="reflect")
    return jax.lax.conv_general_dilated(
        xp, weight, window_strides=(1, 1), padding="VALID",
        dimension_numbers=("NCHW", "OIHW", "NCHW"),
        precision=jax.lax.Precision.HIGHEST)


if __name__ == "__main__":
    key = jax.random.PRNGKey(0)
    kx, kw = jax.random.split(key)

    N, Cin, H, W = 2, 4, 16, 16
    Cout = 8
    x = jax.random.normal(kx, (N, Cin, H, W), dtype=jnp.float32)
    weight = 0.1 * jax.random.normal(kw, (Cout, Cin, 3, 3), dtype=jnp.float32)

    y = jax.jit(upsample_deconv)(x, weight)
    jax.block_until_ready(y)

    y_ref = _reference(x, weight)
    jax.block_until_ready(y_ref)

    assert y.shape == (N, Cout, 2 * H, 2 * W), y.shape
    assert y.dtype == jnp.float32, y.dtype
    max_err = float(jnp.max(jnp.abs(y - y_ref)))
    assert max_err < 1e-3, f"max abs error {max_err}"

    print("KERNEL_OK")
</pallas_src>

<mosaic_0001>
module attributes {stable_mosaic.version = 11 : i64} {
  func.func @kernel(%arg0: i32, %arg1: memref<12x8x4xf32, #tpu.memory_space<vmem>>, %arg2: memref<1x4x646xf32, #tpu.memory_space<vmem>>, %arg3: memref<1x8x32x32xf32, #tpu.memory_space<vmem>>) attributes {dimension_semantics = [#tpu.dimension_semantics<parallel>], iteration_bounds = array<i64: 2>, scalar_prefetch = 0 : i64, scratch_operands = 0 : i64, tpu.core_type = #tpu.core_type<tc>, window_params = [{pipeline_mode = #tpu.pipeline_mode<synchronous>, transform_indices = @transform_0, window_bounds = array<i64: 12, 8, 4>}, {transform_indices = @transform_1, window_bounds = array<i64: 1, 4, 646>}, {transform_indices = @transform_2, window_bounds = array<i64: 1, 8, 32, 32>}]} {
    %c0 = arith.constant 0 : index
    %c0_0 = arith.constant 0 : index
    %c0_1 = arith.constant 0 : index
    %0 = vector.load %arg1[%c0, %c0_0, %c0_1] : memref<12x8x4xf32, #tpu.memory_space<vmem>>, vector<1x8x4xf32>
    %1 = vector.shape_cast %0 : vector<1x8x4xf32> to vector<8x4xf32>
    %c0_2 = arith.constant 0 : index
    %c0_3 = arith.constant 0 : index
    %c0_4 = arith.constant 0 : index
    %2 = vector.load %arg2[%c0_2, %c0_3, %c0_4] : memref<1x4x646xf32, #tpu.memory_space<vmem>>, vector<1x4x544xf32>
    %3 = vector.shape_cast %2 : vector<1x4x544xf32> to vector<4x544xf32>
    %cst = arith.constant dense<0.000000e+00> : vector<8x544xf32>
    %4 = tpu.matmul %1, %3, %cst {dimension_numbers = #tpu.dot_dimension_numbers<[1], [0], [0], [1], [0, 0, 1, 1], [], []>} : vector<8x4xf32>, vector<4x544xf32>, vector<8x544xf32> -> vector<8x544xf32>
    %c1 = arith.constant 1 : index
    %c0_5 = arith.constant 0 : index
    %c0_6 = arith.constant 0 : index
    %5 = vector.load %arg1[%c1, %c0_5, %c0_6] : memref<12x8x4xf32, #tpu.memory_space<vmem>>, vector<1x8x4xf32>
    %6 = vector.shape_cast %5 : vector<1x8x4xf32> to vector<8x4xf32>
    %c0_7 = arith.constant 0 : index
    %c0_8 = arith.constant 0 : index
    %c1_9 = arith.constant 1 : index
    %7 = vector.load %arg2[%c0_7, %c0_8, %c1_9] : memref<1x4x646xf32, #tpu.memory_space<vmem>>, vector<1x4x544xf32>
    %8 = vector.shape_cast %7 : vector<1x4x544xf32> to vector<4x544xf32>
    %cst_10 = arith.constant dense<0.000000e+00> : vector<8x544xf32>
    %9 = tpu.matmul %6, %8, %cst_10 {dimension_numbers = #tpu.dot_dimension_numbers<[1], [0], [0], [1], [0, 0, 1, 1], [], []>} : vector<8x4xf32>, vector<4x544xf32>, vector<8x544xf32> -> vector<8x544xf32>
    %10 = arith.addf %4, %9 : vector<8x544xf32>
    %c2 = arith.constant 2 : index
    %c0_11 = arith.constant 0 : index
    %c0_12 = arith.constant 0 : index
    %11 = vector.load %arg1[%c2, %c0_11, %c0_12] : memref<12x8x4xf32, #tpu.memory_space<vmem>>, vector<1x8x4xf32>
    %12 = vector.shape_cast %11 : vector<1x8x4xf32> to vector<8x4xf32>
    %c0_13 = arith.constant 0 : index
    %c0_14 = arith.constant 0 : index
    %c2_15 = arith.constant 2 : index
    %13 = vector.load %arg2[%c0_13, %c0_14, %c2_15] : memref<1x4x646xf32, #tpu.memory_space<vmem>>, vector<1x4x544xf32>
    %14 = vector.shape_cast %13 : vector<1x4x544xf32> to vector<4x544xf32>
    %cst_16 = arith.constant dense<0.000000e+00> : vector<8x544xf32>
    %15 = tpu.matmul %12, %14, %cst_16 {dimension_numbers = #tpu.dot_dimension_numbers<[1], [0], [0], [1], [0, 0, 1, 1], [], []>} : vector<8x4xf32>, vector<4x544xf32>, vector<8x544xf32> -> vector<8x544xf32>
    %16 = arith.addf %10, %15 : vector<8x544xf32>
    %c3 = arith.constant 3 : index
    %c0_17 = arith.constant 0 : index
    %c0_18 = arith.constant 0 : index
    %17 = vector.load %arg1[%c3, %c0_17, %c0_18] : memref<12x8x4xf32, #tpu.memory_space<vmem>>, vector<1x8x4xf32>
    %18 = vector.shape_cast %17 : vector<1x8x4xf32> to vector<8x4xf32>
    %c0_19 = arith.constant 0 : index
    %c0_20 = arith.constant 0 : index
    %c34 = arith.constant 34 : index
    %19 = vector.load %arg2[%c0_19, %c0_20, %c34] : memref<1x4x646xf32, #tpu.memory_space<vmem>>, vector<1x4x544xf32>
    %20 = vector.shape_cast %19 : vector<1x4x544xf32> to vector<4x544xf32>
    %cst_21 = arith.constant dense<0.000000e+00> : vector<8x544xf32>
    %21 = tpu.matmul %18, %20, %cst_21 {dimension_numbers = #tpu.dot_dimension_numbers<[1], [0], [0], [1], [0, 0, 1, 1], [], []>} : vector<8x4xf32>, vector<4x544xf32>, vector<8x544xf32> -> vector<8x544xf32>
    %22 = arith.addf %16, %21 : vector<8x544xf32>
    %c4 = arith.constant 4 : index
    %c0_22 = arith.constant 0 : index
    %c0_23 = arith.constant 0 : index
    %23 = vector.load %arg1[%c4, %c0_22, %c0_23] : memref<12x8x4xf32, #tpu.memory_space<vmem>>, vector<1x8x4xf32>
    %24 = vector.shape_cast %23 : vector<1x8x4xf32> to vector<8x4xf32>
    %c0_24 = arith.constant 0 : index
    %c0_25 = arith.constant 0 : index
    %c35 = arith.constant 35 : index
    %25 = vector.load %arg2[%c0_24, %c0_25, %c35] : memref<1x4x646xf32, #tpu.memory_space<vmem>>, vector<1x4x544xf32>
    %26 = vector.shape_cast %25 : vector<1x4x544xf32> to vector<4x544xf32>
    %cst_26 = arith.constant dense<0.000000e+00> : vector<8x544xf32>
    %27 = tpu.matmul %24, %26, %cst_26 {dimension_numbers = #tpu.dot_dimension_numbers<[1], [0], [0], [1], [0, 0, 1, 1], [], []>} : vector<8x4xf32>, vector<4x544xf32>, vector<8x544xf32> -> vector<8x544xf32>
    %28 = arith.addf %22, %27 : vector<8x544xf32>
    %c5 = arith.constant 5 : index
    %c0_27 = arith.constant 0 : index
    %c0_28 = arith.constant 0 : index
    %29 = vector.load %arg1[%c5, %c0_27, %c0_28] : memref<12x8x4xf32, #tpu.memory_space<vmem>>, vector<1x8x4xf32>
    %30 = vector.shape_cast %29 : vector<1x8x4xf32> to vector<8x4xf32>
    %c0_29 = arith.constant 0 : index
    %c0_30 = arith.constant 0 : index
    %c36 = arith.constant 36 : index
    %31 = vector.load %arg2[%c0_29, %c0_30, %c36] : memref<1x4x646xf32, #tpu.memory_space<vmem>>, vector<1x4x544xf32>
    %32 = vector.shape_cast %31 : vector<1x4x544xf32> to vector<4x544xf32>
    %cst_31 = arith.constant dense<0.000000e+00> : vector<8x544xf32>
    %33 = tpu.matmul %30, %32, %cst_31 {dimension_numbers = #tpu.dot_dimension_numbers<[1], [0], [0], [1], [0, 0, 1, 1], [], []>} : vector<8x4xf32>, vector<4x544xf32>, vector<8x544xf32> -> vector<8x544xf32>
    %34 = arith.addf %28, %33 : vector<8x544xf32>
    %35 = vector.extract_strided_slice %34 {offsets = [0, 0], sizes = [8, 32], strides = [1, 1]} : vector<8x544xf32> to vector<8x32xf32>
    %c0_32 = arith.constant 0 : index
    %c0_33 = arith.constant 0 : index
    %c0_34 = arith.constant 0 : index
    %c0_35 = arith.constant 0 : index
    %36 = vector.load %arg3[%c0_32, %c0_33, %c0_34, %c0_35] : memref<1x8x32x32xf32, #tpu.memory_space<vmem>>, vector<1x8x1x32xf32>
    %37 = vector.shape_cast %36 : vector<1x8x1x32xf32> to vector<8x32xf32>
    %38 = vector.shape_cast %35 : vector<8x32xf32> to vector<1x8x1x32xf32>
    tpu.vector_store %arg3[%c0_32, %c0_33, %c0_34, %c0_35], %38 {strides = array<i32>} : memref<1x8x32x32xf32, #tpu.memory_space<vmem>>, vector<1x8x1x32xf32>,
    %39 = vector.extract_strided_slice %34 {offsets = [0, 34], sizes = [8, 32], strides = [1, 1]} : vector<8x544xf32> to vector<8x32xf32>
    %c0_36 = arith.constant 0 : index
    %c0_37 = arith.constant 0 : index
    %c2_38 = arith.constant 2 : index
    %c0_39 = arith.constant 0 : index
    %40 = vector.load %arg3[%c0_36, %c0_37, %c2_38, %c0_39] : memref<1x8x32x32xf32, #tpu.memory_space<vmem>>, vector<1x8x1x32xf32>
    %41 = vector.shape_cast %40 : vector<1x8x1x32xf32> to vector<8x32xf32>
    %42 = vector.shape_cast %39 : vector<8x32xf32> to vector<1x8x1x32xf32>
    tpu.vector_store %arg3[%c0_36, %c0_37, %c2_38, %c0_39], %42 {strides = array<i32>} : memref<1x8x32x32xf32, #tpu.memory_space<vmem>>, vector<1x8x1x32xf32>,
    %43 = vector.extract_strided_slice %34 {offsets = [0, 68], sizes = [8, 32], strides = [1, 1]} : vector<8x544xf32> to vector<8x32xf32>
    %c0_40 = arith.constant 0 : index
    %c0_41 = arith.constant 0 : index
    %c4_42 = arith.constant 4 : index
    %c0_43 = arith.constant 0 : index
    %44 = vector.load %arg3[%c0_40, %c0_41, %c4_42, %c0_43] : memref<1x8x32x32xf32, #tpu.memory_space<vmem>>, vector<1x8x1x32xf32>
    %45 = vector.shape_cast %44 : vector<1x8x1x32xf32> to vector<8x32xf32>
    %46 = vector.shape_cast %43 : vector<8x32xf32> to vector<1x8x1x32xf32>
    tpu.vector_store %arg3[%c0_40, %c0_41, %c4_42, %c0_43], %46 {strides = array<i32>} : memref<1x8x32x32xf32, #tpu.memory_space<vmem>>, vector<1x8x1x32xf32>,
    %47 = vector.extract_strided_slice %34 {offsets = [0, 102], sizes = [8, 32], strides = [1, 1]} : vector<8x544xf32> to vector<8x32xf32>
    %c0_44 = arith.constant 0 : index
    %c0_45 = arith.constant 0 : index
    %c6 = arith.constant 6 : index
    %c0_46 = arith.constant 0 : index
    %48 = vector.load %arg3[%c0_44, %c0_45, %c6, %c0_46] : memref<1x8x32x32xf32, #tpu.memory_space<vmem>>, vector<1x8x1x32xf32>
    %49 = vector.shape_cast %48 : vector<1x8x1x32xf32> to vector<8x32xf32>
    %50 = vector.shape_cast %47 : vector<8x32xf32> to vector<1x8x1x32xf32>
    tpu.vector_store %arg3[%c0_44, %c0_45, %c6, %c0_46], %50 {strides = array<i32>} : memref<1x8x32x32xf32, #tpu.memory_space<vmem>>, vector<1x8x1x32xf32>,
    %51 = vector.extract_strided_slice %34 {offsets = [0, 136], sizes = [8, 32], strides = [1, 1]} : vector<8x544xf32> to vector<8x32xf32>
    %c0_47 = arith.constant 0 : index
    %c0_48 = arith.constant 0 : index
    %c8 = arith.constant 8 : index
    %c0_49 = arith.constant 0 : index
    %52 = vector.load %arg3[%c0_47, %c0_48, %c8, %c0_49] : memref<1x8x32x32xf32, #tpu.memory_space<vmem>>, vector<1x8x1x32xf32>
    %53 = vector.shape_cast %52 : vector<1x8x1x32xf32> to vector<8x32xf32>
    %54 = vector.shape_cast %51 : vector<8x32xf32> to vector<1x8x1x32xf32>
    tpu.vector_store %arg3[%c0_47, %c0_48, %c8, %c0_49], %54 {strides = array<i32>} : memref<1x8x32x32xf32, #tpu.memory_space<vmem>>, vector<1x8x1x32xf32>,
    %55 = vector.extract_strided_slice %34 {offsets = [0, 170], sizes = [8, 32], strides = [1, 1]} : vector<8x544xf32> to vector<8x32xf32>
    %c0_50 = arith.constant 0 : index
    %c0_51 = arith.constant 0 : index
    %c10 = arith.constant 10 : index
    %c0_52 = arith.constant 0 : index
    %56 = vector.load %arg3[%c0_50, %c0_51, %c10, %c0_52] : memref<1x8x32x32xf32, #tpu.memory_space<vmem>>, vector<1x8x1x32xf32>
    %57 = vector.shape_cast %56 : vector<1x8x1x32xf32> to vector<8x32xf32>
    %58 = vector.shape_cast %55 : vector<8x32xf32> to vector<1x8x1x32xf32>
    tpu.vector_store %arg3[%c0_50, %c0_51, %c10, %c0_52], %58 {strides = array<i32>} : memref<1x8x32x32xf32, #tpu.memory_space<vmem>>, vector<1x8x1x32xf32>,
    %59 = vector.extract_strided_slice %34 {offsets = [0, 204], sizes = [8, 32], strides = [1, 1]} : vector<8x544xf32> to vector<8x32xf32>
    %c0_53 = arith.constant 0 : index
    %c0_54 = arith.constant 0 : index
    %c12 = arith.constant 12 : index
    %c0_55 = arith.constant 0 : index
    %60 = vector.load %arg3[%c0_53, %c0_54, %c12, %c0_55] : memref<1x8x32x32xf32, #tpu.memory_space<vmem>>, vector<1x8x1x32xf32>
    %61 = vector.shape_cast %60 : vector<1x8x1x32xf32> to vector<8x32xf32>
    %62 = vector.shape_cast %59 : vector<8x32xf32> to vector<1x8x1x32xf32>
    tpu.vector_store %arg3[%c0_53, %c0_54, %c12, %c0_55], %62 {strides = array<i32>} : memref<1x8x32x32xf32, #tpu.memory_space<vmem>>, vector<1x8x1x32xf32>,
    %63 = vector.extract_strided_slice %34 {offsets = [0, 238], sizes = [8, 32], strides = [1, 1]} : vector<8x544xf32> to vector<8x32xf32>
    %c0_56 = arith.constant 0 : index
    %c0_57 = arith.constant 0 : index
    %c14 = arith.constant 14 : index
    %c0_58 = arith.constant 0 : index
    %64 = vector.load %arg3[%c0_56, %c0_57, %c14, %c0_58] : memref<1x8x32x32xf32, #tpu.memory_space<vmem>>, vector<1x8x1x32xf32>
    %65 = vector.shape_cast %64 : vector<1x8x1x32xf32> to vector<8x32xf32>
    %66 = vector.shape_cast %63 : vector<8x32xf32> to vector<1x8x1x32xf32>
    tpu.vector_store %arg3[%c0_56, %c0_57, %c14, %c0_58], %66 {strides = array<i32>} : memref<1x8x32x32xf32, #tpu.memory_space<vmem>>, vector<1x8x1x32xf32>,
    %67 = vector.extract_strided_slice %34 {offsets = [0, 272], sizes = [8, 32], strides = [1, 1]} : vector<8x544xf32> to vector<8x32xf32>
    %c0_59 = arith.constant 0 : index
    %c0_60 = arith.constant 0 : index
    %c16 = arith.constant 16 : index
    %c0_61 = arith.constant 0 : index
    %68 = vector.load %arg3[%c0_59, %c0_60, %c16, %c0_61] : memref<1x8x32x32xf32, #tpu.memory_space<vmem>>, vector<1x8x1x32xf32>
    %69 = vector.shape_cast %68 : vector<1x8x1x32xf32> to vector<8x32xf32>
    %70 = vector.shape_cast %67 : vector<8x32xf32> to vector<1x8x1x32xf32>
    tpu.vector_store %arg3[%c0_59, %c0_60, %c16, %c0_61], %70 {strides = array<i32>} : memref<1x8x32x32xf32, #tpu.memory_space<vmem>>, vector<1x8x1x32xf32>,
    %71 = vector.extract_strided_slice %34 {offsets = [0, 306], sizes = [8, 32], strides = [1, 1]} : vector<8x544xf32> to vector<8x32xf32>
    %c0_62 = arith.constant 0 : index
    %c0_63 = arith.constant 0 : index
    %c18 = arith.constant 18 : index
    %c0_64 = arith.constant 0 : index
    %72 = vector.load %arg3[%c0_62, %c0_63, %c18, %c0_64] : memref<1x8x32x32xf32, #tpu.memory_space<vmem>>, vector<1x8x1x32xf32>
    %73 = vector.shape_cast %72 : vector<1x8x1x32xf32> to vector<8x32xf32>
    %74 = vector.shape_cast %71 : vector<8x32xf32> to vector<1x8x1x32xf32>
    tpu.vector_store %arg3[%c0_62, %c0_63, %c18, %c0_64], %74 {strides = array<i32>} : memref<1x8x32x32xf32, #tpu.memory_space<vmem>>, vector<1x8x1x32xf32>,
    %75 = vector.extract_strided_slice %34 {offsets = [0, 340], sizes = [8, 32], strides = [1, 1]} : vector<8x544xf32> to vector<8x32xf32>
    %c0_65 = arith.constant 0 : index
    %c0_66 = arith.constant 0 : index
    %c20 = arith.constant 20 : index
    %c0_67 = arith.constant 0 : index
    %76 = vector.load %arg3[%c0_65, %c0_66, %c20, %c0_67] : memref<1x8x32x32xf32, #tpu.memory_space<vmem>>, vector<1x8x1x32xf32>
    %77 = vector.shape_cast %76 : vector<1x8x1x32xf32> to vector<8x32xf32>
    %78 = vector.shape_cast %75 : vector<8x32xf32> to vector<1x8x1x32xf32>
    tpu.vector_store %arg3[%c0_65, %c0_66, %c20, %c0_67], %78 {strides = array<i32>} : memref<1x8x32x32xf32, #tpu.memory_space<vmem>>, vector<1x8x1x32xf32>,
    %79 = vector.extract_strided_slice %34 {offsets = [0, 374], sizes = [8, 32], strides = [1, 1]} : vector<8x544xf32> to vector<8x32xf32>
    %c0_68 = arith.constant 0 : index
    %c0_69 = arith.constant 0 : index
    %c22 = arith.constant 22 : index
    %c0_70 = arith.constant 0 : index
    %80 = vector.load %arg3[%c0_68, %c0_69, %c22, %c0_70] : memref<1x8x32x32xf32, #tpu.memory_space<vmem>>, vector<1x8x1x32xf32>
    %81 = vector.shape_cast %80 : vector<1x8x1x32xf32> to vector<8x32xf32>
    %82 = vector.shape_cast %79 : vector<8x32xf32> to vector<1x8x1x32xf32>
    tpu.vector_store %arg3[%c0_68, %c0_69, %c22, %c0_70], %82 {strides = array<i32>} : memref<1x8x32x32xf32, #tpu.memory_space<vmem>>, vector<1x8x1x32xf32>,
    %83 = vector.extract_strided_slice %34 {offsets = [0, 408], sizes = [8, 32], strides = [1, 1]} : vector<8x544xf32> to vector<8x32xf32>
    %c0_71 = arith.constant 0 : index
    %c0_72 = arith.constant 0 : index
    %c24 = arith.constant 24 : index
    %c0_73 = arith.constant 0 : index
    %84 = vector.load %arg3[%c0_71, %c0_72, %c24, %c0_73] : memref<1x8x32x32xf32, #tpu.memory_space<vmem>>, vector<1x8x1x32xf32>
    %85 = vector.shape_cast %84 : vector<1x8x1x32xf32> to vector<8x32xf32>
    %86 = vector.shape_cast %83 : vector<8x32xf32> to vector<1x8x1x32xf32>
    tpu.vector_store %arg3[%c0_71, %c0_72, %c24, %c0_73], %86 {strides = array<i32>} : memref<1x8x32x32xf32, #tpu.memory_space<vmem>>, vector<1x8x1x32xf32>,
    %87 = vector.extract_strided_slice %34 {offsets = [0, 442], sizes = [8, 32], strides = [1, 1]} : vector<8x544xf32> to vector<8x32xf32>
    %c0_74 = arith.constant 0 : index
    %c0_75 = arith.constant 0 : index
    %c26 = arith.constant 26 : index
    %c0_76 = arith.constant 0 : index
    %88 = vector.load %arg3[%c0_74, %c0_75, %c26, %c0_76] : memref<1x8x32x32xf32, #tpu.memory_space<vmem>>, vector<1x8x1x32xf32>
    %89 = vector.shape_cast %88 : vector<1x8x1x32xf32> to vector<8x32xf32>
    %90 = vector.shape_cast %87 : vector<8x32xf32> to vector<1x8x1x32xf32>
    tpu.vector_store %arg3[%c0_74, %c0_75, %c26, %c0_76], %90 {strides = array<i32>} : memref<1x8x32x32xf32, #tpu.memory_space<vmem>>, vector<1x8x1x32xf32>,
    %91 = vector.extract_strided_slice %34 {offsets = [0, 476], sizes = [8, 32], strides = [1, 1]} : vector<8x544xf32> to vector<8x32xf32>
    %c0_77 = arith.constant 0 : index
    %c0_78 = arith.constant 0 : index
    %c28 = arith.constant 28 : index
    %c0_79 = arith.constant 0 : index
    %92 = vector.load %arg3[%c0_77, %c0_78, %c28, %c0_79] : memref<1x8x32x32xf32, #tpu.memory_space<vmem>>, vector<1x8x1x32xf32>
    %93 = vector.shape_cast %92 : vector<1x8x1x32xf32> to vector<8x32xf32>
    %94 = vector.shape_cast %91 : vector<8x32xf32> to vector<1x8x1x32xf32>
    tpu.vector_store %arg3[%c0_77, %c0_78, %c28, %c0_79], %94 {strides = array<i32>} : memref<1x8x32x32xf32, #tpu.memory_space<vmem>>, vector<1x8x1x32xf32>,
    %95 = vector.extract_strided_slice %34 {offsets = [0, 510], sizes = [8, 32], strides = [1, 1]} : vector<8x544xf32> to vector<8x32xf32>
    %c0_80 = arith.constant 0 : index
    %c0_81 = arith.constant 0 : index
    %c30 = arith.constant 30 : index
    %c0_82 = arith.constant 0 : index
    %96 = vector.load %arg3[%c0_80, %c0_81, %c30, %c0_82] : memref<1x8x32x32xf32, #tpu.memory_space<vmem>>, vector<1x8x1x32xf32>
    %97 = vector.shape_cast %96 : vector<1x8x1x32xf32> to vector<8x32xf32>
    %98 = vector.shape_cast %95 : vector<8x32xf32> to vector<1x8x1x32xf32>
    tpu.vector_store %arg3[%c0_80, %c0_81, %c30, %c0_82], %98 {strides = array<i32>} : memref<1x8x32x32xf32, #tpu.memory_space<vmem>>, vector<1x8x1x32xf32>,
    %c6_83 = arith.constant 6 : index
    %c0_84 = arith.constant 0 : index
    %c0_85 = arith.constant 0 : index
    %99 = vector.load %arg1[%c6_83, %c0_84, %c0_85] : memref<12x8x4xf32, #tpu.memory_space<vmem>>, vector<1x8x4xf32>
    %100 = vector.shape_cast %99 : vector<1x8x4xf32> to vector<8x4xf32>
    %c0_86 = arith.constant 0 : index
    %c0_87 = arith.constant 0 : index
    %c34_88 = arith.constant 34 : index
    %101 = vector.load %arg2[%c0_86, %c0_87, %c34_88] : memref<1x4x646xf32, #tpu.memory_space<vmem>>, vector<1x4x544xf32>
    %102 = vector.shape_cast %101 : vector<1x4x544xf32> to vector<4x544xf32>
    %cst_89 = arith.constant dense<0.000000e+00> : vector<8x544xf32>
    %103 = tpu.matmul %100, %102, %cst_89 {dimension_numbers = #tpu.dot_dimension_numbers<[1], [0], [0], [1], [0, 0, 1, 1], [], []>} : vector<8x4xf32>, vector<4x544xf32>, vector<8x544xf32> -> vector<8x544xf32>
    %c7 = arith.constant 7 : index
    %c0_90 = arith.constant 0 : index
    %c0_91 = arith.constant 0 : index
    %104 = vector.load %arg1[%c7, %c0_90, %c0_91] : memref<12x8x4xf32, #tpu.memory_space<vmem>>, vector<1x8x4xf32>
    %105 = vector.shape_cast %104 : vector<1x8x4xf32> to vector<8x4xf32>
    %c0_92 = arith.constant 0 : index
    %c0_93 = arith.constant 0 : index
    %c35_94 = arith.constant 35 : index
    %106 = vector.load %arg2[%c0_92, %c0_93, %c35_94] : memref<1x4x646xf32, #tpu.memory_space<vmem>>, vector<1x4x544xf32>
    %107 = vector.shape_cast %106 : vector<1x4x544xf32> to vector<4x544xf32>
    %cst_95 = arith.constant dense<0.000000e+00> : vector<8x544xf32>
    %108 = tpu.matmul %105, %107, %cst_95 {dimension_numbers = #tpu.dot_dimension_numbers<[1], [0], [0], [1], [0, 0, 1, 1], [], []>} : vector<8x4xf32>, vector<4x544xf32>, vector<8x544xf32> -> vector<8x544xf32>
    %109 = arith.addf %103, %108 : vector<8x544xf32>
    %c8_96 = arith.constant 8 : index
    %c0_97 = arith.constant 0 : index
    %c0_98 = arith.constant 0 : index
    %110 = vector.load %arg1[%c8_96, %c0_97, %c0_98] : memref<12x8x4xf32, #tpu.memory_space<vmem>>, vector<1x8x4xf32>
    %111 = vector.shape_cast %110 : vector<1x8x4xf32> to vector<8x4xf32>
    %c0_99 = arith.constant 0 : index
    %c0_100 = arith.constant 0 : index
    %c36_101 = arith.constant 36 : index
    %112 = vector.load %arg2[%c0_99, %c0_100, %c36_101] : memref<1x4x646xf32, #tpu.memory_space<vmem>>, vector<1x4x544xf32>
    %113 = vector.shape_cast %112 : vector<1x4x544xf32> to vector<4x544xf32>
    %cst_102 = arith.constant dense<0.000000e+00> : vector<8x544xf32>
    %114 = tpu.matmul %111, %113, %cst_102 {dimension_numbers = #tpu.dot_dimension_numbers<[1], [0], [0], [1], [0, 0, 1, 1], [], []>} : vector<8x4xf32>, vector<4x544xf32>, vector<8x544xf32> -> vector<8x544xf32>
    %115 = arith.addf %109, %114 : vector<8x544xf32>
    %c9 = arith.constant 9 : index
    %c0_103 = arith.constant 0 : index
    %c0_104 = arith.constant 0 : index
    %116 = vector.load %arg1[%c9, %c0_103, %c0_104] : memref<12x8x4xf32, #tpu.memory_space<vmem>>, vector<1x8x4xf32>
    %117 = vector.shape_cast %116 : vector<1x8x4xf32> to vector<8x4xf32>
    %c0_105 = arith.constant 0 : index
    %c0_106 = arith.constant 0 : index
    %c68 = arith.constant 68 : index
    %118 = vector.load %arg2[%c0_105, %c0_106, %c68] : memref<1x4x646xf32, #tpu.memory_space<vmem>>, vector<1x4x544xf32>
    %119 = vector.shape_cast %118 : vector<1x4x544xf32> to vector<4x544xf32>
    %cst_107 = arith.constant dense<0.000000e+00> : vector<8x544xf32>
    %120 = tpu.matmul %117, %119, %cst_107 {dimension_numbers = #tpu.dot_dimension_numbers<[1], [0], [0], [1], [0, 0, 1, 1], [], []>} : vector<8x4xf32>, vector<4x544xf32>, vector<8x544xf32> -> vector<8x544xf32>
    %121 = arith.addf %115, %120 : vector<8x544xf32>
    %c10_108 = arith.constant 10 : index
    %c0_109 = arith.constant 0 : index
    %c0_110 = arith.constant 0 : index
    %122 = vector.load %arg1[%c10_108, %c0_109, %c0_110] : memref<12x8x4xf32, #tpu.memory_space<vmem>>, vector<1x8x4xf32>
    %123 = vector.shape_cast %122 : vector<1x8x4xf32> to vector<8x4xf32>
    %c0_111 = arith.constant 0 : index
    %c0_112 = arith.constant 0 : index
    %c69 = arith.constant 69 : index
    %124 = vector.load %arg2[%c0_111, %c0_112, %c69] : memref<1x4x646xf32, #tpu.memory_space<vmem>>, vector<1x4x544xf32>
    %125 = vector.shape_cast %124 : vector<1x4x544xf32> to vector<4x544xf32>
    %cst_113 = arith.constant dense<0.000000e+00> : vector<8x544xf32>
    %126 = tpu.matmul %123, %125, %cst_113 {dimension_numbers = #tpu.dot_dimension_numbers<[1], [0], [0], [1], [0, 0, 1, 1], [], []>} : vector<8x4xf32>, vector<4x544xf32>, vector<8x544xf32> -> vector<8x544xf32>
    %127 = arith.addf %121, %126 : vector<8x544xf32>
    %c11 = arith.constant 11 : index
    %c0_114 = arith.constant 0 : index
    %c0_115 = arith.constant 0 : index
    %128 = vector.load %arg1[%c11, %c0_114, %c0_115] : memref<12x8x4xf32, #tpu.memory_space<vmem>>, vector<1x8x4xf32>
    %129 = vector.shape_cast %128 : vector<1x8x4xf32> to vector<8x4xf32>
    %c0_116 = arith.constant 0 : index
    %c0_117 = arith.constant 0 : index
    %c70 = arith.constant 70 : index
    %130 = vector.load %arg2[%c0_116, %c0_117, %c70] : memref<1x4x646xf32, #tpu.memory_space<vmem>>, vector<1x4x544xf32>
    %131 = vector.shape_cast %130 : vector<1x4x544xf32> to vector<4x544xf32>
    %cst_118 = arith.constant dense<0.000000e+00> : vector<8x544xf32>
    %132 = tpu.matmul %129, %131, %cst_118 {dimension_numbers = #tpu.dot_dimension_numbers<[1], [0], [0], [1], [0, 0, 1, 1], [], []>} : vector<8x4xf32>, vector<4x544xf32>, vector<8x544xf32> -> vector<8x544xf32>
    %133 = arith.addf %127, %132 : vector<8x544xf32>
    %134 = vector.extract_strided_slice %133 {offsets = [0, 0], sizes = [8, 32], strides = [1, 1]} : vector<8x544xf32> to vector<8x32xf32>
    %c0_119 = arith.constant 0 : index
    %c0_120 = arith.constant 0 : index
    %c1_121 = arith.constant 1 : index
    %c0_122 = arith.constant 0 : index
    %135 = vector.load %arg3[%c0_119, %c0_120, %c1_121, %c0_122] : memref<1x8x32x32xf32, #tpu.memory_space<vmem>>, vector<1x8x1x32xf32>
    %136 = vector.shape_cast %135 : vector<1x8x1x32xf32> to vector<8x32xf32>
    %137 = vector.shape_cast %134 : vector<8x32xf32> to vector<1x8x1x32xf32>
    tpu.vector_store %arg3[%c0_119, %c0_120, %c1_121, %c0_122], %137 {strides = array<i32>} : memref<1x8x32x32xf32, #tpu.memory_space<vmem>>, vector<1x8x1x32xf32>,
    %138 = vector.extract_strided_slice %133 {offsets = [0, 34], sizes = [8, 32], strides = [1, 1]} : vector<8x544xf32> to vector<8x32xf32>
    %c0_123 = arith.constant 0 : index
    %c0_124 = arith.constant 0 : index
    %c3_125 = arith.constant 3 : index
    %c0_126 = arith.constant 0 : index
    %139 = vector.load %arg3[%c0_123, %c0_124, %c3_125, %c0_126] : memref<1x8x32x32xf32, #tpu.memory_space<vmem>>, vector<1x8x1x32xf32>
    %140 = vector.shape_cast %139 : vector<1x8x1x32xf32> to vector<8x32xf32>
    %141 = vector.shape_cast %138 : vector<8x32xf32> to vector<1x8x1x32xf32>
    tpu.vector_store %arg3[%c0_123, %c0_124, %c3_125, %c0_126], %141 {strides = array<i32>} : memref<1x8x32x32xf32, #tpu.memory_space<vmem>>, vector<1x8x1x32xf32>,
    %142 = vector.extract_strided_slice %133 {offsets = [0, 68], sizes = [8, 32], strides = [1, 1]} : vector<8x544xf32> to vector<8x32xf32>
    %c0_127 = arith.constant 0 : index
    %c0_128 = arith.constant 0 : index
    %c5_129 = arith.constant 5 : index
    %c0_130 = arith.constant 0 : index
    %143 = vector.load %arg3[%c0_127, %c0_128, %c5_129, %c0_130] : memref<1x8x32x32xf32, #tpu.memory_space<vmem>>, vector<1x8x1x32xf32>
    %144 = vector.shape_cast %143 : vector<1x8x1x32xf32> to vector<8x32xf32>
    %145 = vector.shape_cast %142 : vector<8x32xf32> to vector<1x8x1x32xf32>
    tpu.vector_store %arg3[%c0_127, %c0_128, %c5_129, %c0_130], %145 {strides = array<i32>} : memref<1x8x32x32xf32, #tpu.memory_space<vmem>>, vector<1x8x1x32xf32>,
    %146 = vector.extract_strided_slice %133 {offsets = [0, 102], sizes = [8, 32], strides = [1, 1]} : vector<8x544xf32> to vector<8x32xf32>
    %c0_131 = arith.constant 0 : index
    %c0_132 = arith.constant 0 : index
    %c7_133 = arith.constant 7 : index
    %c0_134 = arith.constant 0 : index
    %147 = vector.load %arg3[%c0_131, %c0_132, %c7_133, %c0_134] : memref<1x8x32x32xf32, #tpu.memory_space<vmem>>, vector<1x8x1x32xf32>
    %148 = vector.shape_cast %147 : vector<1x8x1x32xf32> to vector<8x32xf32>
    %149 = vector.shape_cast %146 : vector<8x32xf32> to vector<1x8x1x32xf32>
    tpu.vector_store %arg3[%c0_131, %c0_132, %c7_133, %c0_134], %149 {strides = array<i32>} : memref<1x8x32x32xf32, #tpu.memory_space<vmem>>, vector<1x8x1x32xf32>,
    %150 = vector.extract_strided_slice %133 {offsets = [0, 136], sizes = [8, 32], strides = [1, 1]} : vector<8x544xf32> to vector<8x32xf32>
    %c0_135 = arith.constant 0 : index
    %c0_136 = arith.constant 0 : index
    %c9_137 = arith.constant 9 : index
    %c0_138 = arith.constant 0 : index
    %151 = vector.load %arg3[%c0_135, %c0_136, %c9_137, %c0_138] : memref<1x8x32x32xf32, #tpu.memory_space<vmem>>, vector<1x8x1x32xf32>
    %152 = vector.shape_cast %151 : vector<1x8x1x32xf32> to vector<8x32xf32>
    %153 = vector.shape_cast %150 : vector<8x32xf32> to vector<1x8x1x32xf32>
    tpu.vector_store %arg3[%c0_135, %c0_136, %c9_137, %c0_138], %153 {strides = array<i32>} : memref<1x8x32x32xf32, #tpu.memory_space<vmem>>, vector<1x8x1x32xf32>,
    %154 = vector.extract_strided_slice %133 {offsets = [0, 170], sizes = [8, 32], strides = [1, 1]} : vector<8x544xf32> to vector<8x32xf32>
    %c0_139 = arith.constant 0 : index
    %c0_140 = arith.constant 0 : index
    %c11_141 = arith.constant 11 : index
    %c0_142 = arith.constant 0 : index
    %155 = vector.load %arg3[%c0_139, %c0_140, %c11_141, %c0_142] : memref<1x8x32x32xf32, #tpu.memory_space<vmem>>, vector<1x8x1x32xf32>
    %156 = vector.shape_cast %155 : vector<1x8x1x32xf32> to vector<8x32xf32>
    %157 = vector.shape_cast %154 : vector<8x32xf32> to vector<1x8x1x32xf32>
    tpu.vector_store %arg3[%c0_139, %c0_140, %c11_141, %c0_142], %157 {strides = array<i32>} : memref<1x8x32x32xf32, #tpu.memory_space<vmem>>, vector<1x8x1x32xf32>,
    %158 = vector.extract_strided_slice %133 {offsets = [0, 204], sizes = [8, 32], strides = [1, 1]} : vector<8x544xf32> to vector<8x32xf32>
    %c0_143 = arith.constant 0 : index
    %c0_144 = arith.constant 0 : index
    %c13 = arith.constant 13 : index
    %c0_145 = arith.constant 0 : index
    %159 = vector.load %arg3[%c0_143, %c0_144, %c13, %c0_145] : memref<1x8x32x32xf32, #tpu.memory_space<vmem>>, vector<1x8x1x32xf32>
    %160 = vector.shape_cast %159 : vector<1x8x1x32xf32> to vector<8x32xf32>
    %161 = vector.shape_cast %158 : vector<8x32xf32> to vector<1x8x1x32xf32>
    tpu.vector_store %arg3[%c0_143, %c0_144, %c13, %c0_145], %161 {strides = array<i32>} : memref<1x8x32x32xf32, #tpu.memory_space<vmem>>, vector<1x8x1x32xf32>,
    %162 = vector.extract_strided_slice %133 {offsets = [0, 238], sizes = [8, 32], strides = [1, 1]} : vector<8x544xf32> to vector<8x32xf32>
    %c0_146 = arith.constant 0 : index
    %c0_147 = arith.constant 0 : index
    %c15 = arith.constant 15 : index
    %c0_148 = arith.constant 0 : index
    %163 = vector.load %arg3[%c0_146, %c0_147, %c15, %c0_148] : memref<1x8x32x32xf32, #tpu.memory_space<vmem>>, vector<1x8x1x32xf32>
    %164 = vector.shape_cast %163 : vector<1x8x1x32xf32> to vector<8x32xf32>
    %165 = vector.shape_cast %162 : vector<8x32xf32> to vector<1x8x1x32xf32>
    tpu.vector_store %arg3[%c0_146, %c0_147, %c15, %c0_148], %165 {strides = array<i32>} : memref<1x8x32x32xf32, #tpu.memory_space<vmem>>, vector<1x8x1x32xf32>,
    %166 = vector.extract_strided_slice %133 {offsets = [0, 272], sizes = [8, 32], strides = [1, 1]} : vector<8x544xf32> to vector<8x32xf32>
    %c0_149 = arith.constant 0 : index
    %c0_150 = arith.constant 0 : index
    %c17 = arith.constant 17 : index
    %c0_151 = arith.constant 0 : index
    %167 = vector.load %arg3[%c0_149, %c0_150, %c17, %c0_151] : memref<1x8x32x32xf32, #tpu.memory_space<vmem>>, vector<1x8x1x32xf32>
    %168 = vector.shape_cast %167 : vector<1x8x1x32xf32> to vector<8x32xf32>
    %169 = vector.shape_cast %166 : vector<8x32xf32> to vector<1x8x1x32xf32>
    tpu.vector_store %arg3[%c0_149, %c0_150, %c17, %c0_151], %169 {strides = array<i32>} : memref<1x8x32x32xf32, #tpu.memory_space<vmem>>, vector<1x8x1x32xf32>,
    %170 = vector.extract_strided_slice %133 {offsets = [0, 306], sizes = [8, 32], strides = [1, 1]} : vector<8x544xf32> to vector<8x32xf32>
    %c0_152 = arith.constant 0 : index
    %c0_153 = arith.constant 0 : index
    %c19 = arith.constant 19 : index
    %c0_154 = arith.constant 0 : index
    %171 = vector.load %arg3[%c0_152, %c0_153, %c19, %c0_154] : memref<1x8x32x32xf32, #tpu.memory_space<vmem>>, vector<1x8x1x32xf32>
    %172 = vector.shape_cast %171 : vector<1x8x1x32xf32> to vector<8x32xf32>
    %173 = vector.shape_cast %170 : vector<8x32xf32> to vector<1x8x1x32xf32>
    tpu.vector_store %arg3[%c0_152, %c0_153, %c19, %c0_154], %173 {strides = array<i32>} : memref<1x8x32x32xf32, #tpu.memory_space<vmem>>, vector<1x8x1x32xf32>,
    %174 = vector.extract_strided_slice %133 {offsets = [0, 340], sizes = [8, 32], strides = [1, 1]} : vector<8x544xf32> to vector<8x32xf32>
    %c0_155 = arith.constant 0 : index
    %c0_156 = arith.constant 0 : index
    %c21 = arith.constant 21 : index
    %c0_157 = arith.constant 0 : index
    %175 = vector.load %arg3[%c0_155, %c0_156, %c21, %c0_157] : memref<1x8x32x32xf32, #tpu.memory_space<vmem>>, vector<1x8x1x32xf32>
    %176 = vector.shape_cast %175 : vector<1x8x1x32xf32> to vector<8x32xf32>
    %177 = vector.shape_cast %174 : vector<8x32xf32> to vector<1x8x1x32xf32>
    tpu.vector_store %arg3[%c0_155, %c0_156, %c21, %c0_157], %177 {strides = array<i32>} : memref<1x8x32x32xf32, #tpu.memory_space<vmem>>, vector<1x8x1x32xf32>,
    %178 = vector.extract_strided_slice %133 {offsets = [0, 374], sizes = [8, 32], strides = [1, 1]} : vector<8x544xf32> to vector<8x32xf32>
    %c0_158 = arith.constant 0 : index
    %c0_159 = arith.constant 0 : index
    %c23 = arith.constant 23 : index
    %c0_160 = arith.constant 0 : index
    %179 = vector.load %arg3[%c0_158, %c0_159, %c23, %c0_160] : memref<1x8x32x32xf32, #tpu.memory_space<vmem>>, vector<1x8x1x32xf32>
    %180 = vector.shape_cast %179 : vector<1x8x1x32xf32> to vector<8x32xf32>
    %181 = vector.shape_cast %178 : vector<8x32xf32> to vector<1x8x1x32xf32>
    tpu.vector_store %arg3[%c0_158, %c0_159, %c23, %c0_160], %181 {strides = array<i32>} : memref<1x8x32x32xf32, #tpu.memory_space<vmem>>, vector<1x8x1x32xf32>,
    %182 = vector.extract_strided_slice %133 {offsets = [0, 408], sizes = [8, 32], strides = [1, 1]} : vector<8x544xf32> to vector<8x32xf32>
    %c0_161 = arith.constant 0 : index
    %c0_162 = arith.constant 0 : index
    %c25 = arith.constant 25 : index
    %c0_163 = arith.constant 0 : index
    %183 = vector.load %arg3[%c0_161, %c0_162, %c25, %c0_163] : memref<1x8x32x32xf32, #tpu.memory_space<vmem>>, vector<1x8x1x32xf32>
    %184 = vector.shape_cast %183 : vector<1x8x1x32xf32> to vector<8x32xf32>
    %185 = vector.shape_cast %182 : vector<8x32xf32> to vector<1x8x1x32xf32>
    tpu.vector_store %arg3[%c0_161, %c0_162, %c25, %c0_163], %185 {strides = array<i32>} : memref<1x8x32x32xf32, #tpu.memory_space<vmem>>, vector<1x8x1x32xf32>,
    %186 = vector.extract_strided_slice %133 {offsets = [0, 442], sizes = [8, 32], strides = [1, 1]} : vector<8x544xf32> to vector<8x32xf32>
    %c0_164 = arith.constant 0 : index
    %c0_165 = arith.constant 0 : index
    %c27 = arith.constant 27 : index
    %c0_166 = arith.constant 0 : index
    %187 = vector.load %arg3[%c0_164, %c0_165, %c27, %c0_166] : memref<1x8x32x32xf32, #tpu.memory_space<vmem>>, vector<1x8x1x32xf32>
    %188 = vector.shape_cast %187 : vector<1x8x1x32xf32> to vector<8x32xf32>
    %189 = vector.shape_cast %186 : vector<8x32xf32> to vector<1x8x1x32xf32>
    tpu.vector_store %arg3[%c0_164, %c0_165, %c27, %c0_166], %189 {strides = array<i32>} : memref<1x8x32x32xf32, #tpu.memory_space<vmem>>, vector<1x8x1x32xf32>,
    %190 = vector.extract_strided_slice %133 {offsets = [0, 476], sizes = [8, 32], strides = [1, 1]} : vector<8x544xf32> to vector<8x32xf32>
    %c0_167 = arith.constant 0 : index
    %c0_168 = arith.constant 0 : index
    %c29 = arith.constant 29 : index
    %c0_169 = arith.constant 0 : index
    %191 = vector.load %arg3[%c0_167, %c0_168, %c29, %c0_169] : memref<1x8x32x32xf32, #tpu.memory_space<vmem>>, vector<1x8x1x32xf32>
    %192 = vector.shape_cast %191 : vector<1x8x1x32xf32> to vector<8x32xf32>
    %193 = vector.shape_cast %190 : vector<8x32xf32> to vector<1x8x1x32xf32>
    tpu.vector_store %arg3[%c0_167, %c0_168, %c29, %c0_169], %193 {strides = array<i32>} : memref<1x8x32x32xf32, #tpu.memory_space<vmem>>, vector<1x8x1x32xf32>,
    %194 = vector.extract_strided_slice %133 {offsets = [0, 510], sizes = [8, 32], strides = [1, 1]} : vector<8x544xf32> to vector<8x32xf32>
    %c0_170 = arith.constant 0 : index
    %c0_171 = arith.constant 0 : index
    %c31 = arith.constant 31 : index
    %c0_172 = arith.constant 0 : index
    %195 = vector.load %arg3[%c0_170, %c0_171, %c31, %c0_172] : memref<1x8x32x32xf32, #tpu.memory_space<vmem>>, vector<1x8x1x32xf32>
    %196 = vector.shape_cast %195 : vector<1x8x1x32xf32> to vector<8x32xf32>
    %197 = vector.shape_cast %194 : vector<8x32xf32> to vector<1x8x1x32xf32>
    tpu.vector_store %arg3[%c0_170, %c0_171, %c31, %c0_172], %197 {strides = array<i32>} : memref<1x8x32x32xf32, #tpu.memory_space<vmem>>, vector<1x8x1x32xf32>,
    return
  }
  func.func @transform_0(%arg0: i32) -> (i32, i32, i32) {
    %c0_i32 = arith.constant 0 : i32
    %c0_i32_0 = arith.constant 0 : i32
    %c0_i32_1 = arith.constant 0 : i32
    %c0_i32_2 = arith.constant 0 : i32
    return %c0_i32, %c0_i32_0, %c0_i32_1 : i32, i32, i32
  }
  func.func @transform_1(%arg0: i32) -> (i32, i32, i32) {
    %c0_i32 = arith.constant 0 : i32
    %c0_i32_0 = arith.constant 0 : i32
    %c0_i32_1 = arith.constant 0 : i32
    return %arg0, %c0_i32, %c0_i32_0 : i32, i32, i32
  }
  func.func @transform_2(%arg0: i32) -> (i32, i32, i32, i32) {
    %c0_i32 = arith.constant 0 : i32
    %c0_i32_0 = arith.constant 0 : i32
    %c0_i32_1 = arith.constant 0 : i32
    %c0_i32_2 = arith.constant 0 : i32
    return %arg0, %c0_i32, %c0_i32_0, %c0_i32_1 : i32, i32, i32, i32
  }
}

</mosaic_0001>

<bundles_post_ra>
// kernel: upsample_deconv.1
= control target key start
LH: loop header
LB: loop body
LE: loop exit
PB: predicated region body
PF: predicated region fallthrough
CT: control target
= control target key end

     0   :  { %7 = vsyncpa [#allocation3], 0  ;;  %s8795_s0 = inlined_call_operand.vmem [shape: f32[12,8,4], index: 0, kind: input, shape index: {}]   ;;  %s8796_s1 = inlined_call_operand.vmem [shape: f32[2,4,646], index: 1, kind: input, shape index: {}]   ;;  %s8797_s2 = inlined_call_operand.hbm [shape: f32[2,8,32,32], index: 2, kind: output, shape index: {}]  }
   0x1   :  { %9 = vsyncpa [#allocation3 + $0x1], 0  ;;  %s6421_s9 = smov 0   ;;  %s6423_s10 = smov 0  }
   0x2   :  { %s6425_s11 = smov 0   ;;  %s6427_s12 = smov 0  }
   0x3 LB: > { %s6442_s13 = sadd.s32 4294967295, %s6377_s12   ;;  %s5984_s14 = sadd.s32 4294967294, %s6377_s12   ;;  %s6377_s12 = sphi %s6427_s12, %s8803_s12   ;;  %s6373_s11 = sphi %s6425_s11, %s8802_s11   ;;  %s6369_s10 = sphi %s6423_s10, %s8801_s10   ;;  %s6365_s9 = sphi %s6421_s9, %s8800_s9  }
   0x4   : > { %s6446_s15 = sadd.s32 1, %s6377_s12   ;;  %s69_s16 = sadd.s32 1, %s6373_s11 }
   0x5   : > { %s66_s17 = ssub.s32 %s6377_s12, %s6446_s15  ;;  %p79_p0 = scmp.ne.s32.totalorder %s6373_s11, %s6369_s10 }
   0x6   : > { %p67_p1 = scmp.eq.s32.totalorder %s66_s17, 0  ;;  %p80_p2 = scmp.eq.s32.totalorder %s6442_s13, 1 }
   0x7   : > { %p85_p3 = scmp.ne.s32.totalorder %s6369_s10, %s6365_s9  ;;  %p86_p4 = scmp.eq.s32.totalorder %s5984_s14, 1 }
   0x8   : > { %s6457_s18 = scalar_select %p67_p1, %s6373_s11, %s69_s16  }
   0x9   : > { %p6459_p5 = por %p80_p2, %p79_p0  ;;  %p6463_p6 = por %p86_p4, %p85_p3 }
   0xa   : > { %p5987_p7 = scmp.ge.s32.totalorder %s6377_s12, 1  ;;  %p115_p8 = scmp.lt.s32.totalorder %s6377_s12, 3 }
   0xc   : > { %p116_p9 = pnand %p5987_p7, %p115_p8 }
   0xd   : > { %p137_p10 = scmp.lt.s32.totalorder (!%p116_p9), %s6442_s13, 1  ;;  %v6379_v0 = vmov (!%p116_p9), 0.0   ;;  %s6380_s26 = smov (!%p116_p9), 127   ;;  %vm163_vm0 = vcmask (!%p116_p9), 1039360   ;;  %vm172_vm1 = vcmask (!%p116_p9), 1043456   ;;  %v5990_v23 = vld [vmem:[%s8795_s0 + $0x8] sm:$0xff] (!%p116_p9) }
   0xe   : > { %119 = sbr.rel (%p116_p9) target bundleno = 1217 (0x4c1), region = 28  ;;  %247 = vmatprep.mubr.f32.mxu0 (!%p116_p9), %v6379_v0  ;;  %3125 = vmatprep.mubr.f32.mxu1 (!%p116_p9), %v6379_v0  ;;  %s6381_s27 = smov (!%p116_p9), 126   ;;  %vm168_vm2 = vcmask (!%p116_p9), 31744   ;;  %vm6388_vm3 = vmmov (!%p116_p9), 0   ;;  %v142_v32 = vld [vmem:[%s8795_s0] sm:$0xff] (!%p116_p9)  ;;  %vm640_vm4 = vcmask (!%p116_p9), 1031168  }
   0xf   : > { %s6382_s28 = smov (!%p116_p9), 94   ;;  %s6383_s29 = smov (!%p116_p9), 93   ;;  %v6007_v42 = vld [vmem:[%s8795_s0 + $0x10] sm:$0xff] (!%p116_p9)  ;;  %vm895_vm5 = vcmask (!%p116_p9), 769024   ;;  %v6016_v53 = vld [vmem:[%s8795_s0 + $0x18] sm:$0xff] (!%p116_p9)  ;;  %vm1150_vm6 = vcmask (!%p116_p9), 760832  }
  0x10   : > { %s6384_s30 = smov (!%p116_p9), 92   ;;  %s6385_s3 = smov (!%p116_p9), 60   ;;  %v6044_v62 = vld [vmem:[%s8795_s0 + $0x38] sm:$0xff] (!%p116_p9)  ;;  %vm1405_vm7 = vcmask (!%p116_p9), 752640   ;;  %vm3786_vm8 = vcmask (!%p116_p9), 490496   ;;  %vm4041_vm9 = vcmask (!%p116_p9), 482304  }
  0x11   : > { %s6386_s4 = smov (!%p116_p9), 59   ;;  %s6387_s5 = smov (!%p116_p9), 58   ;;  %vm4296_vm10 = vcmask (!%p116_p9), 474112   ;;  %vm1698_vm11 = vcmask (!%p116_p9), 253952   ;;  %vm1950_vm12 = vcmask (!%p116_p9), 211968   ;;  %vm2299_vm13 = vcmask (!%p116_p9), 146432  }
  0x12   : > { %s6397_s6 = smov (!%p116_p9), 44   ;;  %s6398_s7 = smov (!%p116_p9), 18   ;;  %vm2648_vm14 = vcmask (!%p116_p9), 80896   ;;  %vm2997_vm15 = vcmask (!%p116_p9), 15360  }
  0x13   : > { %s6399_s8 = smov (!%p116_p9), 104   ;;  %s6400_s14 = smov (!%p116_p9), 70  }
  0x14   : > { %s6401_s16 = smov (!%p116_p9), 10   ;;  %s6402_s17 = smov (!%p116_p9), 2  }
  0x15   : > { %s138_s21 = scalar_select %p137_p10, %s6442_s13, 1 }
  0x17   : > { %s6247_s22 = smul.u32 24, %s138_s21 }
  0x19   : > { %s6476_s25 = scalar_lea.vmem %s8796_s1, %s6247_s22  ;;  %s134_s22 = sand.u32 1, %s6369_s10  }
  0x1a   : > { %v6479_v1 = vld [vmem:[%s6476_s25 + $0x8] sm:$0xff]  ;;  %v6482_v2 = vld [vmem:[%s6476_s25] sm:$0xff]  ;;  %v6487_v3 = vld [vmem:[%s6476_s25 + $0x10] sm:$0xf]  ;;  %s5988_s23 = sshll.u32 %s134_s22, 8 }
  0x1b   : > { %157 = vrot.lane.b32.xlu1 %v6479_v1, %s6380_s26  ;;  %153 = vrot.lane.b32.xlu0 %v6482_v2, %s6380_s26  ;;  %v6491_v4 = vcombine.high %v6482_v2, %v6482_v2  ;;  %v6497_v5 = vcombine.high %v6479_v1, %v6479_v1  ;;  %v624_v6 = vld [vmem:[%s6476_s25 + $0x10] sm:$0xf]  ;;  %s6851_s24 = scalar_lea.vmem [#allocation2], %s5988_s23 }
  0x1c   : > { %v879_v7 = vld [vmem:[%s6476_s25 + $0x10] sm:$0xf] }
  0x1d   : > { %v1134_v8 = vld [vmem:[%s6476_s25 + $0x10] sm:$0xf] }
  0x1e   : > { %v1389_v9 = vld [vmem:[%s6476_s25 + $0x10] sm:$0xf] }
  0x1f   : > { %630 = vrot.lane.b32.xlu1 %v6482_v2, %s6381_s27  ;;  %161 = vrot.lane.b32.xlu0 %v6487_v3, %s6380_s26  ;;  %v3026_v10 = vld [vmem:[%s6476_s25 + $0x10] sm:$0xf] }
  0x20   : > { %v3516_v11 = vld [vmem:[%s6476_s25 + $0x10] sm:$0xf] }
  0x21   : > { %v3770_v12 = vld [vmem:[%s6476_s25 + $0x10] sm:$0xf] }
  0x22   : > { %v4025_v13 = vld [vmem:[%s6476_s25 + $0x10] sm:$0xf] }
  0x23   : > { %159 = vrot.lane.b32.xlu1 %v6497_v5, %s6380_s26  ;;  %155 = vrot.lane.b32.xlu0 %v6491_v4, %s6380_s26  ;;  %v4280_v14 = vld [vmem:[%s6476_s25 + $0x10] sm:$0xf]  ;;  %s6390_s25 = smov 120   ;;  %s6391_s26 = smov 26  }
  0x27   : > { %634 = vrot.lane.b32.xlu1 %v6479_v1, %s6381_s27  ;;  %632 = vrot.lane.b32.xlu0 %v6491_v4, %s6381_s27 }
  0x2b   : > { %638 = vrot.lane.b32.xlu1 %v624_v6, %s6381_s27  ;;  %636 = vrot.lane.b32.xlu0 %v6497_v5, %s6381_s27  ;;  %v6025_v6 = vld [vmem:[%s8795_s0 + $0x20] sm:$0xff]  ;;  %s6392_s27 = smov 86  }
  0x2f   : > { %887 = vrot.lane.b32.xlu1 %v6491_v4, %s6382_s28  ;;  %885 = vrot.lane.b32.xlu0 %v6482_v2, %s6382_s28 }
  0x33   : > { %891 = vrot.lane.b32.xlu1 %v6497_v5, %s6382_s28  ;;  %889 = vrot.lane.b32.xlu0 %v6479_v1, %s6382_s28 }
  0x37   : > { %1140 = vrot.lane.b32.xlu1 %v6482_v2, %s6383_s29  ;;  %893 = vrot.lane.b32.xlu0 %v879_v7, %s6382_s28 }
  0x3b   : > { %1144 = vrot.lane.b32.xlu1 %v6479_v1, %s6383_s29  ;;  %1142 = vrot.lane.b32.xlu0 %v6491_v4, %s6383_s29 }
  0x3f   : > { %1148 = vrot.lane.b32.xlu1 %v1134_v8, %s6383_s29  ;;  %1146 = vrot.lane.b32.xlu0 %v6497_v5, %s6383_s29 }
  0x43   : > { %1397 = vrot.lane.b32.xlu1 %v6491_v4, %s6384_s30  ;;  %1395 = vrot.lane.b32.xlu0 %v6482_v2, %s6384_s30 }
  0x47   : > { %1401 = vrot.lane.b32.xlu1 %v6497_v5, %s6384_s30  ;;  %1399 = vrot.lane.b32.xlu0 %v6479_v1, %s6384_s30 }
  0x4b   : > { %3036 = vrot.lane.b32.xlu1 %v6491_v4, %s6383_s29  ;;  %1403 = vrot.lane.b32.xlu0 %v1389_v9, %s6384_s30 }
  0x4f   : > { %3034 = vrot.lane.b32.xlu1 %v6482_v2, %s6383_s29  ;;  %3038 = vrot.lane.b32.xlu0 %v6479_v1, %s6383_s29 }
  0x53   : > { %3042 = vrot.lane.b32.xlu1 %v3026_v10, %s6383_s29  ;;  %3040 = vrot.lane.b32.xlu0 %v6497_v5, %s6383_s29  ;;  %s6393_s29 = smov 52  }
  0x57   : > { %3275 = vrot.lane.b32.xlu1 %v6491_v4, %s6382_s28  ;;  %3277 = vrot.lane.b32.xlu0 %v6479_v1, %s6382_s28 }
  0x5b   : > { %3273 = vrot.lane.b32.xlu1 %v6482_v2, %s6382_s28  ;;  %3279 = vrot.lane.b32.xlu0 %v6497_v5, %s6382_s28 }
  0x5f   : > { %3281 = vrot.lane.b32.xlu1 %v3026_v10, %s6382_s28  ;;  %3526 = vrot.lane.b32.xlu0 %v6479_v1, %s6384_s30 }
  0x63   : > { %3524 = vrot.lane.b32.xlu1 %v6491_v4, %s6384_s30  ;;  %3528 = vrot.lane.b32.xlu0 %v6497_v5, %s6384_s30 }
  0x67   : > { %3522 = vrot.lane.b32.xlu1 %v6482_v2, %s6384_s30  ;;  %3780 = vrot.lane.b32.xlu0 %v6479_v1, %s6385_s3 }
  0x6b   : > { %3530 = vrot.lane.b32.xlu1 %v3516_v11, %s6384_s30  ;;  %3782 = vrot.lane.b32.xlu0 %v6497_v5, %s6385_s3  ;;  %s6394_s30 = smov 112  }
  0x6f   : > { %3778 = vrot.lane.b32.xlu1 %v6491_v4, %s6385_s3  ;;  %4035 = vrot.lane.b32.xlu0 %v6479_v1, %s6386_s4 }
  0x73   : > { %3776 = vrot.lane.b32.xlu1 %v6482_v2, %s6385_s3  ;;  %4037 = vrot.lane.b32.xlu0 %v6497_v5, %s6386_s4 }
  0x77   : > { %3784 = vrot.lane.b32.xlu1 %v3770_v12, %s6385_s3  ;;  %4290 = vrot.lane.b32.xlu0 %v6479_v1, %s6387_s5 }
  0x7b   : > { %4033 = vrot.lane.b32.xlu1 %v6491_v4, %s6386_s4  ;;  %4292 = vrot.lane.b32.xlu0 %v6497_v5, %s6387_s5 }
  0x7f   : > { %4031 = vrot.lane.b32.xlu1 %v6482_v2, %s6386_s4 }
  0x83   : > { %4039 = vrot.lane.b32.xlu1 %v4025_v13, %s6386_s4  ;;  %s6395_s4 = smov 78  }
  0x87   : > { %4288 = vrot.lane.b32.xlu1 %v6491_v4, %s6387_s5 }
  0x8b   : > { %4286 = vrot.lane.b32.xlu1 %v6482_v2, %s6387_s5 }
  0x8d   : > { %v158_v15 = vpop.permute.xlu1 %157  ;;  %v154_v16 = vpop.permute.xlu0 %153 }
  0x8f   : > { %4294 = vrot.lane.b32.xlu1 %v4280_v14, %s6387_s5  ;;  %s6396_s5 = smov 36  }
  0x91   : > { %v631_v17 = vpop.permute.xlu1 %630  ;;  %v162_v18 = vpop.permute.xlu0 %161 }
  0x95   : > { %v160_v19 = vpop.permute.xlu1 %159  ;;  %v156_v20 = vpop.permute.xlu0 %155 }
  0x96   : > { %v165_v21 = vsel %vm163_vm0, %v156_v20, %v158_v15  ;;  %v164_v22 = vsel %vm163_vm0, %v154_v16, %v156_v20  ;;  %v167_v24 = vsel %vm163_vm0, %v160_v19, %v162_v18  ;;  %v166_v25 = vsel %vm163_vm0, %v158_v15, %v160_v19  ;;  %v6043_v15 = vld [vmem:[%s8795_s0 + $0x30] sm:$0xff]  ;;  %v6034_v20 = vld [vmem:[%s8795_s0 + $0x28] sm:$0xff] }
  0x97   : > { %5991 = vmatprep.subr.msk.mxu0 %vm172_vm1, %v165_v21 }
  0x98   : > { %5992 = vmatpush1.msk.msra.mxu0 %vm172_vm1, %v164_v22 }
  0x99   : > { %v635_v26 = vpop.permute.xlu1 %634  ;;  %5993 = vmatmul.mubr.msk.f32.vlgmr.msra.gmra.mrb[0].mxu0 %vm168_vm2, %v5990_v23  ;;  %5994 = vmatprep.subr.msk.mxu0 %vm172_vm1, %v167_v24  ;;  %v633_v27 = vpop.permute.xlu0 %632 }
  0x9a   : > { %5995 = vmatpush1.msk.msra.mxu0 %vm172_vm1, %v166_v25  ;;  %318 = vmatprep.mubr.f32.mxu0 %v6379_v0  ;;  %v642_v37 = vsel %vm640_vm4, %v633_v27, %v635_v26  ;;  %v641_v38 = vsel %vm640_vm4, %v631_v17, %v633_v27 }
  0x9b   : > { %6127 = vmatprep.subr.mxu0 %v6379_v0 }
  0x9d   : > { %v639_v28 = vpop.permute.xlu1 %638  ;;  %5996 = vmatmul.mubr.msk.f32.vlgmr.msra.gmra.mrb[2].mxu0 %vm168_vm2, %v5990_v23  ;;  %v637_v29 = vpop.permute.xlu0 %636 }
  0x9e   : > { %6128 = vmatpush3.msk.msra.mxu0 %vm172_vm1, %v162_v18  ;;  %6129 = vmatprep.mubr.msk.f32.mxu0 %vm6388_vm3, %v6379_v0  ;;  %v644_v41 = vsel %vm640_vm4, %v637_v29, %v639_v28  ;;  %v643_v43 = vsel %vm640_vm4, %v635_v26, %v637_v29  ;;  %v6061_v29 = vld [vmem:[%s8795_s0 + $0x40] sm:$0xff] }
  0x9f   : > { %5999 = vmatprep.subr.msk.mxu0 %vm172_vm1, %v6491_v4 }
  0xa1   : > { %v888_v30 = vpop.permute.xlu1 %887  ;;  %6130 = vmatmul.mubr.msk.f32.vlgmr.msra.gmra.mrb[4].mxu0 %vm168_vm2, %v5990_v23  ;;  %v886_v31 = vpop.permute.xlu0 %885 }
  0xa2   : > { %6000 = vmatpush1.msk.msra.mxu0 %vm172_vm1, %v6482_v2  ;;  %472 = vmatprep.mubr.f32.mxu0 %v6379_v0  ;;  %v896_v49 = vsel %vm895_vm5, %v886_v31, %v888_v30 }
  0xa3   : > { %6002 = vmatprep.subr.msk.mxu0 %vm172_vm1, %v6497_v5 }
  0xa5   : > { %v892_v33 = vpop.permute.xlu1 %891  ;;  %6001 = vmatmul.mubr.msk.f32.vlgmr.msra.gmra.mrb[0].mxu0 %vm168_vm2, %v142_v32  ;;  %v890_v34 = vpop.permute.xlu0 %889 }
  0xa6   : > { %6003 = vmatpush1.msk.msra.mxu0 %vm172_vm1, %v6479_v1  ;;  %543 = vmatprep.mubr.f32.mxu0 %v6379_v0  ;;  %v897_v48 = vsel %vm895_vm5, %v888_v30, %v890_v34  ;;  %v898_v54 = vsel %vm895_vm5, %v890_v34, %v892_v33 }
  0xa7   : > { %6132 = vmatprep.subr.mxu0 %v6379_v0 }
  0xa9   : > { %v1141_v35 = vpop.permute.xlu1 %1140  ;;  %6004 = vmatmul.mubr.msk.f32.vlgmr.msra.gmra.mrb[2].mxu0 %vm168_vm2, %v142_v32  ;;  %v894_v36 = vpop.permute.xlu0 %893 }
  0xaa   : > { %6133 = vmatpush3.msk.msra.mxu0 %vm172_vm1, %v6487_v3  ;;  %6134 = vmatprep.mubr.msk.f32.mxu0 %vm6388_vm3, %v6379_v0  ;;  %v899_v52 = vsel %vm895_vm5, %v892_v33, %v894_v36 }
  0xab   : > { %6008 = vmatprep.subr.msk.mxu0 %vm172_vm1, %v642_v37 }
  0xad   : > { %v6602_v39 = vpop.permute.xlu1 %1144  ;;  %6135 = vmatmul.mubr.msk.f32.vlgmr.msra.gmra.mrb[4].mxu0 %vm168_vm2, %v142_v32  ;;  %v1143_v40 = vpop.permute.xlu0 %1142 }
  0xae   : > { %6009 = vmatpush1.msk.msra.mxu0 %vm172_vm1, %v641_v38  ;;  %722 = vmatprep.mubr.f32.mxu0 %v6379_v0  ;;  %v1152_v59 = vsel %vm1150_vm6, %v1143_v40, %v6602_v39  ;;  %v1151_v63 = vsel %vm1150_vm6, %v1141_v35, %v1143_v40 }
  0xaf   : > { %6011 = vmatprep.subr.msk.mxu0 %vm172_vm1, %v644_v41 }
  0xb1   : > { %v6613_v44 = vpop.permute.xlu1 %1148  ;;  %6010 = vmatmul.mubr.msk.f32.vlgmr.msra.gmra.mrb[0].mxu0 %vm168_vm2, %v6007_v42  ;;  %v1147_v45 = vpop.permute.xlu0 %1146 }
  0xb2   : > { %6012 = vmatpush1.msk.msra.mxu0 %vm172_vm1, %v643_v43  ;;  %793 = vmatprep.mubr.f32.mxu0 %v6379_v0  ;;  %v1154_v4 = vsel %vm1150_vm6, %v1147_v45, %v6613_v44  ;;  %v1153_v7 = vsel %vm1150_vm6, %v6602_v39, %v1147_v45  ;;  %v6070_v39 = vld [vmem:[%s8795_s0 + $0x48] sm:$0xff] }
  0xb3   : > { %6137 = vmatprep.subr.mxu0 %v6379_v0 }
  0xb5   : > { %v6619_v46 = vpop.permute.xlu1 %1397  ;;  %6013 = vmatmul.mubr.msk.f32.vlgmr.msra.gmra.mrb[2].mxu0 %vm168_vm2, %v6007_v42  ;;  %v6622_v47 = vpop.permute.xlu0 %1395 }
  0xb6   : > { %6138 = vmatpush3.msk.msra.mxu0 %vm172_vm1, %v639_v28  ;;  %6139 = vmatprep.mubr.msk.f32.mxu0 %vm6388_vm3, %v6379_v0  ;;  %v1406_v16 = vsel %vm1405_vm7, %v6622_v47, %v6619_v46 }
  0xb7   : > { %6017 = vmatprep.subr.msk.mxu0 %vm172_vm1, %v897_v48 }
  0xb9   : > { %v6630_v50 = vpop.permute.xlu1 %1401  ;;  %6140 = vmatmul.mubr.msk.f32.vlgmr.msra.gmra.mrb[4].mxu0 %vm168_vm2, %v6007_v42  ;;  %v6633_v51 = vpop.permute.xlu0 %1399 }
  0xba   : > { %6018 = vmatpush1.msk.msra.mxu0 %vm172_vm1, %v896_v49  ;;  %977 = vmatprep.mubr.f32.mxu0 %v6379_v0  ;;  %v1407_v13 = vsel %vm1405_vm7, %v6619_v46, %v6633_v51  ;;  %v1408_v23 = vsel %vm1405_vm7, %v6633_v51, %v6630_v50  ;;  %v6079_v49 = vld [vmem:[%s8795_s0 + $0x50] sm:$0xff] }
  0xbb   : > { %6020 = vmatprep.subr.msk.mxu0 %vm172_vm1, %v899_v52 }
  0xbd   : > { %v3037_v55 = vpop.permute.xlu1 %3036  ;;  %6019 = vmatmul.mubr.msk.f32.vlgmr.msra.gmra.mrb[0].mxu0 %vm168_vm2, %v6016_v53  ;;  %v6644_v56 = vpop.permute.xlu0 %1403 }
  0xbe   : > { %6021 = vmatpush1.msk.msra.mxu0 %vm172_vm1, %v898_v54  ;;  %1048 = vmatprep.mubr.f32.mxu0 %v6379_v0  ;;  %v1409_v18 = vsel %vm1405_vm7, %v6630_v50, %v6644_v56 }
  0xbf   : > { %6142 = vmatprep.subr.mxu0 %v6379_v0 }
  0xc1   : > { %v3035_v57 = vpop.permute.xlu1 %3034  ;;  %6022 = vmatmul.mubr.msk.f32.vlgmr.msra.gmra.mrb[2].mxu0 %vm168_vm2, %v6016_v53  ;;  %v3039_v58 = vpop.permute.xlu0 %3038 }
  0xc2   : > { %6143 = vmatpush3.msk.msra.mxu0 %vm172_vm1, %v894_v36  ;;  %v3045_v60 = vsel %vm1150_vm6, %v3037_v55, %v3039_v58  ;;  %6144 = vmatprep.mubr.msk.f32.mxu0 %vm6388_vm3, %v6379_v0  ;;  %v3044_v61 = vsel %vm1150_vm6, %v3035_v57, %v3037_v55 }
  0xc3   : > { %6026 = vmatprep.subr.msk.mxu0 %vm172_vm1, %v1152_v59  ;;  %6045 = vmatprep.subr.msk.mxu1 %vm172_vm1, %v3045_v60 }
  0xc4   : > { %6046 = vmatpush1.msk.msra.mxu1 %vm172_vm1, %v3044_v61 }
  0xc5   : > { %v3043_v1 = vpop.permute.xlu1 %3042  ;;  %6145 = vmatmul.mubr.msk.f32.vlgmr.msra.gmra.mrb[4].mxu0 %vm168_vm2, %v6016_v53  ;;  %6047 = vmatmul.mubr.msk.f32.vlgmr.msra.gmra.mrb[0].mxu1 %vm168_vm2, %v6044_v62  ;;  %v3041_v2 = vpop.permute.xlu0 %3040 }
  0xc6   : > { %6027 = vmatpush1.msk.msra.mxu0 %vm172_vm1, %v1151_v63  ;;  %v3046_v3 = vsel %vm1150_vm6, %v3039_v58, %v3041_v2  ;;  %v3047_v5 = vsel %vm1150_vm6, %v3041_v2, %v3043_v1  ;;  %1232 = vmatprep.mubr.f32.mxu0 %v6379_v0  ;;  %v6088_v58 = vld [vmem:[%s8795_s0 + $0x58] sm:$0xff]  ;;  %v6389_v63 = vmov 1966171168   ;;  %v1645_v2 = vlaneseq }
  0xc7   : > { %6029 = vmatprep.subr.msk.mxu0 %vm172_vm1, %v1154_v4  ;;  %6048 = vmatprep.subr.msk.mxu1 %vm172_vm1, %v3047_v5 }
  0xc8   : > { %6049 = vmatpush1.msk.msra.mxu1 %vm172_vm1, %v3046_v3  ;;  %3196 = vmatprep.mubr.f32.mxu1 %v6379_v0  ;;  %v6826_v4 = vshrl.u32 %v1645_v2, 7 }
  0xc9   : > { %v3276_v8 = vpop.permute.xlu1 %3275  ;;  %6028 = vmatmul.mubr.msk.f32.vlgmr.msra.gmra.mrb[0].mxu0 %vm168_vm2, %v6025_v6  ;;  %6050 = vmatmul.mubr.msk.f32.vlgmr.msra.gmra.mrb[2].mxu1 %vm168_vm2, %v6044_v62  ;;  %v3278_v9 = vpop.permute.xlu0 %3277 }
  0xca   : > { %6030 = vmatpush1.msk.msra.mxu0 %vm172_vm1, %v1153_v7  ;;  %6157 = vmatprep.subr.mxu1 %v6379_v0  ;;  %v3284_v10 = vsel %vm895_vm5, %v3276_v8, %v3278_v9 }
  0xcb   : > { %6158 = vmatpush3.msk.msra.mxu1 %vm172_vm1, %v3043_v1  ;;  %1303 = vmatprep.mubr.f32.mxu0 %v6379_v0  ;;  %v1643_v1 = vunpack.c.l.s4 %v6389_v63 }
  0xcc   : > { %6053 = vmatprep.subr.msk.mxu1 %vm172_vm1, %v3284_v10  ;;  %6147 = vmatprep.subr.mxu0 %v6379_v0 }
  0xcd   : > { %6159 = vmatprep.mubr.msk.f32.mxu1 %vm6388_vm3, %v6379_v0  ;;  %v3274_v11 = vpop.permute.xlu1 %3273  ;;  %6031 = vmatmul.mubr.msk.f32.vlgmr.msra.gmra.mrb[2].mxu0 %vm168_vm2, %v6025_v6  ;;  %v3280_v14 = vpop.permute.xlu0 %3279  ;;  %v1644_v3 = vunpack.c.0.s8 %v1643_v1 }
  0xce   : > { %v3283_v12 = vsel %vm895_vm5, %v3274_v11, %v3276_v8  ;;  %6148 = vmatpush3.msk.msra.mxu0 %vm172_vm1, %v6613_v44  ;;  %6160 = vmatmul.mubr.msk.f32.vlgmr.msra.gmra.mrb[4].mxu1 %vm168_vm2, %v6044_v62  ;;  %v3285_v21 = vsel %vm895_vm5, %v3278_v9, %v3280_v14  ;;  %v6843_v9 = vsub.s32 0, %v6826_v4 }
  0xcf   : > { %6035 = vmatprep.subr.msk.mxu0 %vm172_vm1, %v1407_v13  ;;  %6054 = vmatpush1.msk.msra.mxu1 %vm172_vm1, %v3283_v12  ;;  %v6830_v5 = vsub.s32 %v1644_v3, %v6826_v4 }
  0xd0   : > { %6149 = vmatprep.mubr.msk.f32.mxu0 %vm6388_vm3, %v6379_v0  ;;  %3364 = vmatprep.mubr.f32.mxu1 %v6379_v0 }
  0xd1   : > { %v3282_v17 = vpop.permute.xlu1 %3281  ;;  %6150 = vmatmul.mubr.msk.f32.vlgmr.msra.gmra.mrb[4].mxu0 %vm168_vm2, %v6025_v6  ;;  %v3527_v22 = vpop.permute.xlu0 %3526 }
  0xd2   : > { %6036 = vmatpush1.msk.msra.mxu0 %vm172_vm1, %v1406_v16  ;;  %6055 = vmatmul.mubr.msk.f32.vlgmr.msra.gmra.mrb[0].mxu1 %vm168_vm2, %v6043_v15  ;;  %v3286_v19 = vsel %vm895_vm5, %v3280_v14, %v3282_v17 }
  0xd3   : > { %6038 = vmatprep.subr.msk.mxu0 %vm172_vm1, %v1409_v18  ;;  %6056 = vmatprep.subr.msk.mxu1 %vm172_vm1, %v3286_v19 }
  0xd4   : > { %1487 = vmatprep.mubr.f32.mxu0 %v6379_v0  ;;  %6057 = vmatpush1.msk.msra.mxu1 %vm172_vm1, %v3285_v21 }
  0xd5   : > { %3435 = vmatprep.mubr.f32.mxu1 %v6379_v0  ;;  %v3525_v24 = vpop.permute.xlu1 %3524  ;;  %6037 = vmatmul.mubr.msk.f32.vlgmr.msra.gmra.mrb[0].mxu0 %vm168_vm2, %v6034_v20  ;;  %v3529_v28 = vpop.permute.xlu0 %3528 }
  0xd6   : > { %6039 = vmatpush1.msk.msra.mxu0 %vm172_vm1, %v1408_v23  ;;  %6058 = vmatmul.mubr.msk.f32.vlgmr.msra.gmra.mrb[2].mxu1 %vm168_vm2, %v6043_v15  ;;  %v3533_v25 = vsel %vm1405_vm7, %v3525_v24, %v3527_v22  ;;  %v3534_v32 = vsel %vm1405_vm7, %v3527_v22, %v3529_v28 }
  0xd7   : > { %6162 = vmatprep.subr.mxu1 %v6379_v0  ;;  %1558 = vmatprep.mubr.f32.mxu0 %v6379_v0 }
  0xd8   : > { %6163 = vmatpush3.msk.msra.mxu1 %vm172_vm1, %v3282_v17  ;;  %6152 = vmatprep.subr.mxu0 %v6379_v0 }
  0xd9   : > { %6062 = vmatprep.subr.msk.mxu1 %vm172_vm1, %v3533_v25  ;;  %6164 = vmatprep.mubr.msk.f32.mxu1 %vm6388_vm3, %v6379_v0  ;;  %v3523_v26 = vpop.permute.xlu1 %3522  ;;  %v3781_v33 = vpop.permute.xlu0 %3780 }
  0xda   : > { %v3532_v27 = vsel %vm1405_vm7, %v3523_v26, %v3525_v24  ;;  %6040 = vmatmul.mubr.msk.f32.vlgmr.msra.gmra.mrb[2].mxu0 %vm168_vm2, %v6034_v20  ;;  %6165 = vmatmul.mubr.msk.f32.vlgmr.msra.gmra.mrb[4].mxu1 %vm168_vm2, %v6043_v15 }
  0xdb   : > { %6153 = vmatpush3.msk.msra.mxu0 %vm172_vm1, %v6644_v56  ;;  %6063 = vmatpush1.msk.msra.mxu1 %vm172_vm1, %v3532_v27 }
  0xdc   : > { %6154 = vmatprep.mubr.msk.f32.mxu0 %vm6388_vm3, %v6379_v0  ;;  %3613 = vmatprep.mubr.f32.mxu1 %v6379_v0 }
  0xdd   : > { %v3531_v30 = vpop.permute.xlu1 %3530  ;;  %v3783_v38 = vpop.permute.xlu0 %3782 }
  0xde   : > { %6155 = vmatmul.mubr.msk.f32.vlgmr.msra.gmra.mrb[4].mxu0 %vm168_vm2, %v6034_v20  ;;  %6064 = vmatmul.mubr.msk.f32.vlgmr.msra.gmra.mrb[0].mxu1 %vm168_vm2, %v6061_v29  ;;  %v3535_v31 = vsel %vm1405_vm7, %v3529_v28, %v3531_v30  ;;  %v3789_v42 = vsel %vm3786_vm8, %v3781_v33, %v3783_v38 }
  0xdf   : > { %6065 = vmatprep.subr.msk.mxu1 %vm172_vm1, %v3535_v31  ;;  %3684 = vmatprep.mubr.f32.mxu1 %v6379_v0 }
  0xe0   : > { %6066 = vmatpush1.msk.msra.mxu1 %vm172_vm1, %v3534_v32 }
  0xe1   : > { %v3779_v34 = vpop.permute.xlu1 %3778  ;;  %6167 = vmatprep.subr.mxu1 %v6379_v0  ;;  %v4036_v43 = vpop.permute.xlu0 %4035 }
  0xe2   : > { %6067 = vmatmul.mubr.msk.f32.vlgmr.msra.gmra.mrb[2].mxu1 %vm168_vm2, %v6061_v29  ;;  %v3788_v35 = vsel %vm3786_vm8, %v3779_v34, %v3781_v33 }
  0xe3   : > { %6168 = vmatpush3.msk.msra.mxu1 %vm172_vm1, %v3531_v30  ;;  %6169 = vmatprep.mubr.msk.f32.mxu1 %vm6388_vm3, %v6379_v0 }
  0xe4   : > { %6071 = vmatprep.subr.msk.mxu1 %vm172_vm1, %v3788_v35 }
  0xe5   : > { %v3777_v36 = vpop.permute.xlu1 %3776  ;;  %v4038_v48 = vpop.permute.xlu0 %4037 }
  0xe6   : > { %v3787_v37 = vsel %vm3786_vm8, %v3777_v36, %v3779_v34  ;;  %6170 = vmatmul.mubr.msk.f32.vlgmr.msra.gmra.mrb[4].mxu1 %vm168_vm2, %v6061_v29  ;;  %v4044_v52 = vsel %vm4041_vm9, %v4036_v43, %v4038_v48 }
  0xe7   : > { %6072 = vmatpush1.msk.msra.mxu1 %vm172_vm1, %v3787_v37  ;;  %3868 = vmatprep.mubr.f32.mxu1 %v6379_v0 }
  0xe9   : > { %v3785_v40 = vpop.permute.xlu1 %3784  ;;  %v4291_v53 = vpop.permute.xlu0 %4290 }
  0xea   : > { %6073 = vmatmul.mubr.msk.f32.vlgmr.msra.gmra.mrb[0].mxu1 %vm168_vm2, %v6070_v39  ;;  %v3790_v41 = vsel %vm3786_vm8, %v3783_v38, %v3785_v40 }
  0xeb   : > { %6074 = vmatprep.subr.msk.mxu1 %vm172_vm1, %v3790_v41  ;;  %3939 = vmatprep.mubr.f32.mxu1 %v6379_v0 }
  0xec   : > { %6075 = vmatpush1.msk.msra.mxu1 %vm172_vm1, %v3789_v42 }
  0xed   : > { %v4034_v44 = vpop.permute.xlu1 %4033  ;;  %6172 = vmatprep.subr.mxu1 %v6379_v0  ;;  %v4293_v59 = vpop.permute.xlu0 %4292 }
  0xee   : > { %6076 = vmatmul.mubr.msk.f32.vlgmr.msra.gmra.mrb[2].mxu1 %vm168_vm2, %v6070_v39  ;;  %v4043_v45 = vsel %vm4041_vm9, %v4034_v44, %v4036_v43  ;;  %v4299_v62 = vsel %vm4296_vm10, %v4291_v53, %v4293_v59 }
  0xef   : > { %6173 = vmatpush3.msk.msra.mxu1 %vm172_vm1, %v3785_v40  ;;  %6174 = vmatprep.mubr.msk.f32.mxu1 %vm6388_vm3, %v6379_v0 }
  0xf0   : > { %6080 = vmatprep.subr.msk.mxu1 %vm172_vm1, %v4043_v45 }
  0xf1   : > { %v4032_v46 = vpop.permute.xlu1 %4031 }
  0xf2   : > { %v4042_v47 = vsel %vm4041_vm9, %v4032_v46, %v4034_v44  ;;  %6175 = vmatmul.mubr.msk.f32.vlgmr.msra.gmra.mrb[4].mxu1 %vm168_vm2, %v6070_v39 }
  0xf3   : > { %6081 = vmatpush1.msk.msra.mxu1 %vm172_vm1, %v4042_v47  ;;  %4123 = vmatprep.mubr.f32.mxu1 %v6379_v0 }
  0xf5   : > { %v4040_v50 = vpop.permute.xlu1 %4039 }
  0xf6   : > { %6082 = vmatmul.mubr.msk.f32.vlgmr.msra.gmra.mrb[0].mxu1 %vm168_vm2, %v6079_v49  ;;  %v4045_v51 = vsel %vm4041_vm9, %v4038_v48, %v4040_v50 }
  0xf7   : > { %6083 = vmatprep.subr.msk.mxu1 %vm172_vm1, %v4045_v51  ;;  %4194 = vmatprep.mubr.f32.mxu1 %v6379_v0 }
  0xf8   : > { %6084 = vmatpush1.msk.msra.mxu1 %vm172_vm1, %v4044_v52 }
  0xf9   : > { %v4289_v54 = vpop.permute.xlu1 %4288  ;;  %6177 = vmatprep.subr.mxu1 %v6379_v0 }
  0xfa   : > { %6085 = vmatmul.mubr.msk.f32.vlgmr.msra.gmra.mrb[2].mxu1 %vm168_vm2, %v6079_v49  ;;  %v4298_v55 = vsel %vm4296_vm10, %v4289_v54, %v4291_v53 }
  0xfb   : > { %6178 = vmatpush3.msk.msra.mxu1 %vm172_vm1, %v4040_v50  ;;  %6179 = vmatprep.mubr.msk.f32.mxu1 %vm6388_vm3, %v6379_v0 }
  0xfc   : > { %6089 = vmatprep.subr.msk.mxu1 %vm172_vm1, %v4298_v55 }
  0xfd   : > { %v4287_v56 = vpop.permute.xlu1 %4286 }
  0xfe   : > { %v4297_v57 = vsel %vm4296_vm10, %v4287_v56, %v4289_v54  ;;  %6180 = vmatmul.mubr.msk.f32.vlgmr.msra.gmra.mrb[4].mxu1 %vm168_vm2, %v6079_v49 }
  0xff   : > { %6090 = vmatpush1.msk.msra.mxu1 %vm172_vm1, %v4297_v57  ;;  %4378 = vmatprep.mubr.f32.mxu1 %v6379_v0  ;;  %v6962_v57 = vsub.s32 1, %v6826_v4 }
 0x101   : > { %v4295_v60 = vpop.permute.xlu1 %4294 }
 0x102   : > { %6091 = vmatmul.mubr.msk.f32.vlgmr.msra.gmra.mrb[0].mxu1 %vm168_vm2, %v6088_v58  ;;  %v4300_v61 = vsel %vm4296_vm10, %v4293_v59, %v4295_v60 }
 0x103   : > { %6092 = vmatprep.subr.msk.mxu1 %vm172_vm1, %v4300_v61  ;;  %4449 = vmatprep.mubr.f32.mxu1 %v6379_v0 }
 0x104   : > { %6093 = vmatpush1.msk.msra.mxu1 %vm172_vm1, %v4299_v62 }
 0x105   : > { %6182 = vmatprep.subr.mxu1 %v6379_v0 }
 0x106   : > { %6094 = vmatmul.mubr.msk.f32.vlgmr.msra.gmra.mrb[2].mxu1 %vm168_vm2, %v6088_v58 }
 0x107   : > { %6183 = vmatpush3.msk.msra.mxu1 %vm172_vm1, %v4295_v60  ;;  %6184 = vmatprep.mubr.msk.f32.mxu1 %vm6388_vm3, %v6379_v0 }
 0x10a   : > { %6185 = vmatmul.mubr.msk.f32.vlgmr.msra.gmra.mrb[4].mxu1 %vm168_vm2, %v6088_v58 }
 0x1a8   : > { %v6834_v6 = vpop.f32.mrb[0].mxu0 }
 0x1a9   : > { %v1641_v7 = vcombine.high %v6834_v6, %v6834_v6  ;;  %v1648_v0 = vrot.slane %v6834_v6, %v6830_v5  ;;  %v6840_v8 = vpop.f32.mrb[1].mxu0 }
 0x1aa   : > { %v1804_v10 = vcombine.low %v6834_v6, %v6840_v8  ;;  %v1805_v11 = vcombine.high %v6834_v6, %v6840_v8  ;;  %v1982_v41 = vrot.slane %v6840_v8, %v6830_v5 }
 0x1ab   : > { %v1655_v12 = vrot.slane %v1641_v7, %v6830_v5  ;;  %v1656_v13 = vcombine.high %v1648_v0, %v1648_v0  ;;  %v1664_v14 = vrot.slane %v1648_v0, %v6830_v5 }
 0x1ac   : > { %v6937_v46 = vrot.slane %v1804_v10, %v6830_v5  ;;  %v6955_v54 = vrot.slane %v1982_v41, %v6830_v5  ;;  %v6976_v60 = vrot.slane %v1805_v11, %v6830_v5  ;;  %v1990_v10 = vcombine.high %v1982_v41, %v1982_v41 }
 0x1ad   : > { %1699 = vst.msk [vmem:[%s6851_s24] sm:$0x1] %vm1698_vm11, %v1664_v14  ;;  %v6855_v15 = vpop.f32.mrb[2].mxu0  ;;  %v1710_v16 = vrot.slane %v1664_v14, %v6843_v9  ;;  %v1678_v17 = vrot.slane %v1656_v13, %v6830_v5  ;;  %v6859_v18 = vcombine.high %v1664_v14, %v1664_v14  ;;  %v1657_v22 = vcombine.high %v1655_v12, %v1655_v12 }
 0x1ae   : > { %v2153_v19 = vcombine.low %v6840_v8, %v6855_v15  ;;  %v2154_v20 = vcombine.high %v6840_v8, %v6855_v15  ;;  %v6865_v21 = vpop.f32.mrb[3].mxu0  ;;  %v6887_v30 = vrot.slane %v1655_v12, %v6830_v5  ;;  %v6970_v59 = vrot.slane %v6937_v46, %v6830_v5 }
 0x1af   : > { %v2502_v23 = vcombine.low %v6855_v15, %v6865_v21  ;;  %v2503_v24 = vcombine.high %v6855_v15, %v6865_v21  ;;  %1739 = vrot.lane.b32.xlu1 %v1710_v16, %s6382_s28  ;;  %v1714_v25 = vrot.slane %v1678_v17, %v6843_v9  ;;  %1700 = vst.msk [vmem:[%s6851_s24 + $0x20] sm:$0x1] %vm1698_vm11, %v1678_v17  ;;  %1701 = vst.msk [vmem:[%s6851_s24 + $0x40] sm:$0x1] %vm1698_vm11, %v6859_v18 }
 0x1b0   : > { %v6889_v31 = vcombine.high %v1678_v17, %v1678_v17  ;;  %v6892_v32 = vrot.slane %v1657_v22, %v6830_v5  ;;  %1703 = vst.msk [vmem:[%s6851_s24 + $0x80] sm:$0x1] %vm1698_vm11, %v6887_v30  ;;  %v6906_v33 = vcombine.high %v6887_v30, %v6887_v30  ;;  %v2027_v6 = vrot.slane %v6955_v54, %v6843_v9 }
 0x1b1   : > { %v6878_v26 = vpop.f32.mrb[4].mxu0  ;;  %1741 = vrot.lane.b32.xlu0 %v1714_v25, %s6382_s28  ;;  %v1861_v7 = vrot.slane %v6970_v59, %v6962_v57  ;;  %v1835_v0 = vrot.slane %v6976_v60, %v6830_v5  ;;  %v2012_v13 = vrot.slane %v1990_v10, %v6830_v5  ;;  %v1718_v17 = vrot.slane %v6859_v18, %v6843_v9 }
 0x1b2   : > { %v2851_v27 = vcombine.low %v6865_v21, %v6878_v26  ;;  %v2852_v28 = vcombine.high %v6865_v21, %v6878_v26  ;;  %v6156_v29 = vpop.f32.mrb[5].mxu0  ;;  %1702 = vst.msk [vmem:[%s6851_s24 + $0x60] sm:$0x1] %vm1698_vm11, %v6889_v31  ;;  %1704 = vst.msk [vmem:[%s6851_s24 + $0xa0] sm:$0x1] %vm1698_vm11, %v6892_v32  ;;  %v6913_v34 = vcombine.high %v6892_v32, %v6892_v32 }
 0x1b3   : > { %1771 = vrot.lane.b32.xlu1 %v1710_v16, %s6385_s3  ;;  %1705 = vst.msk [vmem:[%s6851_s24 + $0xc0] sm:$0x1] %vm1698_vm11, %v6906_v33  ;;  %v1893_v12 = vrot.slane %v1835_v0, %v6962_v57  ;;  %v2031_v16 = vrot.slane %v2012_v13, %v6843_v9  ;;  %v1726_v22 = vrot.slane %v6887_v30, %v6843_v9 }
 0x1b4   : > { %1706 = vst.msk [vmem:[%s6851_s24 + $0xe0] sm:$0x1] %vm1698_vm11, %v6913_v34  ;;  %v1730_v18 = vrot.slane %v6892_v32, %v6843_v9  ;;  %v1857_v32 = vrot.slane %v6970_v59, %v6843_v9 }
 0x1b5   : > { %1773 = vrot.lane.b32.xlu0 %v1714_v25, %s6385_s3  ;;  %v1722_v25 = vrot.slane %v6889_v31, %v6843_v9  ;;  %v1820_v31 = vcombine.high %v6937_v46, %v6937_v46 }
 0x1b7   : > { %v7065_v41 = vrot.slane %v1820_v31, %v6830_v5 }
 0x1b9   : > { %v1869_v46 = vrot.slane %v7065_v41, %v6962_v57 }
 0x1d5   : > { %v6918_v35 = vpop.f32.mrb[0].mxu1 }
 0x1d6   : > { %v4532_v36 = vcombine.high %v6918_v35, %v6918_v35  ;;  %v4539_v37 = vrot.slane %v6918_v35, %v6830_v5  ;;  %v6924_v38 = vpop.f32.mrb[1].mxu1 }
 0x1d7   : > { %v4694_v39 = vcombine.low %v6918_v35, %v6924_v38  ;;  %v4695_v40 = vcombine.high %v6918_v35, %v6924_v38 }
 0x1d8   : > { %v4546_v42 = vrot.slane %v4532_v36, %v6830_v5  ;;  %v4547_v43 = vcombine.high %v4539_v37, %v4539_v37  ;;  %v4555_v44 = vrot.slane %v4539_v37, %v6830_v5  ;;  %v1975_v36 = vcombine.high %v6840_v8, %v6840_v8 }
 0x1d9   : > { %v6934_v45 = vpop.f32.mrb[2].mxu1 }
 0x1da   : > { %v4548_v47 = vcombine.high %v4546_v42, %v4546_v42  ;;  %4589 = vst.msk [vmem:[%s6851_s24 + $0x1] sm:$0x1] %vm1698_vm11, %v4555_v44  ;;  %v5042_v48 = vcombine.low %v6924_v38, %v6934_v45  ;;  %v5043_v49 = vcombine.high %v6924_v38, %v6934_v45  ;;  %v6945_v50 = vpop.f32.mrb[3].mxu1  ;;  %v6952_v53 = vrot.slane %v4555_v44, %v6843_v9 }
 0x1db   : > { %v5390_v51 = vcombine.low %v6934_v45, %v6945_v50  ;;  %v5391_v52 = vcombine.high %v6934_v45, %v6945_v50  ;;  %v4569_v56 = vrot.slane %v4547_v43, %v6830_v5  ;;  %v4577_v61 = vcombine.high %v4555_v44, %v4555_v44 }
 0x1dc   : > { %v6958_v55 = vrot.slane %v4548_v47, %v6830_v5  ;;  %4629 = vrot.lane.b32.xlu1 %v6952_v53, %s6382_s28  ;;  %v4562_v62 = vrot.slane %v4546_v42, %v6830_v5  ;;  %v1889_v42 = vrot.slane %v1835_v0, %v6843_v9  ;;  %v2020_v43 = vcombine.high %v6955_v54, %v6955_v54 }
 0x1dd   : > { %v6966_v58 = vpop.f32.mrb[4].mxu1  ;;  %v6987_v2 = vrot.slane %v4569_v56, %v6843_v9  ;;  %4590 = vst.msk [vmem:[%s6851_s24 + $0x21] sm:$0x1] %vm1698_vm11, %v4569_v56  ;;  %v4579_v4 = vcombine.high %v4569_v56, %v4569_v56  ;;  %4591 = vst.msk [vmem:[%s6851_s24 + $0x41] sm:$0x1] %vm1698_vm11, %v4577_v61  ;;  %v7042_v29 = vrot.slane %v4577_v61, %v6843_v9 }
 0x1de   : > { %4594 = vst.msk [vmem:[%s6851_s24 + $0xa1] sm:$0x1] %vm1698_vm11, %v6958_v55  ;;  %v5738_v63 = vcombine.low %v6945_v50, %v6966_v58  ;;  %v5739_v1 = vcombine.high %v6945_v50, %v6966_v58  ;;  %v6186_v3 = vpop.f32.mrb[5].mxu1  ;;  %4593 = vst.msk [vmem:[%s6851_s24 + $0x81] sm:$0x1] %vm1698_vm11, %v4562_v62  ;;  %v7008_v11 = vcombine.high %v4562_v62, %v4562_v62 }
 0x1df   : > { %4631 = vrot.lane.b32.xlu0 %v6987_v2, %s6382_s28  ;;  %4592 = vst.msk [vmem:[%s6851_s24 + $0x61] sm:$0x1] %vm1698_vm11, %v4579_v4  ;;  %v7018_v14 = vcombine.high %v6958_v55, %v6958_v55  ;;  %v7048_v30 = vrot.slane %v4562_v62, %v6843_v9  ;;  %v7062_v37 = vrot.slane %v4579_v4, %v6843_v9 }
 0x1e0   : > { %2056 = vrot.lane.b32.xlu1 %v2027_v6, %s6390_s25  ;;  %4595 = vst.msk [vmem:[%s6851_s24 + $0xc1] sm:$0x1] %vm1698_vm11, %v7008_v11  ;;  %v1989_v44 = vrot.slane %v1975_v36, %v6830_v5  ;;  %v7078_v47 = vcombine.high %v6970_v59, %v6970_v59  ;;  %v1821_v56 = vcombine.high %v6976_v60, %v6976_v60 }
 0x1e1   : > { %4596 = vst.msk [vmem:[%s6851_s24 + $0xe1] sm:$0x1] %vm1698_vm11, %v7018_v14  ;;  %v2035_v61 = vrot.slane %v2020_v43, %v6843_v9  ;;  %v7099_v4 = vcombine.high %v1835_v0, %v1835_v0 }
 0x1e2   : > { %v7084_v54 = vrot.slane %v1989_v44, %v6830_v5  ;;  %v1877_v62 = vrot.slane %v7078_v47, %v6962_v57  ;;  %v7091_v3 = vrot.slane %v1821_v56, %v6830_v5  ;;  %v1991_v10 = vcombine.high %v1989_v44, %v1989_v44 }
 0x1e3   : > { %1920 = vrot.lane.b32.xlu0 %v1861_v7, %s6391_s26  ;;  %v2022_v7 = vcombine.high %v2012_v13, %v2012_v13  ;;  %v7158_v44 = vrot.slane %v2153_v19, %v6830_v5  ;;  %v1865_v56 = vrot.slane %v7065_v41, %v6843_v9 }
 0x1e4   : > { %2088 = vrot.lane.b32.xlu1 %v2027_v6, %s6392_s27  ;;  %v2043_v59 = vrot.slane %v7084_v54, %v6843_v9  ;;  %v1901_v60 = vrot.slane %v7091_v3, %v6962_v57  ;;  %v7109_v0 = vrot.slane %v1991_v10, %v6830_v5 }
 0x1e5   : > { %v7174_v19 = vrot.slane %v7158_v44, %v6830_v5 }
 0x1e7   : > { %1936 = vrot.lane.b32.xlu0 %v1893_v12, %s6391_s26  ;;  %v2039_v12 = vrot.slane %v2022_v7, %v6843_v9  ;;  %v1905_v7 = vrot.slane %v7099_v4, %v6843_v9 }
 0x1e8   : > { %2120 = vrot.lane.b32.xlu1 %v2027_v6, %s6393_s29  ;;  %v1909_v6 = vrot.slane %v7099_v4, %v6962_v57 }
 0x1eb   : > { %2058 = vrot.lane.b32.xlu0 %v2031_v16, %s6390_s25 }
 0x1ec   : > { %1743 = vrot.lane.b32.xlu1 %v1718_v17, %s6382_s28 }
 0x1ef   : > { %2090 = vrot.lane.b32.xlu0 %v2031_v16, %s6392_s27 }
 0x1f0   : > { %1747 = vrot.lane.b32.xlu1 %v1726_v22, %s6382_s28 }
 0x1f3   : > { %2122 = vrot.lane.b32.xlu0 %v2031_v16, %s6393_s29  ;;  %v2047_v16 = vrot.slane %v7109_v0, %v6843_v9 }
 0x1f4   : > { %1775 = vrot.lane.b32.xlu1 %v1718_v17, %s6385_s3  ;;  %v1734_v17 = vrot.slane %v6906_v33, %v6843_v9  ;;  %v7138_v33 = vrot.slane %v6865_v21, %v6830_v5 }
 0x1f7   : > { %1745 = vrot.lane.b32.xlu0 %v1722_v25, %s6382_s28 }
 0x1f8   : > { %1779 = vrot.lane.b32.xlu1 %v1726_v22, %s6385_s3 }
 0x1fb   : > { %1749 = vrot.lane.b32.xlu0 %v1730_v18, %s6382_s28 }
 0x1fc   : > { %4633 = vrot.lane.b32.xlu1 %v7042_v29, %s6382_s28 }
 0x1ff   : > { %1777 = vrot.lane.b32.xlu0 %v1722_v25, %s6385_s3  ;;  %v2331_v25 = vrot.slane %v6855_v15, %v6830_v5 }
 0x200   : > { %4637 = vrot.lane.b32.xlu1 %v7048_v30, %s6382_s28 }
 0x201   : > { %v2339_v8 = vcombine.high %v2331_v25, %v2331_v25 }
 0x203   : > { %1781 = vrot.lane.b32.xlu0 %v1730_v18, %s6385_s3 }
 0x204   : > { %1918 = vrot.lane.b32.xlu1 %v1857_v32, %s6391_s26  ;;  %v7130_v32 = vrot.slane %v2331_v25, %v6830_v5 }
 0x206   : > { %v2376_v36 = vrot.slane %v7130_v32, %v6843_v9 }
 0x207   : > { %4635 = vrot.lane.b32.xlu0 %v7062_v37, %s6382_s28 }
 0x208   : > { %1934 = vrot.lane.b32.xlu1 %v1889_v42, %s6391_s26  ;;  %v7146_v42 = vrot.slane %v7138_v33, %v6830_v5 }
 0x20a   : > { %v2725_v43 = vrot.slane %v7146_v42, %v6843_v9 }
 0x20b   : > { %1924 = vrot.lane.b32.xlu0 %v1869_v46, %s6391_s26  ;;  %v1738_v46 = vrot.slane %v6913_v34, %v6843_v9  ;;  %v1873_v34 = vrot.slane %v7078_v47, %v6843_v9 }
 0x20c   : > { %2060 = vrot.lane.b32.xlu1 %v2035_v61, %s6390_s25 }
 0x20f   : > { %1928 = vrot.lane.b32.xlu0 %v1877_v62, %s6391_s26  ;;  %v2210_v62 = vrot.slane %v7174_v19, %v6962_v57 }
 0x210   : > { %2064 = vrot.lane.b32.xlu1 %v2043_v59, %s6390_s25 }
 0x213   : > { %1940 = vrot.lane.b32.xlu0 %v1901_v60, %s6391_s26  ;;  %v7193_v60 = vrot.slane %v2339_v8, %v6830_v5 }
 0x214   : > { %2092 = vrot.lane.b32.xlu1 %v2035_v61, %s6392_s27 }
 0x215   : > { %v2380_v10 = vrot.slane %v7193_v60, %v6843_v9 }
 0x217   : > { %1944 = vrot.lane.b32.xlu0 %v1909_v6, %s6391_s26  ;;  %v2021_v6 = vcombine.high %v7084_v54, %v7084_v54  ;;  %v7210_v54 = vcombine.high %v7065_v41, %v7065_v41 }
 0x218   : > { %2096 = vrot.lane.b32.xlu1 %v2043_v59, %s6392_s27 }
 0x21b   : > { %2062 = vrot.lane.b32.xlu0 %v2039_v12, %s6390_s25 }
 0x21c   : > { %2124 = vrot.lane.b32.xlu1 %v2035_v61, %s6393_s29  ;;  %v7170_v61 = vrot.slane %v2154_v20, %v6830_v5  ;;  %v1897_v20 = vrot.slane %v7091_v3, %v6843_v9 }
 0x21f   : > { %2066 = vrot.lane.b32.xlu0 %v2047_v16, %s6390_s25 }
 0x220   : > { %2128 = vrot.lane.b32.xlu1 %v2043_v59, %s6393_s29  ;;  %v7184_v59 = vrot.slane %v7170_v61, %v6830_v5 }
 0x221   : > { %v1740_v13 = vpop.permute.xlu1 %1739 }
 0x222   : > { %1763 = vst.msk [vmem:[%s6851_s24 + $0x2] sm:$0x1] %vm1698_vm11, %v1740_v13  ;;  %v2242_v47 = vrot.slane %v7184_v59, %v6962_v57  ;;  %v1885_v13 = vrot.slane %v7210_v54, %v6962_v57  ;;  %v2238_v8 = vrot.slane %v7184_v59, %v6843_v9 }
 0x223   : > { %v1742_v22 = vpop.permute.xlu0 %1741  ;;  %2094 = vrot.lane.b32.xlu0 %v2039_v12, %s6392_s27 }
 0x224   : > { %1764 = vst.msk [vmem:[%s6851_s24 + $0x22] sm:$0x1] %vm1698_vm11, %v1742_v22  ;;  %1751 = vrot.lane.b32.xlu1 %v1734_v17, %s6382_s28  ;;  %v2023_v22 = vcombine.high %v7109_v0, %v7109_v0  ;;  %v2324_v0 = vcombine.high %v6855_v15, %v6855_v15  ;;  %v2688_v15 = vcombine.high %v7138_v33, %v7138_v33 }
 0x225   : > { %v1772_v18 = vpop.permute.xlu1 %1771 }
 0x226   : > { %1795 = vst.msk [vmem:[%s6851_s24 + $0x4] sm:$0x1] %vm1698_vm11, %v1772_v18 }
 0x227   : > { %v1774_v31 = vpop.permute.xlu0 %1773  ;;  %2098 = vrot.lane.b32.xlu0 %v2047_v16, %s6392_s27 }
 0x228   : > { %1796 = vst.msk [vmem:[%s6851_s24 + $0x24] sm:$0x1] %vm1698_vm11, %v1774_v31  ;;  %1783 = vrot.lane.b32.xlu1 %v1734_v17, %s6385_s3  ;;  %v7220_v17 = vcombine.high %v7091_v3, %v7091_v3 }
 0x22a   : > { %v1917_v3 = vrot.slane %v7220_v17, %v6962_v57 }
 0x22b   : > { %2126 = vrot.lane.b32.xlu0 %v2039_v12, %s6393_s29  ;;  %v2051_v12 = vrot.slane %v2021_v6, %v6843_v9 }
 0x22c   : > { %2405 = vrot.lane.b32.xlu1 %v2376_v36, %s6394_s30 }
 0x22f   : > { %2130 = vrot.lane.b32.xlu0 %v2047_v16, %s6393_s29 }
 0x230   : > { %2437 = vrot.lane.b32.xlu1 %v2376_v36, %s6395_s4 }
 0x233   : > { %2818 = vrot.lane.b32.xlu0 %v2725_v43, %s6396_s5 }
 0x234   : > { %2469 = vrot.lane.b32.xlu1 %v2376_v36, %s6397_s6  ;;  %v2055_v36 = vrot.slane %v2023_v22, %v6843_v9 }
 0x237   : > { %1753 = vrot.lane.b32.xlu0 %v1738_v46, %s6382_s28 }
 0x238   : > { %1922 = vrot.lane.b32.xlu1 %v1865_v56, %s6391_s26  ;;  %v2206_v56 = vrot.slane %v7174_v19, %v6843_v9 }
 0x23b   : > { %1785 = vrot.lane.b32.xlu0 %v1738_v46, %s6385_s3 }
 0x23c   : > { %1926 = vrot.lane.b32.xlu1 %v1873_v34, %s6391_s26 }
 0x23f   : > { %2269 = vrot.lane.b32.xlu0 %v2210_v62, %s6398_s7 }
 0x240   : > { %1938 = vrot.lane.b32.xlu1 %v1897_v20, %s6391_s26  ;;  %v2369_v20 = vcombine.high %v7130_v32, %v7130_v32 }
 0x243   : > { %2285 = vrot.lane.b32.xlu0 %v2242_v47, %s6398_s7  ;;  %v7262_v47 = vrot.slane %v2324_v0, %v6830_v5 }
 0x244   : > { %1942 = vrot.lane.b32.xlu1 %v1905_v7, %s6391_s26 }
 0x247   : > { %2407 = vrot.lane.b32.xlu0 %v2380_v10, %s6394_s30 }
 0x248   : > { %2068 = vrot.lane.b32.xlu1 %v2051_v12, %s6390_s25 }
 0x24b   : > { %2439 = vrot.lane.b32.xlu0 %v2380_v10, %s6395_s4 }
 0x24c   : > { %2100 = vrot.lane.b32.xlu1 %v2051_v12, %s6392_s27 }
 0x24e   : > { %v4630_v4 = vpop.permute.xlu1 %4629 }
 0x24f   : > { %4653 = vst.msk [vmem:[%s6851_s24 + $0x3] sm:$0x1] %vm1698_vm11, %v4630_v4  ;;  %2471 = vrot.lane.b32.xlu0 %v2380_v10, %s6397_s6  ;;  %v2384_v10 = vrot.slane %v2369_v20, %v6843_v9 }
 0x250   : > { %2132 = vrot.lane.b32.xlu1 %v2051_v12, %s6393_s29  ;;  %v7283_v12 = vrot.slane %v7262_v47, %v6830_v5 }
 0x251   : > { %v4632_v16 = vpop.permute.xlu0 %4631 }
 0x252   : > { %4654 = vst.msk [vmem:[%s6851_s24 + $0x23] sm:$0x1] %vm1698_vm11, %v4632_v16  ;;  %v2057_v41 = vpop.permute.xlu1 %2056 }
 0x253   : > { %2080 = vst.msk [vmem:[%s6851_s24 + $0x8] sm:$0x1] %vm1698_vm11, %v2057_v41  ;;  %1932 = vrot.lane.b32.xlu0 %v1885_v13, %s6391_s26  ;;  %v2392_v41 = vrot.slane %v7283_v12, %v6843_v9 }
 0x254   : > { %2754 = vrot.lane.b32.xlu1 %v2725_v43, %s6399_s8 }
 0x255   : > { %v7230_v25 = vpop.permute.xlu0 %1920 }
 0x256   : > { %v2089_v18 = vpop.permute.xlu1 %2088 }
 0x257   : > { %2112 = vst.msk [vmem:[%s6851_s24 + $0xa] sm:$0x1] %vm1698_vm11, %v2089_v18  ;;  %1948 = vrot.lane.b32.xlu0 %v1917_v3, %s6391_s26  ;;  %v7308_v3 = vrot.slane %v2688_v15, %v6830_v5 }
 0x258   : > { %2786 = vrot.lane.b32.xlu1 %v2725_v43, %s6400_s14  ;;  %v7253_v43 = vrot.slane %v2502_v23, %v6830_v5  ;;  %v7272_v23 = vrot.slane %v2503_v24, %v6830_v5 }
 0x259   : > { %v7238_v31 = vpop.permute.xlu0 %1936  ;;  %v2729_v0 = vrot.slane %v7308_v3, %v6843_v9 }
 0x25a   : > { %v2121_v46 = vpop.permute.xlu1 %2120  ;;  %v7276_v32 = vrot.slane %v7253_v43, %v6830_v5  ;;  %v7295_v16 = vrot.slane %v7272_v23, %v6830_v5 }
 0x25b   : > { %2144 = vst.msk [vmem:[%s6851_s24 + $0xc] sm:$0x1] %vm1698_vm11, %v2121_v46  ;;  %2070 = vrot.lane.b32.xlu0 %v2055_v36, %s6390_s25 }
 0x25c   : > { %2267 = vrot.lane.b32.xlu1 %v2206_v56, %s6398_s7  ;;  %v2559_v4 = vrot.slane %v7276_v32, %v6962_v57  ;;  %v2591_v22 = vrot.slane %v7295_v16, %v6962_v57  ;;  %v2673_v56 = vcombine.high %v6865_v21, %v6865_v21 }
 0x25d   : > { %v2059_v34 = vpop.permute.xlu0 %2058 }
 0x25e   : > { %2081 = vst.msk [vmem:[%s6851_s24 + $0x28] sm:$0x1] %vm1698_vm11, %v2059_v34  ;;  %v1744_v62 = vpop.permute.xlu1 %1743 }
 0x25f   : > { %1765 = vst.msk [vmem:[%s6851_s24 + $0x42] sm:$0x1] %vm1698_vm11, %v1744_v62  ;;  %2102 = vrot.lane.b32.xlu0 %v2055_v36, %s6392_s27 }
 0x260   : > { %2283 = vrot.lane.b32.xlu1 %v2238_v8, %s6398_s7  ;;  %v2718_v8 = vcombine.high %v7146_v42, %v7146_v42 }
 0x261   : > { %v2091_v6 = vpop.permute.xlu0 %2090 }
 0x262   : > { %2113 = vst.msk [vmem:[%s6851_s24 + $0x2a] sm:$0x1] %vm1698_vm11, %v2091_v6  ;;  %v1748_v7 = vpop.permute.xlu1 %1747  ;;  %v7335_v6 = vrot.slane %v2673_v56, %v6830_v5  ;;  %v2733_v42 = vrot.slane %v2718_v8, %v6843_v9 }
 0x263   : > { %1767 = vst.msk [vmem:[%s6851_s24 + $0x82] sm:$0x1] %vm1698_vm11, %v1748_v7  ;;  %2134 = vrot.lane.b32.xlu0 %v2055_v36, %s6393_s29 }
 0x264   : > { %2409 = vrot.lane.b32.xlu1 %v2384_v10, %s6394_s30 }
 0x265   : > { %v2123_v24 = vpop.permute.xlu0 %2122 }
 0x266   : > { %2145 = vst.msk [vmem:[%s6851_s24 + $0x2c] sm:$0x1] %vm1698_vm11, %v2123_v24  ;;  %v1776_v13 = vpop.permute.xlu1 %1775  ;;  %v7348_v24 = vrot.slane %v7335_v6, %v6830_v5 }
 0x267   : > { %1797 = vst.msk [vmem:[%s6851_s24 + $0x44] sm:$0x1] %vm1698_vm11, %v1776_v13  ;;  %2618 = vrot.lane.b32.xlu0 %v2559_v4, %s6401_s16  ;;  %v2169_v4 = vcombine.high %v7158_v44, %v7158_v44 }
 0x268   : > { %2413 = vrot.lane.b32.xlu1 %v2392_v41, %s6394_s30  ;;  %v2741_v44 = vrot.slane %v7348_v24, %v6843_v9 }
 0x269   : > { %v1746_v33 = vpop.permute.xlu0 %1745 }
 0x26a   : > { %1766 = vst.msk [vmem:[%s6851_s24 + $0x62] sm:$0x1] %vm1698_vm11, %v1746_v33  ;;  %v1780_v18 = vpop.permute.xlu1 %1779 }
 0x26b   : > { %1799 = vst.msk [vmem:[%s6851_s24 + $0x84] sm:$0x1] %vm1698_vm11, %v1780_v18  ;;  %2634 = vrot.lane.b32.xlu0 %v2591_v22, %s6401_s16  ;;  %v7367_v22 = vrot.slane %v2169_v4, %v6830_v5 }
 0x26c   : > { %2441 = vrot.lane.b32.xlu1 %v2384_v10, %s6395_s4 }
 0x26d   : > { %v1750_v36 = vpop.permute.xlu0 %1749 }
 0x26e   : > { %1768 = vst.msk [vmem:[%s6851_s24 + $0xa2] sm:$0x1] %vm1698_vm11, %v1750_v36  ;;  %v4634_v46 = vpop.permute.xlu1 %4633  ;;  %v2218_v36 = vrot.slane %v7367_v22, %v6962_v57 }
 0x26f   : > { %4655 = vst.msk [vmem:[%s6851_s24 + $0x43] sm:$0x1] %vm1698_vm11, %v4634_v46  ;;  %2756 = vrot.lane.b32.xlu0 %v2729_v0, %s6399_s8  ;;  %v2170_v46 = vcombine.high %v7170_v61, %v7170_v61  ;;  %v2587_v61 = vrot.slane %v7295_v16, %v6843_v9 }
 0x270   : > { %2445 = vrot.lane.b32.xlu1 %v2392_v41, %s6395_s4 }
 0x271   : > { %v1778_v34 = vpop.permute.xlu0 %1777 }
 0x272   : > { %1798 = vst.msk [vmem:[%s6851_s24 + $0x64] sm:$0x1] %vm1698_vm11, %v1778_v34  ;;  %v4638_v62 = vpop.permute.xlu1 %4637 }
 0x273   : > { %2788 = vrot.lane.b32.xlu0 %v2729_v0, %s6400_s14  ;;  %4657 = vst.msk [vmem:[%s6851_s24 + $0x83] sm:$0x1] %vm1698_vm11, %v4638_v62 }
 0x274   : > { %2473 = vrot.lane.b32.xlu1 %v2384_v10, %s6397_s6 }
 0x275   : > { %v1782_v20 = vpop.permute.xlu0 %1781 }
 0x276   : > { %1800 = vst.msk [vmem:[%s6851_s24 + $0xa4] sm:$0x1] %vm1698_vm11, %v1782_v20  ;;  %v1919_v7 = vpop.permute.xlu1 %1918 }
 0x277   : > { %2820 = vrot.lane.b32.xlu0 %v2729_v0, %s6396_s5  ;;  %v1951_v15 = vsel %vm1950_vm12, %v1919_v7, %v7230_v25  ;;  %v1881_v25 = vrot.slane %v7210_v54, %v6843_v9  ;;  %v1913_v54 = vrot.slane %v7220_v17, %v6843_v9  ;;  %v2199_v0 = vcombine.high %v7174_v19, %v7174_v19 }
 0x278   : > { %1967 = vst.msk [vmem:[%s6851_s24 + $0x6] sm:$0x1] %vm1698_vm11, %v1951_v15  ;;  %2477 = vrot.lane.b32.xlu1 %v2392_v41, %s6397_s6  ;;  %v2555_v17 = vrot.slane %v7276_v32, %v6843_v9  ;;  %v7393_v19 = vrot.slane %v2170_v46, %v6830_v5  ;;  %v2200_v15 = vcombine.high %v7184_v59, %v7184_v59 }
 0x279   : > { %v4636_v10 = vpop.permute.xlu0 %4635  ;;  %v2226_v62 = vrot.slane %v2199_v0, %v6962_v57 }
 0x27a   : > { %4656 = vst.msk [vmem:[%s6851_s24 + $0x63] sm:$0x1] %vm1698_vm11, %v4636_v10  ;;  %v1935_v13 = vpop.permute.xlu1 %1934  ;;  %v2250_v7 = vrot.slane %v7393_v19, %v6962_v57 }
 0x27b   : > { %2822 = vrot.lane.b32.xlu0 %v2733_v42, %s6396_s5  ;;  %v1955_v41 = vsel %vm1950_vm12, %v1935_v13, %v7238_v31  ;;  %v2258_v13 = vrot.slane %v2200_v15, %v6962_v57 }
 0x27c   : > { %1971 = vst.msk [vmem:[%s6851_s24 + $0x86] sm:$0x1] %vm1698_vm11, %v1955_v41  ;;  %1930 = vrot.lane.b32.xlu1 %v1881_v25, %s6391_s26  ;;  %v2371_v25 = vcombine.high %v7193_v60, %v7193_v60  ;;  %v2340_v41 = vcombine.high %v7262_v47, %v7262_v47 }
 0x27d   : > { %v7362_v33 = vpop.permute.xlu0 %1924 }
 0x27e   : > { %v2061_v18 = vpop.permute.xlu1 %2060  ;;  %v7424_v60 = vrot.slane %v2340_v41, %v6830_v5  ;;  %v2254_v41 = vrot.slane %v2200_v15, %v6843_v9  ;;  %v2519_v15 = vcombine.high %v7272_v23, %v7272_v23 }
 0x27f   : > { %2826 = vrot.lane.b32.xlu0 %v2741_v44, %s6396_s5  ;;  %2082 = vst.msk [vmem:[%s6851_s24 + $0x48] sm:$0x1] %vm1698_vm11, %v2061_v18 }
 0x280   : > { %1946 = vrot.lane.b32.xlu1 %v1913_v54, %s6391_s26  ;;  %v2388_v54 = vrot.slane %v2371_v25, %v6843_v9  ;;  %v2396_v46 = vrot.slane %v7424_v60, %v6843_v9  ;;  %v7494_v23 = vrot.slane %v2519_v15, %v6830_v5 }
 0x281   : > { %v7375_v31 = vpop.permute.xlu0 %1928 }
 0x282   : > { %v2065_v56 = vpop.permute.xlu1 %2064 }
 0x283   : > { %2273 = vrot.lane.b32.xlu0 %v2218_v36, %s6398_s7  ;;  %2084 = vst.msk [vmem:[%s6851_s24 + $0x88] sm:$0x1] %vm1698_vm11, %v2065_v56 }
 0x284   : > { %2616 = vrot.lane.b32.xlu1 %v2555_v17, %s6401_s16 }
 0x285   : > { %v7389_v34 = vpop.permute.xlu0 %1940 }
 0x286   : > { %v2093_v8 = vpop.permute.xlu1 %2092 }
 0x287   : > { %2277 = vrot.lane.b32.xlu0 %v2226_v62, %s6398_s7  ;;  %2114 = vst.msk [vmem:[%s6851_s24 + $0x4a] sm:$0x1] %vm1698_vm11, %v2093_v8  ;;  %v2214_v62 = vrot.slane %v7367_v22, %v6843_v9 }
 0x288   : > { %2632 = vrot.lane.b32.xlu1 %v2587_v61, %s6401_s16  ;;  %v2222_v61 = vrot.slane %v2199_v0, %v6843_v9 }
 0x289   : > { %v7401_v20 = vpop.permute.xlu0 %1944 }
 0x28a   : > { %v2097_v10 = vpop.permute.xlu1 %2096 }
 0x28b   : > { %2289 = vrot.lane.b32.xlu0 %v2250_v7, %s6398_s7  ;;  %2116 = vst.msk [vmem:[%s6851_s24 + $0x8a] sm:$0x1] %vm1698_vm11, %v2097_v10  ;;  %v2518_v10 = vcombine.high %v7253_v43, %v7253_v43 }
 0x28c   : > { %2758 = vrot.lane.b32.xlu1 %v2733_v42, %s6399_s8 }
 0x28d   : > { %v2063_v4 = vpop.permute.xlu0 %2062  ;;  %v7466_v25 = vrot.slane %v2518_v10, %v6830_v5  ;;  %v2720_v10 = vcombine.high %v7308_v3, %v7308_v3 }
 0x28e   : > { %2083 = vst.msk [vmem:[%s6851_s24 + $0x68] sm:$0x1] %vm1698_vm11, %v2063_v4  ;;  %v2125_v59 = vpop.permute.xlu1 %2124 }
 0x28f   : > { %2293 = vrot.lane.b32.xlu0 %v2258_v13, %s6398_s7  ;;  %2146 = vst.msk [vmem:[%s6851_s24 + $0x4c] sm:$0x1] %vm1698_vm11, %v2125_v59  ;;  %v2246_v13 = vrot.slane %v7393_v19, %v6843_v9  ;;  %v2370_v59 = vcombine.high %v7283_v12, %v7283_v12  ;;  %v2737_v3 = vrot.slane %v2720_v10, %v6843_v9 }
 0x290   : > { %2762 = vrot.lane.b32.xlu1 %v2741_v44, %s6399_s8  ;;  %v2202_v10 = vcombine.high %v7393_v19, %v7393_v19 }
 0x291   : > { %v2067_v18 = vpop.permute.xlu0 %2066 }
 0x292   : > { %2085 = vst.msk [vmem:[%s6851_s24 + $0xa8] sm:$0x1] %vm1698_vm11, %v2067_v18  ;;  %v2129_v47 = vpop.permute.xlu1 %2128 }
 0x293   : > { %2411 = vrot.lane.b32.xlu0 %v2388_v54, %s6394_s30  ;;  %2148 = vst.msk [vmem:[%s6851_s24 + $0x8c] sm:$0x1] %vm1698_vm11, %v2129_v47  ;;  %v2548_v47 = vcombine.high %v7276_v32, %v7276_v32 }
 0x294   : > { %2790 = vrot.lane.b32.xlu1 %v2733_v42, %s6400_s14 }
 0x295   : > { %v2095_v36 = vpop.permute.xlu0 %2094 }
 0x296   : > { %2115 = vst.msk [vmem:[%s6851_s24 + $0x6a] sm:$0x1] %vm1698_vm11, %v2095_v36  ;;  %v1752_v56 = vpop.permute.xlu1 %1751  ;;  %v2400_v36 = vrot.slane %v2370_v59, %v6843_v9 }
 0x297   : > { %1769 = vst.msk [vmem:[%s6851_s24 + $0xc2] sm:$0x1] %vm1698_vm11, %v1752_v56  ;;  %2415 = vrot.lane.b32.xlu0 %v2396_v46, %s6394_s30  ;;  %v2575_v56 = vrot.slane %v2548_v47, %v6962_v57 }
 0x298   : > { %2794 = vrot.lane.b32.xlu1 %v2741_v44, %s6400_s14 }
 0x299   : > { %v2099_v17 = vpop.permute.xlu0 %2098 }
 0x29a   : > { %2117 = vst.msk [vmem:[%s6851_s24 + $0xaa] sm:$0x1] %vm1698_vm11, %v2099_v17  ;;  %v1784_v42 = vpop.permute.xlu1 %1783 }
 0x29b   : > { %1801 = vst.msk [vmem:[%s6851_s24 + $0xc4] sm:$0x1] %vm1698_vm11, %v1784_v42  ;;  %2443 = vrot.lane.b32.xlu0 %v2388_v54, %s6395_s4 }
 0x29c   : > { %2271 = vrot.lane.b32.xlu1 %v2214_v62, %s6398_s7  ;;  %v2599_v62 = vrot.slane %v7494_v23, %v6962_v57 }
 0x29d   : > { %v2127_v8 = vpop.permute.xlu0 %2126 }
 0x29e   : > { %2147 = vst.msk [vmem:[%s6851_s24 + $0x6c] sm:$0x1] %vm1698_vm11, %v2127_v8  ;;  %v2406_v44 = vpop.permute.xlu1 %2405  ;;  %v2549_v8 = vcombine.high %v7295_v16, %v7295_v16  ;;  %v2689_v16 = vcombine.high %v7335_v6, %v7335_v6 }
 0x29f   : > { %2429 = vst.msk [vmem:[%s6851_s24 + $0x10] sm:$0x1] %vm1698_vm11, %v2406_v44  ;;  %2447 = vrot.lane.b32.xlu0 %v2396_v46, %s6395_s4 }
 0x2a0   : > { %2275 = vrot.lane.b32.xlu1 %v2222_v61, %s6398_s7  ;;  %v7531_v6 = vrot.slane %v2689_v16, %v6830_v5 }
 0x2a1   : > { %v2131_v7 = vpop.permute.xlu0 %2130 }
 0x2a2   : > { %2149 = vst.msk [vmem:[%s6851_s24 + $0xac] sm:$0x1] %vm1698_vm11, %v2131_v7  ;;  %v2438_v4 = vpop.permute.xlu1 %2437  ;;  %v2607_v7 = vrot.slane %v2549_v8, %v6962_v57  ;;  %v2745_v59 = vrot.slane %v7531_v6, %v6843_v9 }
 0x2a3   : > { %2461 = vst.msk [vmem:[%s6851_s24 + $0x12] sm:$0x1] %vm1698_vm11, %v2438_v4  ;;  %2475 = vrot.lane.b32.xlu0 %v2388_v54, %s6397_s6  ;;  %v2567_v54 = vrot.slane %v7466_v25, %v6962_v57 }
 0x2a4   : > { %2287 = vrot.lane.b32.xlu1 %v2246_v13, %s6398_s7 }
 0x2a5   : > { %v2819_v0 = vpop.permute.xlu0 %2818 }
 0x2a6   : > { %2842 = vst.msk [vmem:[%s6851_s24 + $0x1c] sm:$0x1] %vm1698_vm11, %v2819_v0  ;;  %v2470_v43 = vpop.permute.xlu1 %2469 }
 0x2a7   : > { %2493 = vst.msk [vmem:[%s6851_s24 + $0x14] sm:$0x1] %vm1698_vm11, %v2470_v43  ;;  %2479 = vrot.lane.b32.xlu0 %v2396_v46, %s6397_s6 }
 0x2a8   : > { %2291 = vrot.lane.b32.xlu1 %v2254_v41, %s6398_s7  ;;  %v2571_v41 = vrot.slane %v2548_v47, %v6843_v9 }
 0x2a9   : > { %v1754_v18 = vpop.permute.xlu0 %1753 }
 0x2aa   : > { %1770 = vst.msk [vmem:[%s6851_s24 + $0xe2] sm:$0x1] %vm1698_vm11, %v1754_v18  ;;  %v1923_v12 = vpop.permute.xlu1 %1922 }
 0x2ab   : > { %v1952_v46 = vsel %vm1950_vm12, %v1923_v12, %v7362_v33  ;;  %2622 = vrot.lane.b32.xlu0 %v2567_v54, %s6401_s16  ;;  %v2595_v54 = vrot.slane %v7494_v23, %v6843_v9  ;;  %v2603_v12 = vrot.slane %v2549_v8, %v6843_v9 }
 0x2ac   : > { %1968 = vst.msk [vmem:[%s6851_s24 + $0x26] sm:$0x1] %vm1698_vm11, %v1952_v46  ;;  %2417 = vrot.lane.b32.xlu1 %v2400_v36, %s6394_s30 }
 0x2ad   : > { %v1786_v32 = vpop.permute.xlu0 %1785 }
 0x2ae   : > { %1802 = vst.msk [vmem:[%s6851_s24 + $0xe4] sm:$0x1] %vm1698_vm11, %v1786_v32  ;;  %v1927_v17 = vpop.permute.xlu1 %1926 }
 0x2af   : > { %v1953_v42 = vsel %vm1950_vm12, %v1927_v17, %v7375_v31  ;;  %2626 = vrot.lane.b32.xlu0 %v2575_v56, %s6401_s16 }
 0x2b0   : > { %1969 = vst.msk [vmem:[%s6851_s24 + $0x46] sm:$0x1] %vm1698_vm11, %v1953_v42  ;;  %2449 = vrot.lane.b32.xlu1 %v2400_v36, %s6395_s4 }
 0x2b1   : > { %v2270_v33 = vpop.permute.xlu0 %2269 }
 0x2b2   : > { %v1939_v44 = vpop.permute.xlu1 %1938 }
 0x2b3   : > { %v1956_v61 = vsel %vm1950_vm12, %v1939_v44, %v7389_v34  ;;  %2638 = vrot.lane.b32.xlu0 %v2599_v62, %s6401_s16  ;;  %v2563_v34 = vrot.slane %v7466_v25, %v6843_v9  ;;  %v2201_v62 = vcombine.high %v7367_v22, %v7367_v22  ;;  %v2859_v22 = vrot.slane %v2851_v27, %v6830_v5 }
 0x2b4   : > { %1972 = vst.msk [vmem:[%s6851_s24 + $0xa6] sm:$0x1] %vm1698_vm11, %v1956_v61  ;;  %2481 = vrot.lane.b32.xlu1 %v2400_v36, %s6397_s6  ;;  %v2719_v36 = vcombine.high %v7348_v24, %v7348_v24  ;;  %v2372_v27 = vcombine.high %v7424_v60, %v7424_v60 }
 0x2b5   : > { %v7514_v31 = vpop.permute.xlu0 %2285  ;;  %v2230_v16 = vrot.slane %v2201_v62, %v6843_v9 }
 0x2b6   : > { %v1943_v4 = vpop.permute.xlu1 %1942  ;;  %v2749_v56 = vrot.slane %v2719_v36, %v6843_v9  ;;  %v2551_v36 = vcombine.high %v7494_v23, %v7494_v23 }
 0x2b7   : > { %v1957_v13 = vsel %vm1950_vm12, %v1943_v4, %v7401_v20  ;;  %2642 = vrot.lane.b32.xlu0 %v2607_v7, %s6401_s16  ;;  %v2234_v7 = vrot.slane %v2201_v62, %v6962_v57 }
 0x2b8   : > { %1973 = vst.msk [vmem:[%s6851_s24 + $0xc6] sm:$0x1] %vm1698_vm11, %v1957_v13  ;;  %2620 = vrot.lane.b32.xlu1 %v2563_v34, %s6401_s16  ;;  %v2266_v34 = vrot.slane %v2202_v10, %v6962_v57  ;;  %v2866_v13 = vrot.slane %v2852_v28, %v6830_v5 }
 0x2b9   : > { %v2408_v0 = vpop.permute.xlu0 %2407 }
 0x2ba   : > { %2430 = vst.msk [vmem:[%s6851_s24 + $0x30] sm:$0x1] %vm1698_vm11, %v2408_v0  ;;  %v2069_v43 = vpop.permute.xlu1 %2068  ;;  %v2882_v21 = vrot.slane %v2866_v13, %v6830_v5 }
 0x2bb   : > { %2086 = vst.msk [vmem:[%s6851_s24 + $0xc8] sm:$0x1] %vm1698_vm11, %v2069_v43  ;;  %2760 = vrot.lane.b32.xlu0 %v2737_v3, %s6399_s8  ;;  %v2404_v43 = vrot.slane %v2372_v27, %v6843_v9  ;;  %v2615_v27 = vrot.slane %v2551_v36, %v6962_v57 }
 0x2bc   : > { %2624 = vrot.lane.b32.xlu1 %v2571_v41, %s6401_s16  ;;  %v2940_v62 = vrot.slane %v2882_v21, %v6962_v57 }
 0x2bd   : > { %v2440_v20 = vpop.permute.xlu0 %2439 }
 0x2be   : > { %2462 = vst.msk [vmem:[%s6851_s24 + $0x32] sm:$0x1] %vm1698_vm11, %v2440_v20  ;;  %v2101_v18 = vpop.permute.xlu1 %2100 }
 0x2bf   : > { %2118 = vst.msk [vmem:[%s6851_s24 + $0xca] sm:$0x1] %vm1698_vm11, %v2101_v18  ;;  %2764 = vrot.lane.b32.xlu0 %v2745_v59, %s6399_s8  ;;  %v2550_v18 = vcombine.high %v7466_v25, %v7466_v25 }
 0x2c0   : > { %2636 = vrot.lane.b32.xlu1 %v2595_v54, %s6401_s16 }
 0x2c1   : > { %v2472_v47 = vpop.permute.xlu0 %2471 }
 0x2c2   : > { %2494 = vst.msk [vmem:[%s6851_s24 + $0x34] sm:$0x1] %vm1698_vm11, %v2472_v47  ;;  %v2133_v15 = vpop.permute.xlu1 %2132  ;;  %v2867_v47 = vcombine.high %v2859_v22, %v2859_v22 }
 0x2c3   : > { %2150 = vst.msk [vmem:[%s6851_s24 + $0xcc] sm:$0x1] %vm1698_vm11, %v2133_v15  ;;  %2792 = vrot.lane.b32.xlu0 %v2737_v3, %s6400_s14 }
 0x2c4   : > { %2640 = vrot.lane.b32.xlu1 %v2603_v12, %s6401_s16  ;;  %v2579_v12 = vrot.slane %v2550_v18, %v6843_v9 }
 0x2c5   : > { %v7559_v46 = vpop.permute.xlu0 %1932 }
 0x2c6   : > { %v2755_v32 = vpop.permute.xlu1 %2754 }
 0x2c7   : > { %2778 = vst.msk [vmem:[%s6851_s24 + $0x18] sm:$0x1] %vm1698_vm11, %v2755_v32  ;;  %2796 = vrot.lane.b32.xlu0 %v2745_v59, %s6400_s14 }
 0x2c8   : > { %2766 = vrot.lane.b32.xlu1 %v2749_v56, %s6399_s8 }
 0x2c9   : > { %v7566_v24 = vpop.permute.xlu0 %1948 }
 0x2ca   : > { %v2787_v17 = vpop.permute.xlu1 %2786 }
 0x2cb   : > { %2810 = vst.msk [vmem:[%s6851_s24 + $0x1a] sm:$0x1] %vm1698_vm11, %v2787_v17  ;;  %2824 = vrot.lane.b32.xlu0 %v2737_v3, %s6396_s5  ;;  %v2262_v3 = vrot.slane %v2202_v10, %v6843_v9 }
 0x2cc   : > { %2798 = vrot.lane.b32.xlu1 %v2749_v56, %s6400_s14 }
 0x2cd   : > { %v2071_v42 = vpop.permute.xlu0 %2070 }
 0x2ce   : > { %2087 = vst.msk [vmem:[%s6851_s24 + $0xe8] sm:$0x1] %vm1698_vm11, %v2071_v42  ;;  %v2268_v8 = vpop.permute.xlu1 %2267  ;;  %v2611_v42 = vrot.slane %v2551_v36, %v6843_v9 }
 0x2cf   : > { %v2300_v44 = vsel %vm2299_vm13, %v2268_v8, %v2270_v33  ;;  %2828 = vrot.lane.b32.xlu0 %v2745_v59, %s6396_s5  ;;  %v2936_v59 = vrot.slane %v2882_v21, %v6843_v9  ;;  %v2868_v8 = vcombine.high %v2866_v13, %v2866_v13  ;;  %v2721_v13 = vcombine.high %v7531_v6, %v7531_v6 }
 0x2d0   : > { %2316 = vst.msk [vmem:[%s6851_s24 + $0xe] sm:$0x1] %vm1698_vm11, %v2300_v44  ;;  %2830 = vrot.lane.b32.xlu1 %v2749_v56, %s6396_s5  ;;  %v7641_v56 = vrot.slane %v2867_v47, %v6830_v5 }
 0x2d1   : > { %v2103_v61 = vpop.permute.xlu0 %2102  ;;  %v2753_v6 = vrot.slane %v2721_v13, %v6843_v9 }
 0x2d2   : > { %2119 = vst.msk [vmem:[%s6851_s24 + $0xea] sm:$0x1] %vm1698_vm11, %v2103_v61  ;;  %v2284_v33 = vpop.permute.xlu1 %2283  ;;  %v2912_v61 = vrot.slane %v7641_v56, %v6843_v9 }
 0x2d3   : > { %v2304_v4 = vsel %vm2299_vm13, %v2284_v33, %v7514_v31  ;;  %2281 = vrot.lane.b32.xlu0 %v2234_v7, %s6398_s7  ;;  %v2875_v31 = vrot.slane %v2859_v22, %v6830_v5  ;;  %v2583_v22 = vrot.slane %v2550_v18, %v6962_v57  ;;  %v2896_v33 = vrot.slane %v2868_v8, %v6830_v5 }
 0x2d4   : > { %2320 = vst.msk [vmem:[%s6851_s24 + $0x8e] sm:$0x1] %vm1698_vm11, %v2304_v4  ;;  %2279 = vrot.lane.b32.xlu1 %v2230_v16, %s6398_s7 }
 0x2d5   : > { %v2135_v19 = vpop.permute.xlu0 %2134  ;;  %v2904_v28 = vrot.slane %v2875_v31, %v6843_v9  ;;  %v2908_v32 = vrot.slane %v2875_v31, %v6962_v57  ;;  %v2897_v7 = vcombine.high %v2875_v31, %v2875_v31 }
 0x2d6   : > { %2151 = vst.msk [vmem:[%s6851_s24 + $0xec] sm:$0x1] %vm1698_vm11, %v2135_v19  ;;  %v2410_v0 = vpop.permute.xlu1 %2409 }
 0x2d7   : > { %2431 = vst.msk [vmem:[%s6851_s24 + $0x50] sm:$0x1] %vm1698_vm11, %v2410_v0  ;;  %2297 = vrot.lane.b32.xlu0 %v2266_v34, %s6398_s7  ;;  %v2920_v4 = vrot.slane %v2897_v7, %v6843_v9  ;;  %v2944_v0 = vrot.slane %v2896_v33, %v6843_v9 }
 0x2d8   : > { %2295 = vrot.lane.b32.xlu1 %v2262_v3, %s6398_s7  ;;  %v2898_v3 = vcombine.high %v2882_v21, %v2882_v21  ;;  %v2899_v21 = vcombine.high %v7641_v56, %v7641_v56 }
 0x2d9   : > { %v7612_v60 = vpop.permute.xlu0 %2618 }
 0x2da   : > { %v2414_v26 = vpop.permute.xlu1 %2413  ;;  %v2928_v18 = vrot.slane %v2899_v21, %v6843_v9 }
 0x2db   : > { %2433 = vst.msk [vmem:[%s6851_s24 + $0x90] sm:$0x1] %vm1698_vm11, %v2414_v26  ;;  %2419 = vrot.lane.b32.xlu0 %v2404_v43, %s6394_s30 }
 0x2dc   : > { %2965 = vrot.lane.b32.xlu1 %v2904_v28, %s6402_s17  ;;  %v2952_v28 = vrot.slane %v2898_v3, %v6843_v9 }
 0x2dd   : > { %v7621_v41 = vpop.permute.xlu0 %2634 }
 0x2de   : > { %v2442_v20 = vpop.permute.xlu1 %2441 }
 0x2df   : > { %2463 = vst.msk [vmem:[%s6851_s24 + $0x52] sm:$0x1] %vm1698_vm11, %v2442_v20  ;;  %2451 = vrot.lane.b32.xlu0 %v2404_v43, %s6395_s4 }
 0x2e0   : > { %2981 = vrot.lane.b32.xlu1 %v2936_v59, %s6402_s17 }
 0x2e1   : > { %v2757_v54 = vpop.permute.xlu0 %2756 }
 0x2e2   : > { %2779 = vst.msk [vmem:[%s6851_s24 + $0x38] sm:$0x1] %vm1698_vm11, %v2757_v54  ;;  %v2446_v15 = vpop.permute.xlu1 %2445  ;;  %v2900_v54 = vcombine.high %v2896_v33, %v2896_v33 }
 0x2e3   : > { %2465 = vst.msk [vmem:[%s6851_s24 + $0x92] sm:$0x1] %vm1698_vm11, %v2446_v15  ;;  %2483 = vrot.lane.b32.xlu0 %v2404_v43, %s6397_s6 }
 0x2e4   : > { %2628 = vrot.lane.b32.xlu1 %v2579_v12, %s6401_s16  ;;  %v2960_v12 = vrot.slane %v2900_v54, %v6843_v9 }
 0x2e5   : > { %v2789_v25 = vpop.permute.xlu0 %2788 }
 0x2e6   : > { %2811 = vst.msk [vmem:[%s6851_s24 + $0x3a] sm:$0x1] %vm1698_vm11, %v2789_v25  ;;  %v2474_v17 = vpop.permute.xlu1 %2473 }
 0x2e7   : > { %2495 = vst.msk [vmem:[%s6851_s24 + $0x54] sm:$0x1] %vm1698_vm11, %v2474_v17  ;;  %2967 = vrot.lane.b32.xlu0 %v2908_v32, %s6402_s17  ;;  %v4624_v32 = vrot.slane %v7008_v11, %v6843_v9 }
 0x2e8   : > { %2644 = vrot.lane.b32.xlu1 %v2611_v42, %s6401_s16  ;;  %v2924_v42 = vrot.slane %v2897_v7, %v6962_v57 }
 0x2e9   : > { %v2821_v23 = vpop.permute.xlu0 %2820 }
 0x2ea   : > { %2843 = vst.msk [vmem:[%s6851_s24 + $0x3c] sm:$0x1] %vm1698_vm11, %v2821_v23  ;;  %v2478_v44 = vpop.permute.xlu1 %2477 }
 0x2eb   : > { %2497 = vst.msk [vmem:[%s6851_s24 + $0x94] sm:$0x1] %vm1698_vm11, %v2478_v44  ;;  %2983 = vrot.lane.b32.xlu0 %v2940_v62, %s6402_s17  ;;  %v2956_v44 = vrot.slane %v2898_v3, %v6962_v57 }
 0x2ec   : > { %2969 = vrot.lane.b32.xlu1 %v2912_v61, %s6402_s17 }
 0x2ed   : > { %v2823_v10 = vpop.permute.xlu0 %2822 }
 0x2ee   : > { %2844 = vst.msk [vmem:[%s6851_s24 + $0x5c] sm:$0x1] %vm1698_vm11, %v2823_v10  ;;  %v1931_v16 = vpop.permute.xlu1 %1930  ;;  %v2932_v10 = vrot.slane %v2899_v21, %v6962_v57 }
 0x2ef   : > { %v1954_v19 = vsel %vm1950_vm12, %v1931_v16, %v7559_v46  ;;  %2630 = vrot.lane.b32.xlu0 %v2583_v22, %s6401_s16 }
 0x2f0   : > { %1970 = vst.msk [vmem:[%s6851_s24 + $0x66] sm:$0x1] %vm1698_vm11, %v1954_v19  ;;  %2973 = vrot.lane.b32.xlu1 %v2920_v4, %s6402_s17  ;;  %v2964_v4 = vrot.slane %v2900_v54, %v6962_v57 }
 0x2f1   : > { %v2827_v34 = vpop.permute.xlu0 %2826 }
 0x2f2   : > { %2846 = vst.msk [vmem:[%s6851_s24 + $0x9c] sm:$0x1] %vm1698_vm11, %v2827_v34  ;;  %v1947_v31 = vpop.permute.xlu1 %1946 }
 0x2f3   : > { %v1958_v46 = vsel %vm1950_vm12, %v1947_v31, %v7566_v24  ;;  %2646 = vrot.lane.b32.xlu0 %v2615_v27, %s6401_s16 }
 0x2f4   : > { %1974 = vst.msk [vmem:[%s6851_s24 + $0xe6] sm:$0x1] %vm1698_vm11, %v1958_v46  ;;  %2985 = vrot.lane.b32.xlu1 %v2944_v0, %s6402_s17  ;;  %v4620_v0 = vrot.slane %v6958_v55, %v6843_v9 }
 0x2f5   : > { %v2274_v43 = vpop.permute.xlu0 %2273 }
 0x2f6   : > { %v2617_v26 = vpop.permute.xlu1 %2616 }
 0x2f7   : > { %v2649_v24 = vsel %vm2648_vm14, %v2617_v26, %v7612_v60  ;;  %2768 = vrot.lane.b32.xlu0 %v2753_v6, %s6399_s8  ;;  %v4628_v26 = vrot.slane %v7018_v14, %v6843_v9 }
 0x2f8   : > { %2665 = vst.msk [vmem:[%s6851_s24 + $0x16] sm:$0x1] %vm1698_vm11, %v2649_v24  ;;  %2989 = vrot.lane.b32.xlu1 %v2952_v28, %s6402_s17  ;;  %v4709_v28 = vrot.slane %v4695_v40, %v6830_v5 }
 0x2f9   : > { %v2278_v20 = vpop.permute.xlu0 %2277 }
 0x2fa   : > { %v2633_v59 = vpop.permute.xlu1 %2632  ;;  %v7799_v40 = vrot.slane %v4709_v28, %v6830_v5 }
 0x2fb   : > { %v2653_v47 = vsel %vm2648_vm14, %v2633_v59, %v7621_v41  ;;  %2800 = vrot.lane.b32.xlu0 %v2753_v6, %s6400_s14  ;;  %v2916_v41 = vrot.slane %v7641_v56, %v6962_v57  ;;  %v2948_v56 = vrot.slane %v2896_v33, %v6962_v57 }
 0x2fc   : > { %2669 = vst.msk [vmem:[%s6851_s24 + $0x96] sm:$0x1] %vm1698_vm11, %v2653_v47  ;;  %2977 = vrot.lane.b32.xlu1 %v2928_v18, %s6402_s17  ;;  %v4711_v18 = vcombine.high %v4709_v28, %v4709_v28 }
 0x2fd   : > { %v2290_v60 = vpop.permute.xlu0 %2289 }
 0x2fe   : > { %v2759_v15 = vpop.permute.xlu1 %2758 }
 0x2ff   : > { %2780 = vst.msk [vmem:[%s6851_s24 + $0x58] sm:$0x1] %vm1698_vm11, %v2759_v15  ;;  %2832 = vrot.lane.b32.xlu0 %v2753_v6, %s6396_s5  ;;  %v7809_v15 = vrot.slane %v4711_v18, %v6830_v5 }
 0x300   : > { %2993 = vrot.lane.b32.xlu1 %v2960_v12, %s6402_s17 }
 0x301   : > { %v2294_v36 = vpop.permute.xlu0 %2293 }
 0x302   : > { %v2763_v25 = vpop.permute.xlu1 %2762 }
 0x303   : > { %2782 = vst.msk [vmem:[%s6851_s24 + $0x98] sm:$0x1] %vm1698_vm11, %v2763_v25  ;;  %2971 = vrot.lane.b32.xlu0 %v2916_v41, %s6402_s17  ;;  %v7820_v41 = vcombine.high %v7799_v40, %v7799_v40 }
 0x304   : > { %4641 = vrot.lane.b32.xlu1 %v4624_v32, %s6382_s28 }
 0x305   : > { %v2412_v17 = vpop.permute.xlu0 %2411 }
 0x306   : > { %2432 = vst.msk [vmem:[%s6851_s24 + $0x70] sm:$0x1] %vm1698_vm11, %v2412_v17  ;;  %v2791_v23 = vpop.permute.xlu1 %2790  ;;  %v4795_v17 = vrot.slane %v7820_v41, %v6843_v9 }
 0x307   : > { %2812 = vst.msk [vmem:[%s6851_s24 + $0x5a] sm:$0x1] %vm1698_vm11, %v2791_v23  ;;  %2975 = vrot.lane.b32.xlu0 %v2924_v42, %s6402_s17  ;;  %v7833_v42 = vcombine.high %v7809_v15, %v7809_v15  ;;  %v7837_v23 = vrot.slane %v6924_v38, %v6830_v5 }
 0x308   : > { %4661 = vrot.lane.b32.xlu1 %v6952_v53, %s6385_s3  ;;  %v4702_v53 = vrot.slane %v4694_v39, %v6830_v5 }
 0x309   : > { %v2416_v11 = vpop.permute.xlu0 %2415 }
 0x30a   : > { %2434 = vst.msk [vmem:[%s6851_s24 + $0xb0] sm:$0x1] %vm1698_vm11, %v2416_v11  ;;  %v2795_v62 = vpop.permute.xlu1 %2794  ;;  %v7745_v22 = vrot.slane %v4702_v53, %v6830_v5  ;;  %v4710_v33 = vcombine.high %v4702_v53, %v4702_v53  ;;  %v4803_v53 = vrot.slane %v7833_v42, %v6843_v9 }
 0x30b   : > { %2814 = vst.msk [vmem:[%s6851_s24 + $0x9a] sm:$0x1] %vm1698_vm11, %v2795_v62  ;;  %2987 = vrot.lane.b32.xlu0 %v2948_v56, %s6402_s17 }
 0x30c   : > { %4665 = vrot.lane.b32.xlu1 %v7042_v29, %s6385_s3  ;;  %v4747_v34 = vrot.slane %v7745_v22, %v6843_v9  ;;  %v7758_v27 = vrot.slane %v4710_v33, %v6830_v5  ;;  %v4751_v62 = vrot.slane %v7745_v22, %v6962_v57 }
 0x30d   : > { %v2444_v8 = vpop.permute.xlu0 %2443 }
 0x30e   : > { %2464 = vst.msk [vmem:[%s6851_s24 + $0x72] sm:$0x1] %vm1698_vm11, %v2444_v8  ;;  %v2272_v61 = vpop.permute.xlu1 %2271  ;;  %v4755_v46 = vrot.slane %v7758_v27, %v6843_v9  ;;  %v4864_v8 = vcombine.high %v6924_v38, %v6924_v38 }
 0x30f   : > { %v2301_v7 = vsel %vm2299_vm13, %v2272_v61, %v2274_v43  ;;  %2991 = vrot.lane.b32.xlu0 %v2956_v44, %s6402_s17  ;;  %v7773_v43 = vcombine.high %v7745_v22, %v7745_v22  ;;  %v4887_v61 = vrot.slane %v7837_v23, %v6830_v5 }
 0x310   : > { %2317 = vst.msk [vmem:[%s6851_s24 + $0x2e] sm:$0x1] %vm1698_vm11, %v2301_v7  ;;  %4669 = vrot.lane.b32.xlu1 %v7048_v30, %s6385_s3 }
 0x311   : > { %v2448_v29 = vpop.permute.xlu0 %2447  ;;  %v4763_v24 = vrot.slane %v7773_v43, %v6843_v9  ;;  %v7864_v22 = vrot.slane %v4887_v61, %v6843_v9  ;;  %v4909_v33 = vcombine.high %v4887_v61, %v4887_v61 }
 0x312   : > { %2466 = vst.msk [vmem:[%s6851_s24 + $0xb2] sm:$0x1] %vm1698_vm11, %v2448_v29  ;;  %v2276_v39 = vpop.permute.xlu1 %2275 }
 0x313   : > { %v2302_v16 = vsel %vm2299_vm13, %v2276_v39, %v2278_v20  ;;  %2979 = vrot.lane.b32.xlu0 %v2932_v10, %s6402_s17  ;;  %v7790_v20 = vcombine.high %v7758_v27, %v7758_v27  ;;  %v4759_v10 = vrot.slane %v7758_v27, %v6962_v57  ;;  %v7880_v27 = vrot.slane %v4909_v33, %v6843_v9 }
 0x314   : > { %2318 = vst.msk [vmem:[%s6851_s24 + $0x4e] sm:$0x1] %vm1698_vm11, %v2302_v16  ;;  %4673 = vrot.lane.b32.xlu1 %v4624_v32, %s6385_s3  ;;  %v7867_v16 = vrot.slane %v4864_v8, %v6830_v5 }
 0x315   : > { %v2476_v30 = vpop.permute.xlu0 %2475  ;;  %v4771_v35 = vrot.slane %v7790_v20, %v6843_v9 }
 0x316   : > { %2496 = vst.msk [vmem:[%s6851_s24 + $0x74] sm:$0x1] %vm1698_vm11, %v2476_v30  ;;  %v2288_v19 = vpop.permute.xlu1 %2287 }
 0x317   : > { %v2305_v13 = vsel %vm2299_vm13, %v2288_v19, %v2290_v60  ;;  %2995 = vrot.lane.b32.xlu0 %v2964_v4, %s6402_s17  ;;  %v4779_v60 = vrot.slane %v7799_v40, %v6843_v9  ;;  %v4767_v19 = vrot.slane %v7773_v43, %v6962_v57 }
 0x318   : > { %2321 = vst.msk [vmem:[%s6851_s24 + $0xae] sm:$0x1] %vm1698_vm11, %v2305_v13  ;;  %4808 = vrot.lane.b32.xlu1 %v4747_v34, %s6391_s26  ;;  %v4894_v13 = vrot.slane %v7867_v16, %v6830_v5 }
 0x319   : > { %v2480_v31 = vpop.permute.xlu0 %2479 }
 0x31a   : > { %2498 = vst.msk [vmem:[%s6851_s24 + $0xb4] sm:$0x1] %vm1698_vm11, %v2480_v31  ;;  %v2292_v3 = vpop.permute.xlu1 %2291  ;;  %v4910_v43 = vcombine.high %v4894_v13, %v4894_v13 }
 0x31b   : > { %v2306_v6 = vsel %vm2299_vm13, %v2292_v3, %v2294_v36  ;;  %4639 = vrot.lane.b32.xlu0 %v4620_v0, %s6382_s28  ;;  %v4787_v36 = vrot.slane %v7809_v15, %v6843_v9 }
 0x31c   : > { %2322 = vst.msk [vmem:[%s6851_s24 + $0xce] sm:$0x1] %vm1698_vm11, %v2306_v6  ;;  %4812 = vrot.lane.b32.xlu1 %v4755_v46, %s6391_s26  ;;  %v7894_v46 = vrot.slane %v4894_v13, %v6843_v9  ;;  %v7906_v28 = vrot.slane %v4910_v43, %v6843_v9  ;;  %v5057_v43 = vrot.slane %v5043_v49, %v6830_v5 }
 0x31d   : > { %v2623_v55 = vpop.permute.xlu0 %2622 }
 0x31e   : > { %v2418_v21 = vpop.permute.xlu1 %2417 }
 0x31f   : > { %2435 = vst.msk [vmem:[%s6851_s24 + $0xd0] sm:$0x1] %vm1698_vm11, %v2418_v21  ;;  %4643 = vrot.lane.b32.xlu0 %v4628_v26, %s6382_s28  ;;  %s6102_s28 = sshll.u32 %s6442_s13, 12 }
 0x320   : > { %4816 = vrot.lane.b32.xlu1 %v4763_v24, %s6391_s26  ;;  %v4791_v24 = vrot.slane %v7809_v15, %v6962_v57 }
 0x321   : > { %v2627_v14 = vpop.permute.xlu0 %2626 }
 0x322   : > { %v2450_v59 = vpop.permute.xlu1 %2449 }
 0x323   : > { %2467 = vst.msk [vmem:[%s6851_s24 + $0xd2] sm:$0x1] %vm1698_vm11, %v2450_v59  ;;  %4663 = vrot.lane.b32.xlu0 %v6987_v2, %s6385_s3 }
 0x324   : > { %4820 = vrot.lane.b32.xlu1 %v4771_v35, %s6391_s26  ;;  %v4799_v35 = vrot.slane %v7820_v41, %v6962_v57 }
 0x325   : > { %v2639_v54 = vpop.permute.xlu0 %2638 }
 0x326   : > { %v2482_v47 = vpop.permute.xlu1 %2481 }
 0x327   : > { %2499 = vst.msk [vmem:[%s6851_s24 + $0xd4] sm:$0x1] %vm1698_vm11, %v2482_v47  ;;  %4667 = vrot.lane.b32.xlu0 %v7062_v37, %s6385_s3 }
 0x328   : > { %4824 = vrot.lane.b32.xlu1 %v4779_v60, %s6391_s26  ;;  %v4807_v60 = vrot.slane %v7833_v42, %v6962_v57 }
 0x329   : > { %v2643_v12 = vpop.permute.xlu0 %2642 }
 0x32a   : > { %v2621_v2 = vpop.permute.xlu1 %2620 }
 0x32b   : > { %v2650_v25 = vsel %vm2648_vm14, %v2621_v2, %v2623_v55  ;;  %4671 = vrot.lane.b32.xlu0 %v4620_v0, %s6385_s3  ;;  %v4775_v0 = vrot.slane %v7790_v20, %v6962_v57  ;;  %v4783_v55 = vrot.slane %v7799_v40, %v6962_v57  ;;  %v4879_v40 = vcombine.high %v7837_v23, %v7837_v23 }
 0x32c   : > { %2666 = vst.msk [vmem:[%s6851_s24 + $0x36] sm:$0x1] %vm1698_vm11, %v2650_v25  ;;  %4828 = vrot.lane.b32.xlu1 %v4787_v36, %s6391_s26  ;;  %v4880_v25 = vcombine.high %v7867_v16, %v7867_v16 }
 0x32d   : > { %v2761_v37 = vpop.permute.xlu0 %2760  ;;  %v4901_v15 = vrot.slane %v4879_v40, %v6830_v5 }
 0x32e   : > { %2781 = vst.msk [vmem:[%s6851_s24 + $0x78] sm:$0x1] %vm1698_vm11, %v2761_v37  ;;  %v2625_v32 = vpop.permute.xlu1 %2624  ;;  %v4908_v42 = vrot.slane %v4880_v25, %v6830_v5 }
 0x32f   : > { %v2651_v11 = vsel %vm2648_vm14, %v2625_v32, %v2627_v14  ;;  %4675 = vrot.lane.b32.xlu0 %v4628_v26, %s6385_s3  ;;  %v7940_v36 = vrot.slane %v4901_v15, %v6843_v9  ;;  %v4911_v41 = vcombine.high %v4901_v15, %v4901_v15  ;;  %s5922_s3 = sshll.u32 %s6851_s24, 4  ;;  %s8748_s3 = int_to_ptr.vmem [resolvable:$true] %s5922_s3 }
 0x330   : > { %2667 = vst.msk [vmem:[%s6851_s24 + $0x56] sm:$0x1] %vm1698_vm11, %v2651_v11  ;;  %4832 = vrot.lane.b32.xlu1 %v4795_v17, %s6391_s26  ;;  %s6315_s13 = scalar_lea.vmem %s8748_s3, 4096 }
 0x331   : > { %v2765_v56 = vpop.permute.xlu0 %2764  ;;  %v7951_v17 = vrot.slane %v4911_v41, %v6843_v9  ;;  %p6316_p11 = scmp.ne.s32.totalorder %s8748_s3, %s6315_s13 }
 0x332   : > { %2783 = vst.msk [vmem:[%s6851_s24 + $0xb8] sm:$0x1] %vm1698_vm11, %v2765_v56  ;;  %v2637_v44 = vpop.permute.xlu1 %2636  ;;  %v7961_v56 = vrot.slane %v4908_v42, %v6843_v9 }
 0x333   : > { %v2654_v7 = vsel %vm2648_vm14, %v2637_v44, %v2639_v54  ;;  %4810 = vrot.lane.b32.xlu0 %v4751_v62, %s6391_s26  ;;  %v4912_v62 = vcombine.high %v4908_v42, %v4908_v42  ;;  %v5212_v42 = vcombine.high %v6934_v45, %v6934_v45  ;;  %p6317_p12 = pnand %p6316_p11, %p6459_p5 }
 0x334   : > { %2670 = vst.msk [vmem:[%s6851_s24 + $0xb6] sm:$0x1] %vm1698_vm11, %v2654_v7  ;;  %4836 = vrot.lane.b32.xlu1 %v4803_v53, %s6391_s26  ;;  %v5050_v7 = vrot.slane %v5042_v48, %v6830_v5 }
 0x335   : > { %v2793_v29 = vpop.permute.xlu0 %2792  ;;  %v7971_v61 = vrot.slane %v4912_v62, %v6843_v9  ;;  %p6318_p13 = pneg %p6317_p12 }
 0x336   : > { %2813 = vst.msk [vmem:[%s6851_s24 + $0x7a] sm:$0x1] %vm1698_vm11, %v2793_v29  ;;  %v2641_v39 = vpop.permute.xlu1 %2640  ;;  %v7986_v16 = vrot.slane %v5050_v7, %v6830_v5  ;;  %v5058_v48 = vcombine.high %v5050_v7, %v5050_v7 }
 0x337   : > { %v2655_v30 = vsel %vm2648_vm14, %v2641_v39, %v2643_v12  ;;  %4814 = vrot.lane.b32.xlu0 %v4759_v10, %s6391_s26 }
 0x338   : > { %2671 = vst.msk [vmem:[%s6851_s24 + $0xd6] sm:$0x1] %vm1698_vm11, %v2655_v30  ;;  %4945 = vrot.lane.b32.xlu1 %v7864_v22, %s6390_s25 }
 0x339   : > { %v2797_v4 = vpop.permute.xlu0 %2796 }
 0x33a   : > { %2815 = vst.msk [vmem:[%s6851_s24 + $0xba] sm:$0x1] %vm1698_vm11, %v2797_v4  ;;  %v2767_v34 = vpop.permute.xlu1 %2766 }
 0x33b   : > { %2784 = vst.msk [vmem:[%s6851_s24 + $0xd8] sm:$0x1] %vm1698_vm11, %v2767_v34  ;;  %4818 = vrot.lane.b32.xlu0 %v4767_v19, %s6391_s26  ;;  %v5095_v34 = vrot.slane %v7986_v16, %v6843_v9 }
 0x33c   : > { %4949 = vrot.lane.b32.xlu1 %v7880_v27, %s6390_s25 }
 0x33d   : > { %v2825_v31 = vpop.permute.xlu0 %2824 }
 0x33e   : > { %2845 = vst.msk [vmem:[%s6851_s24 + $0x7c] sm:$0x1] %vm1698_vm11, %v2825_v31  ;;  %v2799_v3 = vpop.permute.xlu1 %2798 }
 0x33f   : > { %2816 = vst.msk [vmem:[%s6851_s24 + $0xda] sm:$0x1] %vm1698_vm11, %v2799_v3  ;;  %4822 = vrot.lane.b32.xlu0 %v4775_v0, %s6391_s26  ;;  %v8011_v3 = vcombine.high %v7986_v16, %v7986_v16 }
 0x340   : > { %4953 = vrot.lane.b32.xlu1 %v7894_v46, %s6390_s25 }
 0x341   : > { %v2829_v6 = vpop.permute.xlu0 %2828 }
 0x342   : > { %2847 = vst.msk [vmem:[%s6851_s24 + $0xbc] sm:$0x1] %vm1698_vm11, %v2829_v6  ;;  %v2831_v26 = vpop.permute.xlu1 %2830 }
 0x343   : > { %2848 = vst.msk [vmem:[%s6851_s24 + $0xdc] sm:$0x1] %vm1698_vm11, %v2831_v26  ;;  %4826 = vrot.lane.b32.xlu0 %v4783_v55, %s6391_s26  ;;  %v5111_v55 = vrot.slane %v8011_v3, %v6843_v9 }
 0x344   : > { %4957 = vrot.lane.b32.xlu1 %v7906_v28, %s6390_s25 }
 0x345   : > { %v2282_v21 = vpop.permute.xlu0 %2281 }
 0x346   : > { %v2280_v20 = vpop.permute.xlu1 %2279 }
 0x347   : > { %v2303_v14 = vsel %vm2299_vm13, %v2280_v20, %v2282_v21  ;;  %4830 = vrot.lane.b32.xlu0 %v4791_v24, %s6391_s26  ;;  %v8036_v21 = vrot.slane %v5057_v43, %v6830_v5  ;;  %v5059_v24 = vcombine.high %v5057_v43, %v5057_v43 }
 0x348   : > { %2319 = vst.msk [vmem:[%s6851_s24 + $0x6e] sm:$0x1] %vm1698_vm11, %v2303_v14  ;;  %4977 = vrot.lane.b32.xlu1 %v7864_v22, %s6392_s27 }
 0x349   : > { %v2298_v59 = vpop.permute.xlu0 %2297  ;;  %v8045_v40 = vrot.slane %v5059_v24, %v6830_v5  ;;  %v8059_v15 = vcombine.high %v8036_v21, %v8036_v21 }
 0x34a   : > { %v2296_v18 = vpop.permute.xlu1 %2295 }
 0x34b   : > { %v2307_v54 = vsel %vm2299_vm13, %v2296_v18, %v2298_v59  ;;  %4834 = vrot.lane.b32.xlu0 %v4799_v35, %s6391_s26  ;;  %v5127_v35 = vrot.slane %v8036_v21, %v6843_v9  ;;  %v5143_v41 = vrot.slane %v8059_v15, %v6843_v9  ;;  %v8073_v25 = vcombine.high %v8045_v40, %v8045_v40 }
 0x34c   : > { %2323 = vst.msk [vmem:[%s6851_s24 + $0xee] sm:$0x1] %vm1698_vm11, %v2307_v54  ;;  %4981 = vrot.lane.b32.xlu1 %v7880_v27, %s6392_s27 }
 0x34d   : > { %v2420_v47 = vpop.permute.xlu0 %2419  ;;  %v5155_v24 = vrot.slane %v8073_v25, %v6962_v57 }
 0x34e   : > { %2436 = vst.msk [vmem:[%s6851_s24 + $0xf0] sm:$0x1] %vm1698_vm11, %v2420_v47  ;;  %v2966_v12 = vpop.permute.xlu1 %2965 }
 0x34f   : > { %4838 = vrot.lane.b32.xlu0 %v4807_v60, %s6391_s26  ;;  %v5135_v60 = vrot.slane %v8045_v40, %v6843_v9  ;;  %s8754_s26 = scalar_lea.sflag [#allocation3], %s134_s22 }
 0x350   : > { %4985 = vrot.lane.b32.xlu1 %v7894_v46, %s6392_s27 }
 0x351   : > { %v2452_v2 = vpop.permute.xlu0 %2451 }
 0x352   : > { %2468 = vst.msk [vmem:[%s6851_s24 + $0xf2] sm:$0x1] %vm1698_vm11, %v2452_v2  ;;  %v2982_v37 = vpop.permute.xlu1 %2981 }
 0x353   : > { %4947 = vrot.lane.b32.xlu0 %v7940_v36, %s6390_s25 }
 0x354   : > { %4989 = vrot.lane.b32.xlu1 %v7906_v28, %s6392_s27 }
 0x355   : > { %v2484_v32 = vpop.permute.xlu0 %2483 }
 0x356   : > { %2500 = vst.msk [vmem:[%s6851_s24 + $0xf4] sm:$0x1] %vm1698_vm11, %v2484_v32  ;;  %v2629_v23 = vpop.permute.xlu1 %2628 }
 0x357   : > { %4951 = vrot.lane.b32.xlu0 %v7951_v17, %s6390_s25 }
 0x358   : > { %5009 = vrot.lane.b32.xlu1 %v7864_v22, %s6393_s29 }
 0x359   : > { %v2968_v11 = vpop.permute.xlu0 %2967 }
 0x35a   : > { %v2998_v8 = vsel %vm2997_vm15, %v2966_v12, %v2968_v11  ;;  %v2645_v44 = vpop.permute.xlu1 %2644 }
 0x35b   : > { %3014 = vst.msk [vmem:[%s6851_s24 + $0x1e] sm:$0x1] %vm1698_vm11, %v2998_v8  ;;  %4955 = vrot.lane.b32.xlu0 %v7961_v56, %s6390_s25 }
 0x35c   : > { %5013 = vrot.lane.b32.xlu1 %v7880_v27, %s6393_s29  ;;  %v7998_v27 = vrot.slane %v5058_v48, %v6830_v5 }
 0x35d   : > { %v2984_v53 = vpop.permute.xlu0 %2983 }
 0x35e   : > { %v3002_v29 = vsel %vm2997_vm15, %v2982_v37, %v2984_v53  ;;  %v2970_v10 = vpop.permute.xlu1 %2969  ;;  %v5103_v0 = vrot.slane %v7998_v27, %v6843_v9  ;;  %v8026_v26 = vcombine.high %v7998_v27, %v7998_v27  ;;  %v8077_v37 = vrot.slane %v6934_v45, %v6830_v5 }
 0x35f   : > { %3018 = vst.msk [vmem:[%s6851_s24 + $0x9e] sm:$0x1] %vm1698_vm11, %v3002_v29  ;;  %4959 = vrot.lane.b32.xlu0 %v7971_v61, %s6390_s25  ;;  %s8746_s25 = scalar_lea.hbm %s8797_s2, %s6102_s28 }
 0x360   : > { %5017 = vrot.lane.b32.xlu1 %v7894_v46, %s6393_s29  ;;  %v5119_v49 = vrot.slane %v8026_v26, %v6843_v9  ;;  %v5235_v62 = vrot.slane %v8077_v37, %v6830_v5 }
 0x361   : > { %v2631_v39 = vpop.permute.xlu0 %2630 }
 0x362   : > { %v2652_v22 = vsel %vm2648_vm14, %v2629_v23, %v2631_v39  ;;  %v2974_v33 = vpop.permute.xlu1 %2973  ;;  %v8105_v7 = vrot.slane %v5235_v62, %v6843_v9  ;;  %v5257_v29 = vcombine.high %v5235_v62, %v5235_v62 }
 0x363   : > { %2668 = vst.msk [vmem:[%s6851_s24 + $0x76] sm:$0x1] %vm1698_vm11, %v2652_v22  ;;  %4979 = vrot.lane.b32.xlu0 %v7940_v36, %s6392_s27  ;;  %v5115_v22 = vrot.slane %v8011_v3, %v6962_v57 }
 0x364   : > { %5021 = vrot.lane.b32.xlu1 %v7906_v28, %s6393_s29  ;;  %v8119_v48 = vrot.slane %v5257_v29, %v6843_v9 }
 0x365   : > { %v2647_v30 = vpop.permute.xlu0 %2646 }
 0x366   : > { %v2656_v4 = vsel %vm2648_vm14, %v2645_v44, %v2647_v30  ;;  %v2986_v19 = vpop.permute.xlu1 %2985  ;;  %v5107_v44 = vrot.slane %v7998_v27, %v6962_v57 }
 0x367   : > { %2672 = vst.msk [vmem:[%s6851_s24 + $0xf6] sm:$0x1] %vm1698_vm11, %v2656_v4  ;;  %4983 = vrot.lane.b32.xlu0 %v7951_v17, %s6392_s27 }
 0x368   : > { %5156 = vrot.lane.b32.xlu1 %v5095_v34, %s6398_s7 }
 0x369   : > { %v2769_v13 = vpop.permute.xlu0 %2768 }
 0x36a   : > { %2785 = vst.msk [vmem:[%s6851_s24 + $0xf8] sm:$0x1] %vm1698_vm11, %v2769_v13  ;;  %v2990_v31 = vpop.permute.xlu1 %2989 }
 0x36b   : > { %4987 = vrot.lane.b32.xlu0 %v7961_v56, %s6392_s27 }
 0x36c   : > { %5160 = vrot.lane.b32.xlu1 %v5103_v0, %s6398_s7  ;;  %v5131_v0 = vrot.slane %v8036_v21, %v6962_v57 }
 0x36d   : > { %v2801_v46 = vpop.permute.xlu0 %2800 }
 0x36e   : > { %2817 = vst.msk [vmem:[%s6851_s24 + $0xfa] sm:$0x1] %vm1698_vm11, %v2801_v46  ;;  %v2978_v6 = vpop.permute.xlu1 %2977 }
 0x36f   : > { %4991 = vrot.lane.b32.xlu0 %v7971_v61, %s6392_s27  ;;  %s6403_s27 = smov [#allocation2]  }
 0x370   : > { %5164 = vrot.lane.b32.xlu1 %v5111_v55, %s6398_s7 }
 0x371   : > { %v2833_v28 = vpop.permute.xlu0 %2832 }
 0x372   : > { %2849 = vst.msk [vmem:[%s6851_s24 + $0xfc] sm:$0x1] %vm1698_vm11, %v2833_v28  ;;  %v2994_v38 = vpop.permute.xlu1 %2993  ;;  %v5147_v28 = vrot.slane %v8059_v15, %v6962_v57 }
 0x373   : > { %5011 = vrot.lane.b32.xlu0 %v7940_v36, %s6393_s29 }
 0x374   : > { %5168 = vrot.lane.b32.xlu1 %v5119_v49, %s6398_s7 }
 0x375   : > { %v2972_v20 = vpop.permute.xlu0 %2971 }
 0x376   : > { %v2999_v14 = vsel %vm2997_vm15, %v2970_v10, %v2972_v20  ;;  %v4642_v59 = vpop.permute.xlu1 %4641  ;;  %v5226_v10 = vrot.slane %v5212_v42, %v6830_v5 }
 0x377   : > { %3015 = vst.msk [vmem:[%s6851_s24 + $0x3e] sm:$0x1] %vm1698_vm11, %v2999_v14  ;;  %4659 = vst.msk [vmem:[%s6851_s24 + $0xc3] sm:$0x1] %vm1698_vm11, %v4642_v59  ;;  %5015 = vrot.lane.b32.xlu0 %v7951_v17, %s6393_s29  ;;  %v5099_v17 = vrot.slane %v7986_v16, %v6962_v57 }
 0x378   : > { %5172 = vrot.lane.b32.xlu1 %v5127_v35, %s6398_s7  ;;  %v5242_v30 = vrot.slane %v5226_v10, %v6830_v5 }
 0x379   : > { %v2976_v18 = vpop.permute.xlu0 %2975 }
 0x37a   : > { %v3000_v54 = vsel %vm2997_vm15, %v2974_v33, %v2976_v18  ;;  %v4662_v47 = vpop.permute.xlu1 %4661  ;;  %v8132_v27 = vrot.slane %v5242_v30, %v6843_v9  ;;  %v5258_v13 = vcombine.high %v5242_v30, %v5242_v30  ;;  %v5228_v18 = vcombine.high %v5226_v10, %v5226_v10 }
 0x37b   : > { %3016 = vst.msk [vmem:[%s6851_s24 + $0x5e] sm:$0x1] %vm1698_vm11, %v3000_v54  ;;  %4685 = vst.msk [vmem:[%s6851_s24 + $0x5] sm:$0x1] %vm1698_vm11, %v4662_v47  ;;  %5019 = vrot.lane.b32.xlu0 %v7961_v56, %s6393_s29  ;;  %v5151_v56 = vrot.slane %v8073_v25, %v6843_v9 }
 0x37c   : > { %5176 = vrot.lane.b32.xlu1 %v5135_v60, %s6398_s7  ;;  %v8142_v46 = vrot.slane %v5258_v13, %v6843_v9  ;;  %v5256_v15 = vrot.slane %v5228_v18, %v6830_v5 }
 0x37d   : > { %v2988_v12 = vpop.permute.xlu0 %2987 }
 0x37e   : > { %v3003_v2 = vsel %vm2997_vm15, %v2986_v19, %v2988_v12  ;;  %v4666_v36 = vpop.permute.xlu1 %4665  ;;  %v5123_v19 = vrot.slane %v8026_v26, %v6962_v57  ;;  %v5260_v25 = vcombine.high %v5256_v15, %v5256_v15 }
 0x37f   : > { %3019 = vst.msk [vmem:[%s6851_s24 + $0xbe] sm:$0x1] %vm1698_vm11, %v3003_v2  ;;  %4687 = vst.msk [vmem:[%s6851_s24 + $0x45] sm:$0x1] %vm1698_vm11, %v4666_v36  ;;  %5023 = vrot.lane.b32.xlu0 %v7971_v61, %s6393_s29  ;;  %s6319_s29 = sshll.u32 %s6403_s27, 4  ;;  %s6320_s29 = int_to_ptr.vmem [resolvable:$false] %s6319_s29 }
 0x380   : > { %5180 = vrot.lane.b32.xlu1 %v5143_v41, %s6398_s7  ;;  %v8192_v41 = vrot.slane %v5256_v15, %v6843_v9  ;;  %v8204_v42 = vrot.slane %v5260_v25, %v6843_v9  ;;  %p6322_p0 = scmp.lt.s32.totalorder %s8748_s3, %s6320_s29 }
 0x381   : > { %v2992_v32 = vpop.permute.xlu0 %2991 }
 0x382   : > { %v3004_v23 = vsel %vm2997_vm15, %v2990_v31, %v2992_v32  ;;  %v4670_v11 = vpop.permute.xlu1 %4669 }
 0x383   : > { %3020 = vst.msk [vmem:[%s6851_s24 + $0xde] sm:$0x1] %vm1698_vm11, %v3004_v23  ;;  %4689 = vst.msk [vmem:[%s6851_s24 + $0x85] sm:$0x1] %vm1698_vm11, %v4670_v11  ;;  %5158 = vrot.lane.b32.xlu0 %v5099_v17, %s6398_s7  ;;  %v5398_v23 = vrot.slane %v5390_v51, %v6830_v5 }
 0x384   : > { %5184 = vrot.lane.b32.xlu1 %v5151_v56, %s6398_s7 }
 0x385   : > { %v2980_v8 = vpop.permute.xlu0 %2979  ;;  %v8221_v51 = vrot.slane %v5398_v23, %v6830_v5 }
 0x386   : > { %v3001_v53 = vsel %vm2997_vm15, %v2978_v6, %v2980_v8  ;;  %v4674_v61 = vpop.permute.xlu1 %4673  ;;  %v5139_v6 = vrot.slane %v8045_v40, %v6962_v57 }
 0x387   : > { %3017 = vst.msk [vmem:[%s6851_s24 + $0x7e] sm:$0x1] %vm1698_vm11, %v3001_v53  ;;  %4691 = vst.msk [vmem:[%s6851_s24 + $0xc5] sm:$0x1] %vm1698_vm11, %v4674_v61  ;;  %5162 = vrot.lane.b32.xlu0 %v5107_v44, %s6398_s7  ;;  %v5406_v53 = vcombine.high %v5398_v23, %v5398_v23  ;;  %v5443_v10 = vrot.slane %v8221_v51, %v6843_v9  ;;  %v8249_v30 = vcombine.high %v8221_v51, %v8221_v51 }
 0x388   : > { %5293 = vrot.lane.b32.xlu1 %v8105_v7, %s6394_s30 }
 0x389   : > { %v2996_v39 = vpop.permute.xlu0 %2995  ;;  %v5459_v13 = vrot.slane %v8249_v30, %v6843_v9 }
 0x38a   : > { %v3005_v33 = vsel %vm2997_vm15, %v2994_v38, %v2996_v39  ;;  %v4809_v16 = vpop.permute.xlu1 %4808  ;;  %v5227_v38 = vcombine.high %v8077_v37, %v8077_v37  ;;  %v8235_v39 = vrot.slane %v5406_v53, %v6830_v5 }
 0x38b   : > { %3021 = vst.msk [vmem:[%s6851_s24 + $0xfe] sm:$0x1] %vm1698_vm11, %v3005_v33  ;;  %5166 = vrot.lane.b32.xlu0 %v5115_v22, %s6398_s7 }
 0x38c   : > { %5297 = vrot.lane.b32.xlu1 %v8119_v48, %s6394_s30  ;;  %v5249_v20 = vrot.slane %v5227_v38, %v6830_v5 }
 0x38d   : > { %v4640_v4 = vpop.permute.xlu0 %4639 }
 0x38e   : > { %4658 = vst.msk [vmem:[%s6851_s24 + $0xa3] sm:$0x1] %vm1698_vm11, %v4640_v4  ;;  %v4813_v34 = vpop.permute.xlu1 %4812  ;;  %v8172_v35 = vrot.slane %v5249_v20, %v6843_v9  ;;  %v5259_v40 = vcombine.high %v5249_v20, %v5249_v20 }
 0x38f   : > { %5170 = vrot.lane.b32.xlu0 %v5123_v19, %s6398_s7  ;;  %v5405_v19 = vrot.slane %v5391_v52, %v6830_v5 }
 0x390   : > { %5301 = vrot.lane.b32.xlu1 %v8132_v27, %s6394_s30  ;;  %v8181_v60 = vrot.slane %v5259_v40, %v6843_v9  ;;  %v8324_v40 = vrot.slane %v6945_v50, %v6830_v5 }
 0x391   : > { %v4644_v31 = vpop.permute.xlu0 %4643 }
 0x392   : > { %4660 = vst.msk [vmem:[%s6851_s24 + $0xe3] sm:$0x1] %vm1698_vm11, %v4644_v31  ;;  %v4817_v3 = vpop.permute.xlu1 %4816  ;;  %v8267_v31 = vcombine.high %v8235_v39, %v8235_v39 }
 0x393   : > { %5174 = vrot.lane.b32.xlu0 %v5131_v0, %s6398_s7 }
 0x394   : > { %5305 = vrot.lane.b32.xlu1 %v8142_v46, %s6394_s30 }
 0x395   : > { %v4664_v43 = vpop.permute.xlu0 %4663 }
 0x396   : > { %4686 = vst.msk [vmem:[%s6851_s24 + $0x25] sm:$0x1] %vm1698_vm11, %v4664_v43  ;;  %v4821_v55 = vpop.permute.xlu1 %4820  ;;  %v5407_v43 = vcombine.high %v5405_v19, %v5405_v19 }
 0x397   : > { %5178 = vrot.lane.b32.xlu0 %v5139_v6, %s6398_s7 }
 0x398   : > { %5325 = vrot.lane.b32.xlu1 %v8105_v7, %s6395_s4 }
 0x399   : > { %v4668_v26 = vpop.permute.xlu0 %4667 }
 0x39a   : > { %4688 = vst.msk [vmem:[%s6851_s24 + $0x65] sm:$0x1] %vm1698_vm11, %v4668_v26  ;;  %v4825_v49 = vpop.permute.xlu1 %4824 }
 0x39b   : > { %5182 = vrot.lane.b32.xlu0 %v5147_v28, %s6398_s7  ;;  %v8294_v28 = vrot.slane %v5407_v43, %v6830_v5 }
 0x39c   : > { %5329 = vrot.lane.b32.xlu1 %v8119_v48, %s6395_s4 }
 0x39d   : > { %v4672_v21 = vpop.permute.xlu0 %4671 }
 0x39e   : > { %4690 = vst.msk [vmem:[%s6851_s24 + $0xa5] sm:$0x1] %vm1698_vm11, %v4672_v21  ;;  %v4829_v14 = vpop.permute.xlu1 %4828  ;;  %v5483_v21 = vrot.slane %v8294_v28, %v6843_v9 }
 0x39f   : > { %5186 = vrot.lane.b32.xlu0 %v5155_v24, %s6398_s7 }
 0x3a0   : > { %5333 = vrot.lane.b32.xlu1 %v8132_v27, %s6395_s4 }
 0x3a1   : > { %v4676_v59 = vpop.permute.xlu0 %4675 }
 0x3a2   : > { %4692 = vst.msk [vmem:[%s6851_s24 + $0xe5] sm:$0x1] %vm1698_vm11, %v4676_v59  ;;  %v4833_v54 = vpop.permute.xlu1 %4832 }
 0x3a3   : > { %5295 = vrot.lane.b32.xlu0 %v8172_v35, %s6394_s30 }
 0x3a4   : > { %5337 = vrot.lane.b32.xlu1 %v8142_v46, %s6395_s4 }
 0x3a5   : > { %v4811_v47 = vpop.permute.xlu0 %4810 }
 0x3a6   : > { %v4840_v12 = vsel %vm1950_vm12, %v4809_v16, %v4811_v47  ;;  %v4837_v2 = vpop.permute.xlu1 %4836  ;;  %v5560_v47 = vcombine.high %v6945_v50, %v6945_v50 }
 0x3a7   : > { %4856 = vst.msk [vmem:[%s6851_s24 + $0x7] sm:$0x1] %vm1698_vm11, %v4840_v12  ;;  %5299 = vrot.lane.b32.xlu0 %v8181_v60, %s6394_s30  ;;  %v5583_v12 = vrot.slane %v8324_v40, %v6830_v5 }
 0x3a8   : > { %5357 = vrot.lane.b32.xlu1 %v8105_v7, %s6397_s6 }
 0x3a9   : > { %v4815_v36 = vpop.permute.xlu0 %4814  ;;  %v8350_v25 = vrot.slane %v5583_v12, %v6843_v9 }
 0x3aa   : > { %v4841_v37 = vsel %vm1950_vm12, %v4813_v34, %v4815_v36  ;;  %v4946_v32 = vpop.permute.xlu1 %4945  ;;  %v5455_v36 = vrot.slane %v8235_v39, %v6962_v57 }
 0x3ab   : > { %4857 = vst.msk [vmem:[%s6851_s24 + $0x27] sm:$0x1] %vm1698_vm11, %v4841_v37  ;;  %4969 = vst.msk [vmem:[%s6851_s24 + $0x9] sm:$0x1] %vm1698_vm11, %v4946_v32  ;;  %5303 = vrot.lane.b32.xlu0 %v8192_v41, %s6394_s30  ;;  %v5605_v37 = vcombine.high %v5583_v12, %v5583_v12  ;;  %v8353_v32 = vrot.slane %v5560_v47, %v6830_v5 }
 0x3ac   : > { %5361 = vrot.lane.b32.xlu1 %v8119_v48, %s6397_s6  ;;  %v5451_v48 = vrot.slane %v8235_v39, %v6843_v9 }
 0x3ad   : > { %v4819_v17 = vpop.permute.xlu0 %4818 }
 0x3ae   : > { %v4842_v11 = vsel %vm1950_vm12, %v4817_v3, %v4819_v17  ;;  %v4950_v56 = vpop.permute.xlu1 %4949  ;;  %v5467_v3 = vrot.slane %v8267_v31, %v6843_v9 }
 0x3af   : > { %4858 = vst.msk [vmem:[%s6851_s24 + $0x47] sm:$0x1] %vm1698_vm11, %v4842_v11  ;;  %4971 = vst.msk [vmem:[%s6851_s24 + $0x49] sm:$0x1] %vm1698_vm11, %v4950_v56  ;;  %5307 = vrot.lane.b32.xlu0 %v8204_v42, %s6394_s30  ;;  %v8367_v11 = vrot.slane %v5605_v37, %v6843_v9  ;;  %v5590_v56 = vrot.slane %v8353_v32, %v6830_v5  ;;  %s6321_s30 = scalar_lea.vmem %s6320_s29, 8192 }
 0x3b0   : > { %5365 = vrot.lane.b32.xlu1 %v8132_v27, %s6397_s6  ;;  %p6323_p1 = scmp.lt.s32.totalorder %s6321_s30, %s6315_s13 }
 0x3b1   : > { %v4823_v62 = vpop.permute.xlu0 %4822  ;;  %v5606_v53 = vcombine.high %v5590_v56, %v5590_v56 }
 0x3b2   : > { %v4843_v8 = vsel %vm1950_vm12, %v4821_v55, %v4823_v62  ;;  %v4954_v44 = vpop.permute.xlu1 %4953  ;;  %p6324_p2 = por %p6323_p1, %p6322_p0 }
 0x3b3   : > { %4859 = vst.msk [vmem:[%s6851_s24 + $0x67] sm:$0x1] %vm1698_vm11, %v4843_v8  ;;  %4973 = vst.msk [vmem:[%s6851_s24 + $0x89] sm:$0x1] %vm1698_vm11, %v4954_v44  ;;  %5327 = vrot.lane.b32.xlu0 %v8172_v35, %s6395_s4  ;;  %v5471_v8 = vrot.slane %v8267_v31, %v6962_v57  ;;  %v8397_v39 = vrot.slane %v5606_v53, %v6843_v9 }
 0x3b4   : > { %5369 = vrot.lane.b32.xlu1 %v8142_v46, %s6397_s6  ;;  %v8280_v46 = vrot.slane %v5405_v19, %v6830_v5  ;;  %v5575_v19 = vcombine.high %v8324_v40, %v8324_v40  ;;  %p6325_p3 = pnand %p6324_p2, %p6318_p13 }
 0x3b5   : > { %v4827_v61 = vpop.permute.xlu0 %4826 }
 0x3b6   : > { %v4844_v7 = vsel %vm1950_vm12, %v4825_v49, %v4827_v61  ;;  %v4958_v29 = vpop.permute.xlu1 %4957  ;;  %v5475_v26 = vrot.slane %v8280_v46, %v6843_v9  ;;  %v8307_v24 = vcombine.high %v8280_v46, %v8280_v46 }
 0x3b7   : > { %4860 = vst.msk [vmem:[%s6851_s24 + $0x87] sm:$0x1] %vm1698_vm11, %v4844_v7  ;;  %4975 = vst.msk [vmem:[%s6851_s24 + $0xc9] sm:$0x1] %vm1698_vm11, %v4958_v29  ;;  %5331 = vrot.lane.b32.xlu0 %v8181_v60, %s6395_s4  ;;  %v5479_v7 = vrot.slane %v8280_v46, %v6962_v57  ;;  %v5746_v29 = vrot.slane %v5738_v63, %v6830_v5 }
 0x3b8   : > { %5504 = vrot.lane.b32.xlu1 %v5443_v10, %s6401_s16  ;;  %v5491_v59 = vrot.slane %v8307_v24, %v6843_v9 }
 0x3b9   : > { %v4831_v22 = vpop.permute.xlu0 %4830  ;;  %v8405_v63 = vrot.slane %v5746_v29, %v6830_v5 }
 0x3ba   : > { %v4845_v33 = vsel %vm1950_vm12, %v4829_v14, %v4831_v22  ;;  %v4978_v16 = vpop.permute.xlu1 %4977 }
 0x3bb   : > { %4861 = vst.msk [vmem:[%s6851_s24 + $0xa7] sm:$0x1] %vm1698_vm11, %v4845_v33  ;;  %5001 = vst.msk [vmem:[%s6851_s24 + $0xb] sm:$0x1] %vm1698_vm11, %v4978_v16  ;;  %5335 = vrot.lane.b32.xlu0 %v8192_v41, %s6395_s4  ;;  %v5487_v33 = vrot.slane %v8294_v28, %v6962_v57  ;;  %v5754_v16 = vcombine.high %v5746_v29, %v5746_v29  ;;  %v8440_v46 = vcombine.high %v8405_v63, %v8405_v63 }
 0x3bc   : > { %5508 = vrot.lane.b32.xlu1 %v5451_v48, %s6401_s16 }
 0x3bd   : > { %v4835_v4 = vpop.permute.xlu0 %4834 }
 0x3be   : > { %v4846_v34 = vsel %vm1950_vm12, %v4833_v54, %v4835_v4  ;;  %v4982_v27 = vpop.permute.xlu1 %4981  ;;  %v5447_v54 = vrot.slane %v8221_v51, %v6962_v57  ;;  %v8381_v51 = vrot.slane %v5590_v56, %v6843_v9  ;;  %v5495_v4 = vrot.slane %v8307_v24, %v6962_v57 }
 0x3bf   : > { %4862 = vst.msk [vmem:[%s6851_s24 + $0xc7] sm:$0x1] %vm1698_vm11, %v4846_v34  ;;  %5003 = vst.msk [vmem:[%s6851_s24 + $0x4b] sm:$0x1] %vm1698_vm11, %v4982_v27  ;;  %5339 = vrot.lane.b32.xlu0 %v8204_v42, %s6395_s4  ;;  %v8419_v34 = vrot.slane %v5754_v16, %v6830_v5  ;;  %v5811_v16 = vrot.slane %v8440_v46, %v6962_v57 }
 0x3c0   : > { %5512 = vrot.lane.b32.xlu1 %v5459_v13, %s6401_s16  ;;  %v5791_v13 = vrot.slane %v8405_v63, %v6843_v9 }
 0x3c1   : > { %v4839_v45 = vpop.permute.xlu0 %4838 }
 0x3c2   : > { %v4847_v52 = vsel %vm1950_vm12, %v4837_v2, %v4839_v45  ;;  %v4986_v0 = vpop.permute.xlu1 %4985 }
 0x3c3   : > { %4863 = vst.msk [vmem:[%s6851_s24 + $0xe7] sm:$0x1] %vm1698_vm11, %v4847_v52  ;;  %5005 = vst.msk [vmem:[%s6851_s24 + $0x8b] sm:$0x1] %vm1698_vm11, %v4986_v0  ;;  %5359 = vrot.lane.b32.xlu0 %v8172_v35, %s6397_s6  ;;  %v8320_v35 = vcombine.high %v8294_v28, %v8294_v28  ;;  %v5597_v52 = vrot.slane %v5575_v19, %v6830_v5  ;;  %v5753_v28 = vrot.slane %v5739_v1, %v6830_v5 }
 0x3c4   : > { %5516 = vrot.lane.b32.xlu1 %v5467_v3, %s6401_s16  ;;  %v5799_v3 = vrot.slane %v8419_v34, %v6843_v9 }
 0x3c5   : > { %v4948_v6 = vpop.permute.xlu0 %4947  ;;  %v5499_v15 = vrot.slane %v8320_v35, %v6843_v9  ;;  %v5503_v45 = vrot.slane %v8320_v35, %v6962_v57  ;;  %v5755_v1 = vcombine.high %v5753_v28, %v5753_v28 }
 0x3c6   : > { %4970 = vst.msk [vmem:[%s6851_s24 + $0x29] sm:$0x1] %vm1698_vm11, %v4948_v6  ;;  %v4990_v55 = vpop.permute.xlu1 %4989  ;;  %v8445_v6 = vrot.slane %v5597_v52, %v6843_v9 }
 0x3c7   : > { %5007 = vst.msk [vmem:[%s6851_s24 + $0xcb] sm:$0x1] %vm1698_vm11, %v4990_v55  ;;  %5363 = vrot.lane.b32.xlu0 %v8181_v60, %s6397_s6  ;;  %v5607_v55 = vcombine.high %v5597_v52, %v5597_v52  ;;  %v8488_v47 = vrot.slane %v5755_v1, %v6830_v5 }
 0x3c8   : > { %5520 = vrot.lane.b32.xlu1 %v5475_v26, %s6401_s16  ;;  %v5576_v26 = vcombine.high %v8353_v32, %v8353_v32 }
 0x3c9   : > { %v4952_v38 = vpop.permute.xlu0 %4951  ;;  %v8467_v50 = vrot.slane %v5607_v55, %v6843_v9  ;;  %v5831_v37 = vrot.slane %v8488_v47, %v6843_v9  ;;  %v5835_v52 = vrot.slane %v8488_v47, %v6962_v57 }
 0x3ca   : > { %4972 = vst.msk [vmem:[%s6851_s24 + $0x69] sm:$0x1] %vm1698_vm11, %v4952_v38  ;;  %v5010_v49 = vpop.permute.xlu1 %5009  ;;  %v5604_v58 = vrot.slane %v5576_v26, %v6830_v5 }
 0x3cb   : > { %5033 = vst.msk [vmem:[%s6851_s24 + $0xd] sm:$0x1] %vm1698_vm11, %v5010_v49  ;;  %5367 = vrot.lane.b32.xlu0 %v8192_v41, %s6397_s6  ;;  %v5807_v49 = vrot.slane %v8440_v46, %v6843_v9 }
 0x3cc   : > { %5524 = vrot.lane.b32.xlu1 %v5483_v21, %s6401_s16  ;;  %v8461_v21 = vcombine.high %v8419_v34, %v8419_v34 }
 0x3cd   : > { %v4956_v20 = vpop.permute.xlu0 %4955 }
 0x3ce   : > { %4974 = vst.msk [vmem:[%s6851_s24 + $0xa9] sm:$0x1] %vm1698_vm11, %v4956_v20  ;;  %v5014_v14 = vpop.permute.xlu1 %5013  ;;  %v8471_v20 = vrot.slane %v5753_v28, %v6830_v5  ;;  %v5815_v35 = vrot.slane %v8461_v21, %v6843_v9 }
 0x3cf   : > { %5035 = vst.msk [vmem:[%s6851_s24 + $0x4d] sm:$0x1] %vm1698_vm11, %v5014_v14  ;;  %5371 = vrot.lane.b32.xlu0 %v8204_v42, %s6397_s6  ;;  %v5463_v42 = vrot.slane %v8249_v30, %v6962_v57 }
 0x3d0   : > { %5528 = vrot.lane.b32.xlu1 %v5491_v59, %s6401_s16  ;;  %v5823_v12 = vrot.slane %v8471_v20, %v6843_v9  ;;  %v8510_v32 = vcombine.high %v8471_v20, %v8471_v20 }
 0x3d1   : > { %v4960_v18 = vpop.permute.xlu0 %4959 }
 0x3d2   : > { %4976 = vst.msk [vmem:[%s6851_s24 + $0xe9] sm:$0x1] %vm1698_vm11, %v4960_v18  ;;  %v5018_v60 = vpop.permute.xlu1 %5017  ;;  %v8485_v18 = vrot.slane %v5604_v58, %v6843_v9  ;;  %v5839_v56 = vrot.slane %v8510_v32, %v6843_v9 }
 0x3d3   : > { %5037 = vst.msk [vmem:[%s6851_s24 + $0x8d] sm:$0x1] %vm1698_vm11, %v5018_v60  ;;  %5506 = vrot.lane.b32.xlu0 %v5447_v54, %s6401_s16  ;;  %v5608_v54 = vcombine.high %v5604_v58, %v5604_v58 }
 0x3d4   : > { %5532 = vrot.lane.b32.xlu1 %v5499_v15, %s6401_s16 }
 0x3d5   : > { %v4980_v2 = vpop.permute.xlu0 %4979  ;;  %v8502_v5 = vrot.slane %v5608_v54, %v6843_v9 }
 0x3d6   : > { %5002 = vst.msk [vmem:[%s6851_s24 + $0x2b] sm:$0x1] %vm1698_vm11, %v4980_v2  ;;  %v5022_v41 = vpop.permute.xlu1 %5021 }
 0x3d7   : > { %5039 = vst.msk [vmem:[%s6851_s24 + $0xcd] sm:$0x1] %vm1698_vm11, %v5022_v41  ;;  %5510 = vrot.lane.b32.xlu0 %v5455_v36, %s6401_s16 }
 0x3d8   : > { %5641 = vrot.lane.b32.xlu1 %v8350_v25, %s6399_s8 }
 0x3d9   : > { %v4984_v17 = vpop.permute.xlu0 %4983 }
 0x3da   : > { %5004 = vst.msk [vmem:[%s6851_s24 + $0x6b] sm:$0x1] %vm1698_vm11, %v4984_v17  ;;  %v8364_v23 = vpop.permute.xlu1 %5156 }
 0x3db   : > { %5514 = vrot.lane.b32.xlu0 %v5463_v42, %s6401_s16 }
 0x3dc   : > { %5645 = vrot.lane.b32.xlu1 %v8367_v11, %s6399_s8 }
 0x3dd   : > { %v4988_v62 = vpop.permute.xlu0 %4987 }
 0x3de   : > { %5006 = vst.msk [vmem:[%s6851_s24 + $0xab] sm:$0x1] %vm1698_vm11, %v4988_v62  ;;  %v8378_v44 = vpop.permute.xlu1 %5160  ;;  %v8525_v62 = vcombine.high %v8488_v47, %v8488_v47 }
 0x3df   : > { %5518 = vrot.lane.b32.xlu0 %v5471_v8, %s6401_s16 }
 0x3e0   : > { %5649 = vrot.lane.b32.xlu1 %v8381_v51, %s6399_s8 }
 0x3e1   : > { %v4992_v61 = vpop.permute.xlu0 %4991 }
 0x3e2   : > { %5008 = vst.msk [vmem:[%s6851_s24 + $0xeb] sm:$0x1] %vm1698_vm11, %v4992_v61  ;;  %v8394_v10 = vpop.permute.xlu1 %5164 }
 0x3e3   : > { %5522 = vrot.lane.b32.xlu0 %v5479_v7, %s6401_s16  ;;  %v5847_v7 = vrot.slane %v8525_v62, %v6843_v9 }
 0x3e4   : > { %5653 = vrot.lane.b32.xlu1 %v8397_v39, %s6399_s8 }
 0x3e5   : > { %v5012_v22 = vpop.permute.xlu0 %5011 }
 0x3e6   : > { %5034 = vst.msk [vmem:[%s6851_s24 + $0x2d] sm:$0x1] %vm1698_vm11, %v5012_v22  ;;  %v8409_v48 = vpop.permute.xlu1 %5168 }
 0x3e7   : > { %5526 = vrot.lane.b32.xlu0 %v5487_v33, %s6401_s16 }
 0x3e8   : > { %5673 = vrot.lane.b32.xlu1 %v8350_v25, %s6400_s14 }
 0x3e9   : > { %v5016_v30 = vpop.permute.xlu0 %5015 }
 0x3ea   : > { %5036 = vst.msk [vmem:[%s6851_s24 + $0x6d] sm:$0x1] %vm1698_vm11, %v5016_v30  ;;  %v8423_v27 = vpop.permute.xlu1 %5172 }
 0x3eb   : > { %5530 = vrot.lane.b32.xlu0 %v5495_v4, %s6401_s16  ;;  %v5819_v4 = vrot.slane %v8461_v21, %v6962_v57 }
 0x3ec   : > { %5852 = vrot.lane.b32.xlu1 %v5791_v13, %s6402_s17  ;;  %v5827_v13 = vrot.slane %v8471_v20, %v6962_v57 }
 0x3ed   : > { %v5020_v31 = vpop.permute.xlu0 %5019 }
 0x3ee   : > { %5038 = vst.msk [vmem:[%s6851_s24 + $0xad] sm:$0x1] %vm1698_vm11, %v5020_v31  ;;  %v8434_v0 = vpop.permute.xlu1 %5176 }
 0x3ef   : > { %5534 = vrot.lane.b32.xlu0 %v5503_v45, %s6401_s16 }
 0x3f0   : > { %5856 = vrot.lane.b32.xlu1 %v5799_v3, %s6402_s17 }
 0x3f1   : > { %v5024_v43 = vpop.permute.xlu0 %5023 }
 0x3f2   : > { %5040 = vst.msk [vmem:[%s6851_s24 + $0xed] sm:$0x1] %vm1698_vm11, %v5024_v43  ;;  %v8455_v38 = vpop.permute.xlu1 %5180 }
 0x3f3   : > { %5643 = vrot.lane.b32.xlu0 %v8445_v6, %s6399_s8 }
 0x3f4   : > { %5860 = vrot.lane.b32.xlu1 %v5807_v49, %s6402_s17 }
 0x3f5   : > { %v5159_v24 = vpop.permute.xlu0 %5158 }
 0x3f6   : > { %v5188_v14 = vsel %vm2299_vm13, %v8364_v23, %v5159_v24  ;;  %v8475_v59 = vpop.permute.xlu1 %5184 }
 0x3f7   : > { %5204 = vst.msk [vmem:[%s6851_s24 + $0xf] sm:$0x1] %vm1698_vm11, %v5188_v14  ;;  %5647 = vrot.lane.b32.xlu0 %v8467_v50, %s6399_s8 }
 0x3f8   : > { %5864 = vrot.lane.b32.xlu1 %v5815_v35, %s6402_s17 }
 0x3f9   : > { %v5163_v40 = vpop.permute.xlu0 %5162 }
 0x3fa   : > { %v5189_v60 = vsel %vm2299_vm13, %v8378_v44, %v5163_v40  ;;  %v5294_v15 = vpop.permute.xlu1 %5293  ;;  %v5795_v44 = vrot.slane %v8405_v63, %v6962_v57 }
 0x3fb   : > { %5205 = vst.msk [vmem:[%s6851_s24 + $0x2f] sm:$0x1] %vm1698_vm11, %v5189_v60  ;;  %5317 = vst.msk [vmem:[%s6851_s24 + $0x11] sm:$0x1] %vm1698_vm11, %v5294_v15  ;;  %5651 = vrot.lane.b32.xlu0 %v8485_v18, %s6399_s8 }
 0x3fc   : > { %5868 = vrot.lane.b32.xlu1 %v5823_v12, %s6402_s17 }
 0x3fd   : > { %v5167_v2 = vpop.permute.xlu0 %5166 }
 0x3fe   : > { %v5190_v36 = vsel %vm2299_vm13, %v8394_v10, %v5167_v2  ;;  %v5298_v41 = vpop.permute.xlu1 %5297  ;;  %v5803_v10 = vrot.slane %v8419_v34, %v6962_v57 }
 0x3ff   : > { %5206 = vst.msk [vmem:[%s6851_s24 + $0x4f] sm:$0x1] %vm1698_vm11, %v5190_v36  ;;  %5319 = vst.msk [vmem:[%s6851_s24 + $0x51] sm:$0x1] %vm1698_vm11, %v5298_v41  ;;  %5655 = vrot.lane.b32.xlu0 %v8502_v5, %s6399_s8 }
 0x400   : > { %5872 = vrot.lane.b32.xlu1 %v5831_v37, %s6402_s17 }
 0x401   : > { %v5171_v17 = vpop.permute.xlu0 %5170 }
 0x402   : > { %v5191_v42 = vsel %vm2299_vm13, %v8409_v48, %v5171_v17  ;;  %v5302_v23 = vpop.permute.xlu1 %5301 }
 0x403   : > { %5207 = vst.msk [vmem:[%s6851_s24 + $0x6f] sm:$0x1] %vm1698_vm11, %v5191_v42  ;;  %5321 = vst.msk [vmem:[%s6851_s24 + $0x91] sm:$0x1] %vm1698_vm11, %v5302_v23  ;;  %5675 = vrot.lane.b32.xlu0 %v8445_v6, %s6400_s14 }
 0x404   : > { %5876 = vrot.lane.b32.xlu1 %v5839_v56, %s6402_s17 }
 0x405   : > { %v5175_v8 = vpop.permute.xlu0 %5174 }
 0x406   : > { %v5192_v53 = vsel %vm2299_vm13, %v8423_v27, %v5175_v8  ;;  %v5306_v61 = vpop.permute.xlu1 %5305 }
 0x407   : > { %5208 = vst.msk [vmem:[%s6851_s24 + $0x8f] sm:$0x1] %vm1698_vm11, %v5192_v53  ;;  %5323 = vst.msk [vmem:[%s6851_s24 + $0xd1] sm:$0x1] %vm1698_vm11, %v5306_v61  ;;  %5854 = vrot.lane.b32.xlu0 %v5795_v44, %s6402_s17 }
 0x408   : > { %5880 = vrot.lane.b32.xlu1 %v5847_v7, %s6402_s17 }
 0x409   : > { %v5179_v29 = vpop.permute.xlu0 %5178 }
 0x40a   : > { %v5193_v22 = vsel %vm2299_vm13, %v8434_v0, %v5179_v29  ;;  %v5326_v33 = vpop.permute.xlu1 %5325 }
 0x40b   : > { %5209 = vst.msk [vmem:[%s6851_s24 + $0xaf] sm:$0x1] %vm1698_vm11, %v5193_v22  ;;  %5349 = vst.msk [vmem:[%s6851_s24 + $0x13] sm:$0x1] %vm1698_vm11, %v5326_v33  ;;  %5858 = vrot.lane.b32.xlu0 %v5803_v10, %s6402_s17 }
 0x40c   : > { %5677 = vrot.lane.b32.xlu1 %v8367_v11, %s6400_s14 }
 0x40d   : > { %v5183_v9 = vpop.permute.xlu0 %5182 }
 0x40e   : > { %v5194_v63 = vsel %vm2299_vm13, %v8455_v38, %v5183_v9  ;;  %v5330_v48 = vpop.permute.xlu1 %5329 }
 0x40f   : > { %5210 = vst.msk [vmem:[%s6851_s24 + $0xcf] sm:$0x1] %vm1698_vm11, %v5194_v63  ;;  %5351 = vst.msk [vmem:[%s6851_s24 + $0x53] sm:$0x1] %vm1698_vm11, %v5330_v48  ;;  %5862 = vrot.lane.b32.xlu0 %v5811_v16, %s6402_s17 }
 0x410   : > { %5681 = vrot.lane.b32.xlu1 %v8381_v51, %s6400_s14 }
 0x411   : > { %v5187_v30 = vpop.permute.xlu0 %5186 }
 0x412   : > { %v5195_v19 = vsel %vm2299_vm13, %v8475_v59, %v5187_v30  ;;  %v5334_v34 = vpop.permute.xlu1 %5333 }
 0x413   : > { %5211 = vst.msk [vmem:[%s6851_s24 + $0xef] sm:$0x1] %vm1698_vm11, %v5195_v19  ;;  %5353 = vst.msk [vmem:[%s6851_s24 + $0x93] sm:$0x1] %vm1698_vm11, %v5334_v34  ;;  %5866 = vrot.lane.b32.xlu0 %v5819_v4, %s6402_s17 }
 0x414   : > { %5685 = vrot.lane.b32.xlu1 %v8397_v39, %s6400_s14 }
 0x415   : > { %v5296_v27 = vpop.permute.xlu0 %5295 }
 0x416   : > { %5318 = vst.msk [vmem:[%s6851_s24 + $0x31] sm:$0x1] %vm1698_vm11, %v5296_v27  ;;  %v5338_v31 = vpop.permute.xlu1 %5337 }
 0x417   : > { %5355 = vst.msk [vmem:[%s6851_s24 + $0xd3] sm:$0x1] %vm1698_vm11, %v5338_v31  ;;  %5870 = vrot.lane.b32.xlu0 %v5827_v13, %s6402_s17 }
 0x418   : > { %5705 = vrot.lane.b32.xlu1 %v8350_v25, %s6396_s5  ;;  %v5843_v25 = vrot.slane %v8510_v32, %v6962_v57 }
 0x419   : > { %v5300_v45 = vpop.permute.xlu0 %5299 }
 0x41a   : > { %5320 = vst.msk [vmem:[%s6851_s24 + $0x71] sm:$0x1] %vm1698_vm11, %v5300_v45  ;;  %v5358_v0 = vpop.permute.xlu1 %5357 }
 0x41b   : > { %5381 = vst.msk [vmem:[%s6851_s24 + $0x15] sm:$0x1] %vm1698_vm11, %v5358_v0  ;;  %5874 = vrot.lane.b32.xlu0 %v5835_v52, %s6402_s17 }
 0x41c   : > { %5709 = vrot.lane.b32.xlu1 %v8367_v11, %s6396_s5  ;;  %v5851_v11 = vrot.slane %v8525_v62, %v6962_v57 }
 0x41d   : > { %v5304_v3 = vpop.permute.xlu0 %5303 }
 0x41e   : > { %5322 = vst.msk [vmem:[%s6851_s24 + $0xb1] sm:$0x1] %vm1698_vm11, %v5304_v3  ;;  %v5362_v46 = vpop.permute.xlu1 %5361 }
 0x41f   : > { %5383 = vst.msk [vmem:[%s6851_s24 + $0x55] sm:$0x1] %vm1698_vm11, %v5362_v46  ;;  %5878 = vrot.lane.b32.xlu0 %v5843_v25, %s6402_s17 }
 0x420   : > { %5713 = vrot.lane.b32.xlu1 %v8381_v51, %s6396_s5 }
 0x421   : > { %v5308_v43 = vpop.permute.xlu0 %5307 }
 0x422   : > { %5324 = vst.msk [vmem:[%s6851_s24 + $0xf1] sm:$0x1] %vm1698_vm11, %v5308_v43  ;;  %v5366_v55 = vpop.permute.xlu1 %5365 }
 0x423   : > { %5385 = vst.msk [vmem:[%s6851_s24 + $0x95] sm:$0x1] %vm1698_vm11, %v5366_v55  ;;  %5882 = vrot.lane.b32.xlu0 %v5851_v11, %s6402_s17 }
 0x424   : > { %5717 = vrot.lane.b32.xlu1 %v8397_v39, %s6396_s5 }
 0x425   : > { %v5328_v26 = vpop.permute.xlu0 %5327 }
 0x426   : > { %5350 = vst.msk [vmem:[%s6851_s24 + $0x33] sm:$0x1] %vm1698_vm11, %v5328_v26  ;;  %v5370_v51 = vpop.permute.xlu1 %5369 }
 0x427   : > { %5387 = vst.msk [vmem:[%s6851_s24 + $0xd5] sm:$0x1] %vm1698_vm11, %v5370_v51  ;;  %5679 = vrot.lane.b32.xlu0 %v8467_v50, %s6400_s14 }
 0x429   : > { %v5332_v57 = vpop.permute.xlu0 %5331 }
 0x42a   : > { %5352 = vst.msk [vmem:[%s6851_s24 + $0x73] sm:$0x1] %vm1698_vm11, %v5332_v57  ;;  %v5505_v28 = vpop.permute.xlu1 %5504 }
 0x42b   : > { %5683 = vrot.lane.b32.xlu0 %v8485_v18, %s6400_s14 }
 0x42d   : > { %v5336_v38 = vpop.permute.xlu0 %5335 }
 0x42e   : > { %5354 = vst.msk [vmem:[%s6851_s24 + $0xb3] sm:$0x1] %vm1698_vm11, %v5336_v38  ;;  %v5509_v39 = vpop.permute.xlu1 %5508 }
 0x42f   : > { %5687 = vrot.lane.b32.xlu0 %v8502_v5, %s6400_s14 }
 0x431   : > { %v5340_v49 = vpop.permute.xlu0 %5339 }
 0x432   : > { %5356 = vst.msk [vmem:[%s6851_s24 + $0xf3] sm:$0x1] %vm1698_vm11, %v5340_v49  ;;  %v5513_v21 = vpop.permute.xlu1 %5512 }
 0x433   : > { %5707 = vrot.lane.b32.xlu0 %v8445_v6, %s6396_s5 }
 0x435   : > { %v5360_v24 = vpop.permute.xlu0 %5359 }
 0x436   : > { %5382 = vst.msk [vmem:[%s6851_s24 + $0x35] sm:$0x1] %vm1698_vm11, %v5360_v24  ;;  %v5517_v58 = vpop.permute.xlu1 %5516 }
 0x437   : > { %5711 = vrot.lane.b32.xlu0 %v8467_v50, %s6396_s5 }
 0x439   : > { %v5364_v1 = vpop.permute.xlu0 %5363 }
 0x43a   : > { %5384 = vst.msk [vmem:[%s6851_s24 + $0x75] sm:$0x1] %vm1698_vm11, %v5364_v1  ;;  %v5521_v20 = vpop.permute.xlu1 %5520 }
 0x43b   : > { %5715 = vrot.lane.b32.xlu0 %v8485_v18, %s6396_s5 }
 0x43d   : > { %v5368_v14 = vpop.permute.xlu0 %5367 }
 0x43e   : > { %5386 = vst.msk [vmem:[%s6851_s24 + $0xb5] sm:$0x1] %vm1698_vm11, %v5368_v14  ;;  %v5525_v6 = vpop.permute.xlu1 %5524 }
 0x43f   : > { %5719 = vrot.lane.b32.xlu0 %v8502_v5, %s6396_s5 }
 0x441   : > { %v5372_v59 = vpop.permute.xlu0 %5371 }
 0x442   : > { %5388 = vst.msk [vmem:[%s6851_s24 + $0xf5] sm:$0x1] %vm1698_vm11, %v5372_v59  ;;  %v5529_v50 = vpop.permute.xlu1 %5528 }
 0x445   : > { %v5507_v35 = vpop.permute.xlu0 %5506 }
 0x446   : > { %v5536_v40 = vsel %vm2648_vm14, %v5505_v28, %v5507_v35  ;;  %v5533_v54 = vpop.permute.xlu1 %5532 }
 0x447   : > { %5552 = vst.msk [vmem:[%s6851_s24 + $0x17] sm:$0x1] %vm1698_vm11, %v5536_v40 }
 0x449   : > { %v5511_v18 = vpop.permute.xlu0 %5510 }
 0x44a   : > { %v5537_v47 = vsel %vm2648_vm14, %v5509_v39, %v5511_v18  ;;  %v5642_v60 = vpop.permute.xlu1 %5641 }
 0x44b   : > { %5553 = vst.msk [vmem:[%s6851_s24 + $0x37] sm:$0x1] %vm1698_vm11, %v5537_v47  ;;  %5665 = vst.msk [vmem:[%s6851_s24 + $0x19] sm:$0x1] %vm1698_vm11, %v5642_v60 }
 0x44d   : > { %v5515_v15 = vpop.permute.xlu0 %5514 }
 0x44e   : > { %v5538_v12 = vsel %vm2648_vm14, %v5513_v21, %v5515_v15  ;;  %v5646_v2 = vpop.permute.xlu1 %5645 }
 0x44f   : > { %5554 = vst.msk [vmem:[%s6851_s24 + $0x57] sm:$0x1] %vm1698_vm11, %v5538_v12  ;;  %5667 = vst.msk [vmem:[%s6851_s24 + $0x59] sm:$0x1] %vm1698_vm11, %v5646_v2 }
 0x451   : > { %v5519_v5 = vpop.permute.xlu0 %5518 }
 0x452   : > { %v5539_v36 = vsel %vm2648_vm14, %v5517_v58, %v5519_v5  ;;  %v5650_v41 = vpop.permute.xlu1 %5649 }
 0x453   : > { %5555 = vst.msk [vmem:[%s6851_s24 + $0x77] sm:$0x1] %vm1698_vm11, %v5539_v36  ;;  %5669 = vst.msk [vmem:[%s6851_s24 + $0x99] sm:$0x1] %vm1698_vm11, %v5650_v41 }
 0x455   : > { %v5523_v37 = vpop.permute.xlu0 %5522 }
 0x456   : > { %v5540_v32 = vsel %vm2648_vm14, %v5521_v20, %v5523_v37  ;;  %v5654_v17 = vpop.permute.xlu1 %5653 }
 0x457   : > { %5556 = vst.msk [vmem:[%s6851_s24 + $0x97] sm:$0x1] %vm1698_vm11, %v5540_v32  ;;  %5671 = vst.msk [vmem:[%s6851_s24 + $0xd9] sm:$0x1] %vm1698_vm11, %v5654_v17 }
 0x459   : > { %v5527_v42 = vpop.permute.xlu0 %5526 }
 0x45a   : > { %v5541_v23 = vsel %vm2648_vm14, %v5525_v6, %v5527_v42  ;;  %v5674_v56 = vpop.permute.xlu1 %5673 }
 0x45b   : > { %5557 = vst.msk [vmem:[%s6851_s24 + $0xb7] sm:$0x1] %vm1698_vm11, %v5541_v23  ;;  %5697 = vst.msk [vmem:[%s6851_s24 + $0x1b] sm:$0x1] %vm1698_vm11, %v5674_v56 }
 0x45d   : > { %v5531_v62 = vpop.permute.xlu0 %5530 }
 0x45e   : > { %v5542_v8 = vsel %vm2648_vm14, %v5529_v50, %v5531_v62  ;;  %v5853_v44 = vpop.permute.xlu1 %5852 }
 0x45f   : > { %5558 = vst.msk [vmem:[%s6851_s24 + $0xd7] sm:$0x1] %vm1698_vm11, %v5542_v8 }
 0x461   : > { %v5535_v53 = vpop.permute.xlu0 %5534 }
 0x462   : > { %v5543_v61 = vsel %vm2648_vm14, %v5533_v54, %v5535_v53  ;;  %v5857_v7 = vpop.permute.xlu1 %5856 }
 0x463   : > { %5559 = vst.msk [vmem:[%s6851_s24 + $0xf7] sm:$0x1] %vm1698_vm11, %v5543_v61 }
 0x465   : > { %v5644_v29 = vpop.permute.xlu0 %5643 }
 0x466   : > { %5666 = vst.msk [vmem:[%s6851_s24 + $0x39] sm:$0x1] %vm1698_vm11, %v5644_v29  ;;  %v5861_v10 = vpop.permute.xlu1 %5860 }
 0x469   : > { %v5648_v22 = vpop.permute.xlu0 %5647 }
 0x46a   : > { %5668 = vst.msk [vmem:[%s6851_s24 + $0x79] sm:$0x1] %vm1698_vm11, %v5648_v22  ;;  %v5865_v33 = vpop.permute.xlu1 %5864 }
 0x46d   : > { %v5652_v9 = vpop.permute.xlu0 %5651 }
 0x46e   : > { %5670 = vst.msk [vmem:[%s6851_s24 + $0xb9] sm:$0x1] %vm1698_vm11, %v5652_v9  ;;  %v5869_v16 = vpop.permute.xlu1 %5868 }
 0x471   : > { %v5656_v63 = vpop.permute.xlu0 %5655 }
 0x472   : > { %5672 = vst.msk [vmem:[%s6851_s24 + $0xf9] sm:$0x1] %vm1698_vm11, %v5656_v63  ;;  %v5873_v48 = vpop.permute.xlu1 %5872 }
 0x475   : > { %v5676_v30 = vpop.permute.xlu0 %5675 }
 0x476   : > { %5698 = vst.msk [vmem:[%s6851_s24 + $0x3b] sm:$0x1] %vm1698_vm11, %v5676_v30  ;;  %v5877_v4 = vpop.permute.xlu1 %5876 }
 0x479   : > { %v5855_v19 = vpop.permute.xlu0 %5854 }
 0x47a   : > { %v5884_v34 = vsel %vm2997_vm15, %v5853_v44, %v5855_v19  ;;  %v5881_v27 = vpop.permute.xlu1 %5880 }
 0x47b   : > { %5900 = vst.msk [vmem:[%s6851_s24 + $0x1f] sm:$0x1] %vm1698_vm11, %v5884_v34 }
 0x47d   : > { %v5859_v13 = vpop.permute.xlu0 %5858 }
 0x47e   : > { %v5885_v31 = vsel %vm2997_vm15, %v5857_v7, %v5859_v13  ;;  %v5678_v45 = vpop.permute.xlu1 %5677 }
 0x47f   : > { %5901 = vst.msk [vmem:[%s6851_s24 + $0x3f] sm:$0x1] %vm1698_vm11, %v5885_v31  ;;  %5699 = vst.msk [vmem:[%s6851_s24 + $0x5b] sm:$0x1] %vm1698_vm11, %v5678_v45 }
 0x481   : > { %v5863_v52 = vpop.permute.xlu0 %5862 }
 0x482   : > { %v5886_v0 = vsel %vm2997_vm15, %v5861_v10, %v5863_v52  ;;  %v5682_v3 = vpop.permute.xlu1 %5681 }
 0x483   : > { %5902 = vst.msk [vmem:[%s6851_s24 + $0x5f] sm:$0x1] %vm1698_vm11, %v5886_v0  ;;  %5701 = vst.msk [vmem:[%s6851_s24 + $0x9b] sm:$0x1] %vm1698_vm11, %v5682_v3 }
 0x485   : > { %v5867_v25 = vpop.permute.xlu0 %5866 }
 0x486   : > { %v5887_v46 = vsel %vm2997_vm15, %v5865_v33, %v5867_v25  ;;  %v5686_v43 = vpop.permute.xlu1 %5685 }
 0x487   : > { %5903 = vst.msk [vmem:[%s6851_s24 + $0x7f] sm:$0x1] %vm1698_vm11, %v5887_v46  ;;  %5703 = vst.msk [vmem:[%s6851_s24 + $0xdb] sm:$0x1] %vm1698_vm11, %v5686_v43 }
 0x489   : > { %v5871_v11 = vpop.permute.xlu0 %5870 }
 0x48a   : > { %v5888_v55 = vsel %vm2997_vm15, %v5869_v16, %v5871_v11  ;;  %v5706_v26 = vpop.permute.xlu1 %5705 }
 0x48b   : > { %5904 = vst.msk [vmem:[%s6851_s24 + $0x9f] sm:$0x1] %vm1698_vm11, %v5888_v55  ;;  %5729 = vst.msk [vmem:[%s6851_s24 + $0x1d] sm:$0x1] %vm1698_vm11, %v5706_v26 }
 0x48d   : > { %v5875_v51 = vpop.permute.xlu0 %5874 }
 0x48e   : > { %v5889_v57 = vsel %vm2997_vm15, %v5873_v48, %v5875_v51  ;;  %v5710_v28 = vpop.permute.xlu1 %5709 }
 0x48f   : > { %5905 = vst.msk [vmem:[%s6851_s24 + $0xbf] sm:$0x1] %vm1698_vm11, %v5889_v57  ;;  %5731 = vst.msk [vmem:[%s6851_s24 + $0x5d] sm:$0x1] %vm1698_vm11, %v5710_v28 }
 0x491   : > { %v5879_v38 = vpop.permute.xlu0 %5878 }
 0x492   : > { %v5890_v39 = vsel %vm2997_vm15, %v5877_v4, %v5879_v38  ;;  %v5714_v49 = vpop.permute.xlu1 %5713 }
 0x493   : > { %5906 = vst.msk [vmem:[%s6851_s24 + $0xdf] sm:$0x1] %vm1698_vm11, %v5890_v39  ;;  %5733 = vst.msk [vmem:[%s6851_s24 + $0x9d] sm:$0x1] %vm1698_vm11, %v5714_v49 }
 0x495   : > { %v5883_v21 = vpop.permute.xlu0 %5882 }
 0x496   : > { %v5891_v24 = vsel %vm2997_vm15, %v5881_v27, %v5883_v21  ;;  %v5718_v58 = vpop.permute.xlu1 %5717 }
 0x497   : > { %5907 = vst.msk [vmem:[%s6851_s24 + $0xff] sm:$0x1] %vm1698_vm11, %v5891_v24  ;;  %5735 = vst.msk [vmem:[%s6851_s24 + $0xdd] sm:$0x1] %vm1698_vm11, %v5718_v58 }
 0x499   : > { %v5680_v1 = vpop.permute.xlu0 %5679 }
 0x49a   : > { %5700 = vst.msk [vmem:[%s6851_s24 + $0x7b] sm:$0x1] %vm1698_vm11, %v5680_v1 }
 0x49d   : > { %v5684_v20 = vpop.permute.xlu0 %5683 }
 0x49e   : > { %5702 = vst.msk [vmem:[%s6851_s24 + $0xbb] sm:$0x1] %vm1698_vm11, %v5684_v20 }
 0x4a1   : > { %v5688_v14 = vpop.permute.xlu0 %5687 }
 0x4a2   : > { %5704 = vst.msk [vmem:[%s6851_s24 + $0xfb] sm:$0x1] %vm1698_vm11, %v5688_v14 }
 0x4a5   : > { %v5708_v6 = vpop.permute.xlu0 %5707 }
 0x4a6   : > { %5730 = vst.msk [vmem:[%s6851_s24 + $0x3d] sm:$0x1] %vm1698_vm11, %v5708_v6 }
 0x4a9   : > { %v5712_v59 = vpop.permute.xlu0 %5711 }
 0x4aa   : > { %5732 = vst.msk [vmem:[%s6851_s24 + $0x7d] sm:$0x1] %vm1698_vm11, %v5712_v59 }
 0x4ad   : > { %v5716_v50 = vpop.permute.xlu0 %5715 }
 0x4ae   : > { %5734 = vst.msk [vmem:[%s6851_s24 + $0xbd] sm:$0x1] %vm1698_vm11, %v5716_v50 }
 0x4b1   : > { %v5720_v35 = vpop.permute.xlu0 %5719 }
 0x4b2   : > { %5736 = vst.msk [vmem:[%s6851_s24 + $0xfd] sm:$0x1] %vm1698_vm11, %v5720_v35 }
 0x4b3   : > { %6328 = shalt.err (!%p6325_p3)
}
 0x4b4   : > { %s6329_s22 = scalar_lea.hbm %s8746_s25, 4096  ;;  %s6333_s5 = scalar_lea.hbm %s8797_s2, 8192 }
 0x4b5   : > { %p6330_p4 = scmp.ne.s32.totalorder %s8746_s25, %s6329_s22  ;;  %p6334_p9 = scmp.lt.u32.totalorder %s8746_s25, %s8797_s2 }
 0x4b6   : > { %p6335_p10 = scmp.lt.u32.totalorder %s6333_s5, %s6329_s22  ;;  %p6337_p12 = scmp.lt.u32.totalorder %s6329_s22, %s8746_s25 }
 0x4b7   : > { %p6331_p7 = pnand %p6330_p4, %p6459_p5 }
 0x4b8   : > { %p6336_p11 = por %p6335_p10, %p6334_p9 }
 0x4b9   : > { %p6332_p8 = pneg %p6331_p7 }
 0x4ba   : > { %p6338_p13 = por %p6337_p12, %p6336_p11 }
 0x4bc   : > { %p6339_p0 = pnand %p6338_p13, %p6332_p8 }
 0x4be   : > { %6342 = shalt.err (!%p6339_p0)
}
 0x4bf   : > { %s6404_s8 = smov 128   ;;  %s6405_s14 = smov 8  }
 0x4c0   : > { %6248 = dma.vmem_to_hbm [thread:$0]  (%p6459_p5), %s8748_s3, 4096, %s8746_s25, %s8754_s26, %s6404_s8, %s6404_s8, %s6405_s14  }
 0x4c1 PF: > { %p6254_p1 = scmp.ge.s32.totalorder %s6377_s12, 2  ;;  %s5937_s16 = sand.u32 1, %s6365_s9  }
 0x4c2   : > { %s5938_s17 = scalar_lea.sflag [#allocation3], %s5937_s16 }
 0x4c3   : > { %p6251_p2 = pnand %p6254_p1, %p6463_p6 }
 0x4c5   : > { %6360 = dma.done.wait (!%p6251_p2), %s5938_s17, 4096  }
 0x4c6   : > { %6362 = vsyncadd (!%p6251_p2), %s5938_s17, 4294963200  ;;  %p12_p3 = scmp.ge.s32.totalorder %s6446_s15, 4   ;;  %s8800_s9 = smov %s6369_s10 }
 0x4c7   : > { %s8801_s10 = smov %s6373_s11  ;;  %s8802_s11 = smov %s6457_s18 }
 0x4c8   : > { %s8803_s12 = smov %s6446_s15  ;;  %14 = sbr.rel (!%p12_p3) target bundleno = 3 (0x3), region = 74 }
 0x4cf   :  { %5943 = vsyncpa [#allocation3], 1 }
 0x4d0   :  { %5945 = vsyncpa [#allocation3 + $0x1], 1 }

</bundles_post_ra>
